<compile_context>
chip_gen: v6e
topology: v6e:2x2x1
jax: 0.10.0
libtpu: 0.0.40
codegen_flags: <defaults>
</compile_context>

<pallas_src>
import math
import jax
import jax.numpy as jnp
from jax.experimental import pallas as pl
from jax.experimental.pallas import tpu as pltpu


# ----------------------------- generation-dependent caps -----------------------------

def _tpu_vmem_capacity_bytes():
    try:
        info = pltpu.get_tpu_info()
        return int(getattr(info, "vmem_capacity_bytes"))
    except Exception:
        return 64 * 1024 * 1024          # conservative (v7x-sized) fallback


_VMEM_CAPACITY = _tpu_vmem_capacity_bytes()
if _VMEM_CAPACITY >= 100 * 1024 * 1024:   # v5e / v6e: 128 MiB physical VMEM
    _VMEM_LIMIT = 64 * 1024 * 1024
    _TM_CAP = 512                         # amortize per-grid-step overhead
    _TN_CAP = 1024
else:                                     # v7x: 64 MiB physical VMEM
    _VMEM_LIMIT = 32 * 1024 * 1024
    _TM_CAP = 256
    _TN_CAP = 512


# ----------------------------- in-kernel helpers -----------------------------

def _erf(x):
    # Abramowitz & Stegun 7.1.26 rational approximation, |err| <= 1.5e-7:
    # reproduces torch.nn.GELU() (exact erf GELU) with TPU-lowerable ops only.
    a1, a2, a3, a4, a5 = 0.254829592, -0.284496736, 1.421413741, -1.453152027, 1.061405429
    p = 0.3275911
    s = jnp.where(x >= 0.0, 1.0, -1.0)
    ax = jnp.abs(x)
    t = 1.0 / (1.0 + p * ax)
    poly = ((((a5 * t + a4) * t + a3) * t + a2) * t + a1) * t
    return s * (1.0 - poly * jnp.exp(-ax * ax))


def _gelu_exact(x):
    return 0.5 * x * (1.0 + _erf(x * 0.7071067811865476))


def _layernorm_f32(x, g, b):
    mean = jnp.mean(x, axis=-1, keepdims=True)
    var = jnp.mean((x - mean) ** 2, axis=-1, keepdims=True)
    return (x - mean) * jax.lax.rsqrt(var + 1e-5) * g + b   # torch eps = 1e-5


# ----------------------------- Pallas kernels -----------------------------

def _matmul_kernel(x_ref, w_ref, o_ref):
    acc = jnp.dot(x_ref[...].astype(jnp.bfloat16), w_ref[...],
                  preferred_element_type=jnp.float32)
    o_ref[...] = acc.astype(o_ref.dtype)


def _matmul_bias_kernel(x_ref, w_ref, b_ref, o_ref):
    acc = jnp.dot(x_ref[...].astype(jnp.bfloat16), w_ref[...],
                  preferred_element_type=jnp.float32)
    o_ref[...] = (acc + b_ref[...]).astype(o_ref.dtype)


def _matmul_bias_res_kernel(x_ref, w_ref, b_ref, r_ref, o_ref):
    # out = x @ w + b + residual   (fused attention out-projection epilogue)
    acc = jnp.dot(x_ref[...].astype(jnp.bfloat16), w_ref[...],
                  preferred_element_type=jnp.float32)
    o_ref[...] = (acc + b_ref[...] + r_ref[...].astype(jnp.float32)).astype(o_ref.dtype)


def _ln_matmul_kernel(x_ref, g_ref, b_ref, w_ref, bias_ref, o_ref, xn_ref):
    # out = LayerNorm(x) @ w + bias
    # LN stats + f32->bf16 cast computed once per row tile (at the first column
    # tile) and cached in VMEM scratch; reused across all output-column tiles.
    @pl.when(pl.program_id(1) == 0)
    def _():
        x = x_ref[...].astype(jnp.float32)
        xn_ref[...] = _layernorm_f32(x, g_ref[...], b_ref[...]).astype(jnp.bfloat16)

    acc = jnp.dot(xn_ref[...], w_ref[...], preferred_element_type=jnp.float32)
    o_ref[...] = (acc + bias_ref[...]).astype(o_ref.dtype)


def _ln_mlp_res_kernel(x_ref, g_ref, b_ref, w1_ref, b1_ref, w2_ref, b2_ref, o_ref):
    # out = x + fc2(GELU(fc1(LayerNorm(x))))
    x = x_ref[...].astype(jnp.float32)
    xn = _layernorm_f32(x, g_ref[...], b_ref[...])
    h = jnp.dot(xn.astype(jnp.bfloat16), w1_ref[...],
                preferred_element_type=jnp.float32) + b1_ref[...]
    h = _gelu_exact(h)
    o = jnp.dot(h.astype(jnp.bfloat16), w2_ref[...],
                preferred_element_type=jnp.float32) + b2_ref[...]
    o_ref[...] = (x + o).astype(o_ref.dtype)


def _self_attn_kernel(q_ref, k_ref, v_ref, o_ref):
    # One (batch*head, window) per grid step: the score tensor is a single
    # (L, L) f32 block, bounded regardless of the number of windows.
    q = q_ref[0, 0]                           # (L, hd) bf16
    k = k_ref[0, 0]
    v = v_ref[0, 0]
    scale = 1.0 / math.sqrt(q.shape[-1])
    s = jnp.einsum('qd,kd->qk', q, k, preferred_element_type=jnp.float32) * scale
    s = s - jnp.max(s, axis=-1, keepdims=True)
    p = jnp.exp(s)
    p = p * pl.reciprocal(jnp.sum(p, axis=-1, keepdims=True), approx=True)
    o = jnp.einsum('qk,kd->qd', p.astype(v.dtype), v,
                   preferred_element_type=jnp.float32)
    o_ref[0, 0] = o.astype(o_ref.dtype)


def _cross_attn_kernel(q_ref, k_ref, v_ref, o_ref):
    # One (batch*head, query-row-tile) per grid step; K/V block is shared
    # across every query tile (constant index_map keeps it resident).
    q = q_ref[0]                              # (tq, hd) bf16
    k = k_ref[0]                              # (Lk, hd) bf16
    v = v_ref[0]
    scale = 1.0 / math.sqrt(q.shape[-1])
    s = jnp.einsum('qd,kd->qk', q, k, preferred_element_type=jnp.float32) * scale
    s = s - jnp.max(s, axis=-1, keepdims=True)
    p = jnp.exp(s)
    p = p * pl.reciprocal(jnp.sum(p, axis=-1, keepdims=True), approx=True)
    o = jnp.einsum('qk,kd->qd', p.astype(v.dtype), v,
                   preferred_element_type=jnp.float32)
    o_ref[0] = o.astype(o_ref.dtype)


# ----------------------------- tiling helpers -----------------------------

def _row_tile(M):
    # tile size must be a multiple of 8 or the full dim; caps are generation
    # dependent (_TM_CAP is always a multiple of 8).
    if M <= _TM_CAP:
        return M
    return _TM_CAP


def _col_tile(N):
    # tile size must be a multiple of 128 or the full dim.  Fallbacks are
    # 256-aligned (v6e/v7x MXU is 256 wide); 384 intentionally excluded.
    if N <= _TN_CAP:
        return N
    for t in (1024, 512, 256, 128):
        if t <= _TN_CAP and N % t == 0:
            return t
    return N


def _divisor_tile(n, cap):
    # largest tile from a power-of-two ladder that divides n (avoids boundary
    # blocks for the attention query axis).
    for t in (1024, 512, 256, 128, 64, 32, 16, 8):
        if t <= cap and n % t == 0:
            return t
    return n


def _compiler_params(sem):
    return pltpu.CompilerParams(dimension_semantics=sem,
                                vmem_limit_bytes=_VMEM_LIMIT)


# ----------------------------- kernel wrappers -----------------------------

def pallas_matmul(x, w, bias=None, residual=None, out_dtype=jnp.float32):
    """y = x @ w (+ bias) (+ residual); tiled over rows and output columns."""
    K, N = w.shape
    lead = x.shape[:-1]
    x2 = x.reshape(-1, K)
    M = x2.shape[0]
    tm = _row_tile(M)
    tn = _col_tile(N)
    grid = (pl.cdiv(M, tm), pl.cdiv(N, tn))   # boundary row blocks are masked

    x_spec = pl.BlockSpec((tm, K), lambda i, j: (i, 0))
    w_spec = pl.BlockSpec((K, tn), lambda i, j: (0, j))
    b_spec = pl.BlockSpec((1, tn), lambda i, j: (0, j))
    o_spec = pl.BlockSpec((tm, tn), lambda i, j: (i, j))
    cp = _compiler_params(("parallel", "parallel"))
    ce = pl.CostEstimate(
        flops=2 * M * K * N, transcendentals=0,
        bytes_accessed=(M * K * x2.dtype.itemsize + K * N * w.dtype.itemsize
                        + M * N * jnp.dtype(out_dtype).itemsize))

    if residual is not None:
        if bias is None:
            bias = jnp.zeros((N,), jnp.float32)
        r2 = residual.reshape(-1, N)
        out = pl.pallas_call(
            _matmul_bias_res_kernel,
            out_shape=jax.ShapeDtypeStruct((M, N), out_dtype),
            grid=grid,
            in_specs=[x_spec, w_spec, b_spec, o_spec],
            out_specs=o_spec, compiler_params=cp, cost_estimate=ce,
        )(x2, w, bias.reshape(1, N), r2)
    elif bias is not None:
        out = pl.pallas_call(
            _matmul_bias_kernel,
            out_shape=jax.ShapeDtypeStruct((M, N), out_dtype),
            grid=grid,
            in_specs=[x_spec, w_spec, b_spec],
            out_specs=o_spec, compiler_params=cp, cost_estimate=ce,
        )(x2, w, bias.reshape(1, N))
    else:
        out = pl.pallas_call(
            _matmul_kernel,
            out_shape=jax.ShapeDtypeStruct((M, N), out_dtype),
            grid=grid,
            in_specs=[x_spec, w_spec],
            out_specs=o_spec, compiler_params=cp, cost_estimate=ce,
        )(x2, w)

    return out.reshape(lead + (N,))


def pallas_ln_matmul(x, g, b, w, bias=None, out_dtype=jnp.float32):
    """y = LayerNorm(x) @ w (+ bias); LN cached per row tile, tiled over columns."""
    K, N = w.shape
    lead = x.shape[:-1]
    x2 = x.reshape(-1, K)
    M = x2.shape[0]
    tm = _row_tile(M)
    tn = _col_tile(N)
    if bias is None:
        bias = jnp.zeros((N,), jnp.float32)
    grid = (pl.cdiv(M, tm), pl.cdiv(N, tn))
    ce = pl.CostEstimate(
        flops=2 * M * K * N + 8 * M * K, transcendentals=M,
        bytes_accessed=(M * K * x2.dtype.itemsize + K * N * w.dtype.itemsize
                        + M * N * jnp.dtype(out_dtype).itemsize))
    out = pl.pallas_call(
        _ln_matmul_kernel,
        out_shape=jax.ShapeDtypeStruct((M, N), out_dtype),
        grid=grid,
        in_specs=[pl.BlockSpec((tm, K), lambda i, j: (i, 0)),
                  pl.BlockSpec((1, K), lambda i, j: (0, 0)),
                  pl.BlockSpec((1, K), lambda i, j: (0, 0)),
                  pl.BlockSpec((K, tn), lambda i, j: (0, j)),
                  pl.BlockSpec((1, tn), lambda i, j: (0, j))],
        out_specs=pl.BlockSpec((tm, tn), lambda i, j: (i, j)),
        scratch_shapes=[pltpu.VMEM((tm, K), jnp.bfloat16)],     # cached LN(x) tile
        # column axis must be "arbitrary" (innermost) so the LN scratch computed
        # at j == 0 is valid for all j of the same row tile.
        compiler_params=_compiler_params(("parallel", "arbitrary")),
        cost_estimate=ce,
    )(x2, g.reshape(1, K), b.reshape(1, K), w, bias.reshape(1, N))
    return out.reshape(lead + (N,))


def pallas_ln_mlp_res(x, g, b, mp):
    """y = x + fc2(GELU(fc1(LayerNorm(x)))); tiled over rows."""
    C = x.shape[-1]
    Dm = mp['w1'].shape[1]
    lead = x.shape[:-1]
    x2 = x.reshape(-1, C)
    M = x2.shape[0]
    tm = _row_tile(M)
    ce = pl.CostEstimate(
        flops=4 * M * C * Dm + 16 * M * C, transcendentals=M * Dm + M,
        bytes_accessed=2 * M * C * 4 + 2 * C * Dm * 2)
    out = pl.pallas_call(
        _ln_mlp_res_kernel,
        out_shape=jax.ShapeDtypeStruct((M, C), jnp.float32),
        grid=(pl.cdiv(M, tm),),
        in_specs=[pl.BlockSpec((tm, C), lambda i: (i, 0)),
                  pl.BlockSpec((1, C), lambda i: (0, 0)),
                  pl.BlockSpec((1, C), lambda i: (0, 0)),
                  pl.BlockSpec((C, Dm), lambda i: (0, 0)),
                  pl.BlockSpec((1, Dm), lambda i: (0, 0)),
                  pl.BlockSpec((Dm, C), lambda i: (0, 0)),
                  pl.BlockSpec((1, C), lambda i: (0, 0))],
        out_specs=pl.BlockSpec((tm, C), lambda i: (i, 0)),
        compiler_params=_compiler_params(("parallel",)),
        cost_estimate=ce,
    )(x2, g.reshape(1, C), b.reshape(1, C),
      mp['w1'], mp['b1'].reshape(1, Dm), mp['w2'], mp['b2'].reshape(1, C))
    return out.reshape(lead + (C,))


def pallas_self_attention(q, k, v):
    # q, k, v: (B*nh, nWin, L, hd) bf16.  Grid = (B*nh, nWin): one window per
    # step bounds the f32 score block to (L, L) and gives many grid steps for
    # dual-TC balance and double-buffered pipelining.
    G, nWin, L, hd = q.shape
    spec = pl.BlockSpec((1, 1, L, hd), lambda g, w: (g, w, 0, 0))
    # TODO(synk): with head_dim < 128 the (…, hd) output stores are lane-masked;
    # packing heads into one lane-dense block needs hd (or a head group) to be a
    # multiple of 128 — left in split-head layout for portability at small dims.
    return pl.pallas_call(
        _self_attn_kernel,
        out_shape=jax.ShapeDtypeStruct((G, nWin, L, hd), jnp.bfloat16),
        grid=(G, nWin),
        in_specs=[spec, spec, spec],
        out_specs=spec,
        compiler_params=_compiler_params(("parallel", "parallel")),
    )(q, k, v)


def pallas_cross_attention(q, k, v):
    # q: (B*nh, Nq, hd); k, v: (B*nh, Lk, hd) shared by every query tile.
    G, Nq, hd = q.shape
    Lk = k.shape[1]
    tq = _divisor_tile(Nq, _TM_CAP)           # bounds the (tq, Lk) score block
    q_spec = pl.BlockSpec((1, tq, hd), lambda g, t: (g, t, 0))
    kv_spec = pl.BlockSpec((1, Lk, hd), lambda g, t: (g, 0, 0))   # stays resident
    return pl.pallas_call(
        _cross_attn_kernel,
        out_shape=jax.ShapeDtypeStruct((G, Nq, hd), jnp.bfloat16),
        grid=(G, Nq // tq),
        in_specs=[q_spec, kv_spec, kv_spec],
        out_specs=q_spec,
        compiler_params=_compiler_params(("parallel", "parallel")),
    )(q, k, v)


# ----------------------------- layout plumbing (plain JAX) -----------------------------

def _window_tokens(x, cfg, spatiotemporal):
    # (B, N, C) -> (B, nWin, L, C), matching torch unfold ordering.
    B, N, C = x.shape
    F = cfg['frames']
    Hp = cfg['image_size'] // cfg['patch_size']
    if not spatiotemporal:
        return x.reshape(B, F, Hp * Hp, C)
    T, H, W = cfg['window_size']
    nT, nH, nW = F // T, Hp // H, Hp // W
    xw = x.reshape(B, nT, T, nH, H, nW, W, C).transpose(0, 1, 3, 5, 2, 4, 6, 7)
    return xw.reshape(B, nT * nH * nW, T * H * W, C)


def _unwindow_tokens(xw, cfg, spatiotemporal):
    # (B, nWin, L, C) -> (B, N, C)
    B, nWin, L, C = xw.shape
    F = cfg['frames']
    Hp = cfg['image_size'] // cfg['patch_size']
    N = F * Hp * Hp
    if not spatiotemporal:
        return xw.reshape(B, N, C)
    T, H, W = cfg['window_size']
    nT, nH, nW = F // T, Hp // H, Hp // W
    x = xw.reshape(B, nT, nH, nW, T, H, W, C).transpose(0, 1, 4, 2, 5, 3, 6, 7)
    return x.reshape(B, N, C)


# ----------------------------- model forward -----------------------------

def _self_attention_block(x, ap, ln_g, ln_b, cfg, spatiotemporal):
    B, N, C = x.shape
    nh = cfg['num_heads']
    hd = C // nh
    # LN1 fused with the concatenated QKV projection (no bias in torch q/k/v).
    qkv = pallas_ln_matmul(x, ln_g, ln_b, ap['wqkv'], bias=None, out_dtype=jnp.bfloat16)
    qkv_w = _window_tokens(qkv, cfg, spatiotemporal)            # (B, nWin, L, 3C)
    _, nWin, L, _ = qkv_w.shape
    qkv_w = qkv_w.reshape(B, nWin, L, 3, nh, hd).transpose(3, 0, 4, 1, 2, 5)
    q = qkv_w[0].reshape(B * nh, nWin, L, hd)
    k = qkv_w[1].reshape(B * nh, nWin, L, hd)
    v = qkv_w[2].reshape(B * nh, nWin, L, hd)
    o = pallas_self_attention(q, k, v)                          # (B*nh, nWin, L, hd)
    o = o.reshape(B, nh, nWin, L, hd).transpose(0, 2, 3, 1, 4).reshape(B, nWin, L, C)
    o = _unwindow_tokens(o, cfg, spatiotemporal)                # (B, N, C)
    # output projection fused with bias and residual add
    return pallas_matmul(o, ap['wo'], bias=ap['bo'], residual=x)


def _cross_attention_block(x, c, ap, ln_g, ln_b, cfg):
    # Cross attention: every window sees the same context, so attention is
    # computed directly in token layout (the window permute is a no-op here).
    B, N, C = x.shape
    nh = cfg['num_heads']
    hd = C // nh
    q = pallas_ln_matmul(x, ln_g, ln_b, ap['wq'], bias=None, out_dtype=jnp.bfloat16)
    q = q.reshape(B, N, nh, hd).transpose(0, 2, 1, 3).reshape(B * nh, N, hd)
    kv = pallas_matmul(c, ap['wkv'], bias=None, out_dtype=jnp.bfloat16)   # (B, Lk, 2C)
    Lk = kv.shape[1]
    kv = kv.reshape(B, Lk, 2, nh, hd).transpose(2, 0, 3, 1, 4)            # (2, B, nh, Lk, hd)
    k = kv[0].reshape(B * nh, Lk, hd)
    v = kv[1].reshape(B * nh, Lk, hd)
    o = pallas_cross_attention(q, k, v)                                   # (B*nh, N, hd)
    o = o.reshape(B, nh, N, hd).transpose(0, 2, 1, 3).reshape(B, N, C)
    return pallas_matmul(o, ap['wo'], bias=ap['bo'], residual=x)


def transformer_block(x, c, bp, cfg, spatiotemporal):
    x = _self_attention_block(x, bp['self_attn'], bp['ln1_g'], bp['ln1_b'],
                              cfg, spatiotemporal)
    x = _cross_attention_block(x, c, bp['cross_attn'], bp['ln2_g'], bp['ln2_b'], cfg)
    x = pallas_ln_mlp_res(x, bp['ln3_g'], bp['ln3_b'], bp['mlp'])
    return x


def dit_forward(params, x, actions, cfg):
    B = x.shape[0]
    Cin, F, S, P = cfg['query_dim'], cfg['frames'], cfg['image_size'], cfg['patch_size']
    Hd = cfg['hidden_dim']
    Hp = S // P
    np_ = Hp * Hp

    # EmbeddingProjection: Conv3d kernel (1,P,P)/stride (1,P,P) == per-patch linear.
    xp = x.reshape(B, Cin, F, Hp, P, Hp, P).transpose(0, 2, 3, 5, 1, 4, 6)
    xp = xp.reshape(B * F * np_, Cin * P * P)
    tok = pallas_matmul(xp, params['embed_w'], bias=params['embed_b']).reshape(B, F * np_, Hd)
    pos = params['temporal_pos'][:, None, :] + params['spatial_pos'][None, :, :]
    tok = tok + pos.reshape(1, F * np_, Hd)
    # dropout: inference-mode identity

    # ActionEmbedding (gather kept in plain JAX)
    c = jnp.take(params['action_emb'], actions, axis=0) + params['action_pos']

    for li, bp in enumerate(params['blocks'], start=1):
        # torch: i odd -> SpatialBlock, i even -> SpatialtemporalBlock
        tok = transformer_block(tok, c, bp, cfg, spatiotemporal=(li % 2 == 0))

    # final LN fused with the MlpHead linear, then unpatchify
    y = pallas_ln_matmul(tok, params['ln_g'], params['ln_b'],
                         params['head_w'], bias=params['head_b'])
    y = y.reshape(B, F, Hp, Hp, P, P, Cin).transpose(0, 6, 1, 2, 4, 3, 5)
    return y.reshape(B, Cin, F, S, S)


# ----------------------------- params -----------------------------

def init_params(key, cfg):
    keys = iter(jax.random.split(key, 256))

    def nrm(shape, scale=0.02, dtype=jnp.float32):
        return (scale * jax.random.normal(next(keys), shape)).astype(dtype)

    Hd, Cin, P = cfg['hidden_dim'], cfg['query_dim'], cfg['patch_size']
    F, S, ctx = cfg['frames'], cfg['image_size'], cfg['context_dim']
    Hp = S // P
    np_ = Hp * Hp
    bf = jnp.bfloat16

    params = {
        'embed_w': nrm((Cin * P * P, Hd), dtype=bf),
        'embed_b': nrm((Hd,)),
        'temporal_pos': jnp.ones((F, Hd), jnp.float32),          # torch.ones init
        'spatial_pos': jnp.ones((np_, Hd), jnp.float32),          # torch.ones init
        'action_emb': nrm((4 + 1, ctx), scale=1.0),               # nn.Embedding(5, ctx)
        'action_pos': jnp.zeros((1, cfg['seq_len'], ctx), jnp.float32),
        'ln_g': jnp.ones((Hd,), jnp.float32),
        'ln_b': jnp.zeros((Hd,), jnp.float32),
        'head_w': nrm((Hd, P * P * Cin), dtype=bf),
        'head_b': nrm((P * P * Cin,)),
    }

    def self_attn_params():
        return {'wqkv': nrm((Hd, 3 * Hd), dtype=bf),              # [q | k | v]
                'wo': nrm((Hd, Hd), dtype=bf),
                'bo': jnp.zeros((Hd,), jnp.float32)}

    def cross_attn_params():
        return {'wq': nrm((Hd, Hd), dtype=bf),
                'wkv': nrm((ctx, 2 * Hd), dtype=bf),              # [k | v]
                'wo': nrm((Hd, Hd), dtype=bf),
                'bo': jnp.zeros((Hd,), jnp.float32)}

    blocks = []
    for _ in range(1, cfg['n_layers'] + 1):
        blocks.append({
            'ln1_g': jnp.ones((Hd,), jnp.float32), 'ln1_b': jnp.zeros((Hd,), jnp.float32),
            'ln2_g': jnp.ones((Hd,), jnp.float32), 'ln2_b': jnp.zeros((Hd,), jnp.float32),
            'ln3_g': jnp.ones((Hd,), jnp.float32), 'ln3_b': jnp.zeros((Hd,), jnp.float32),
            'self_attn': self_attn_params(),
            'cross_attn': cross_attn_params(),
            # torch MLP(hidden_dim, hidden_dim): mlp_dim == hidden_dim
            'mlp': {'w1': nrm((Hd, Hd), dtype=bf), 'b1': jnp.zeros((Hd,), jnp.float32),
                    'w2': nrm((Hd, Hd), dtype=bf), 'b2': jnp.zeros((Hd,), jnp.float32)},
        })
    params['blocks'] = blocks
    return params


# ----------------------------- main -----------------------------

if __name__ == "__main__":
    cfg = dict(n_layers=2, image_size=16, hidden_dim=32, query_dim=4, context_dim=32,
               frames=4, patch_size=4, window_size=(2, 2, 2), seq_len=8,
               num_heads=4, dropout=0.0)

    key = jax.random.PRNGKey(0)
    kp, kx, kc = jax.random.split(key, 3)
    params = init_params(kp, cfg)

    x = jax.random.normal(
        kx, (2, cfg['query_dim'], cfg['frames'], cfg['image_size'], cfg['image_size']),
        dtype=jnp.float32)
    actions = jax.random.randint(kc, (2, cfg['seq_len']), 0, 5)   # num_actions=4 -> ids in [0,4]

    fwd = jax.jit(lambda p, xx, aa: dit_forward(p, xx, aa, cfg))
    out = jax.block_until_ready(fwd(params, x, actions))

    assert out.shape == (2, cfg['query_dim'], cfg['frames'], cfg['image_size'], cfg['image_size'])
    assert out.dtype == jnp.float32
    print("KERNEL_OK")
</pallas_src>

<mosaic_0001>
module attributes {stable_mosaic.version = 11 : i64} {
  func.func @_matmul_bias_kernel(%arg0: i32, %arg1: i32, %arg2: memref<128x64xf32, #tpu.memory_space<vmem>>, %arg3: memref<64x32xbf16, #tpu.memory_space<vmem>>, %arg4: memref<1x32xf32, #tpu.memory_space<vmem>>, %arg5: memref<128x32xf32, #tpu.memory_space<vmem>>) attributes {dimension_semantics = [#tpu.dimension_semantics<parallel>, #tpu.dimension_semantics<parallel>], iteration_bounds = array<i64: 1, 1>, scalar_prefetch = 0 : i64, scratch_operands = 0 : i64, tpu.core_type = #tpu.core_type<tc>, window_params = [{transform_indices = @transform_0, window_bounds = array<i64: 128, 64>}, {transform_indices = @transform_1, window_bounds = array<i64: 64, 32>}, {transform_indices = @transform_2, window_bounds = array<i64: 1, 32>}, {transform_indices = @transform_3, window_bounds = array<i64: 128, 32>}]} {
    %c0 = arith.constant 0 : index
    %c0_0 = arith.constant 0 : index
    %0 = vector.load %arg2[%c0, %c0_0] : memref<128x64xf32, #tpu.memory_space<vmem>>, vector<128x64xf32>
    %1 = arith.truncf %0 : vector<128x64xf32> to vector<128x64xbf16>
    %c0_1 = arith.constant 0 : index
    %c0_2 = arith.constant 0 : index
    %2 = vector.load %arg3[%c0_1, %c0_2] : memref<64x32xbf16, #tpu.memory_space<vmem>>, vector<64x32xbf16>
    %cst = arith.constant dense<0.000000e+00> : vector<128x32xf32>
    %3 = tpu.matmul %1, %2, %cst {dimension_numbers = #tpu.dot_dimension_numbers<[1], [0], [0], [1], [0, 0, 1, 1], [], []>} : vector<128x64xbf16>, vector<64x32xbf16>, vector<128x32xf32> -> vector<128x32xf32>
    %c0_3 = arith.constant 0 : index
    %c0_4 = arith.constant 0 : index
    %4 = vector.load %arg4[%c0_3, %c0_4] : memref<1x32xf32, #tpu.memory_space<vmem>>, vector<1x32xf32>
    %5 = vector.broadcast %4 : vector<1x32xf32> to vector<128x32xf32>
    %6 = arith.addf %3, %5 : vector<128x32xf32>
    %c0_5 = arith.constant 0 : index
    %c0_6 = arith.constant 0 : index
    %7 = vector.load %arg5[%c0_5, %c0_6] : memref<128x32xf32, #tpu.memory_space<vmem>>, vector<128x32xf32>
    tpu.vector_store %arg5[%c0_5, %c0_6], %6 {strides = array<i32>} : memref<128x32xf32, #tpu.memory_space<vmem>>, vector<128x32xf32>,
    return
  }
  func.func @transform_0(%arg0: i32, %arg1: i32) -> (i32, i32) {
    %c0_i32 = arith.constant 0 : i32
    %c0_i32_0 = arith.constant 0 : i32
    return %arg0, %c0_i32 : i32, i32
  }
  func.func @transform_1(%arg0: i32, %arg1: i32) -> (i32, i32) {
    %c0_i32 = arith.constant 0 : i32
    %c0_i32_0 = arith.constant 0 : i32
    return %c0_i32, %arg1 : i32, i32
  }
  func.func @transform_2(%arg0: i32, %arg1: i32) -> (i32, i32) {
    %c0_i32 = arith.constant 0 : i32
    %c0_i32_0 = arith.constant 0 : i32
    return %c0_i32, %arg1 : i32, i32
  }
  func.func @transform_3(%arg0: i32, %arg1: i32) -> (i32, i32) {
    %c0_i32 = arith.constant 0 : i32
    return %arg0, %arg1 : i32, i32
  }
}

module attributes {stable_mosaic.version = 11 : i64} {
  func.func @_ln_matmul_kernel(%arg0: i32, %arg1: i32, %arg2: memref<128x32xf32, #tpu.memory_space<vmem>>, %arg3: memref<1x32xf32, #tpu.memory_space<vmem>>, %arg4: memref<1x32xf32, #tpu.memory_space<vmem>>, %arg5: memref<32x96xbf16, #tpu.memory_space<vmem>>, %arg6: memref<1x96xf32, #tpu.memory_space<vmem>>, %arg7: memref<128x96xbf16, #tpu.memory_space<vmem>>, %arg8: memref<128x32xbf16, #tpu.memory_space<vmem>>) attributes {dimension_semantics = [#tpu.dimension_semantics<parallel>, #tpu.dimension_semantics<arbitrary>], iteration_bounds = array<i64: 1, 1>, scalar_prefetch = 0 : i64, scratch_operands = 1 : i64, tpu.core_type = #tpu.core_type<tc>, window_params = [{transform_indices = @transform_0, window_bounds = array<i64: 128, 32>}, {pipeline_mode = #tpu.pipeline_mode<synchronous>, transform_indices = @transform_1, window_bounds = array<i64: 1, 32>}, {pipeline_mode = #tpu.pipeline_mode<synchronous>, transform_indices = @transform_2, window_bounds = array<i64: 1, 32>}, {transform_indices = @transform_3, window_bounds = array<i64: 32, 96>}, {transform_indices = @transform_4, window_bounds = array<i64: 1, 96>}, {transform_indices = @transform_5, window_bounds = array<i64: 128, 96>}]} {
    %c0_i32 = arith.constant 0 : i32
    %0 = arith.cmpi eq, %arg1, %c0_i32 : i32
    %1 = arith.extui %0 : i1 to i32
    %c0_i32_0 = arith.constant 0 : i32
    %2 = arith.cmpi ne, %1, %c0_i32_0 : i32
    scf.if %2 {
      %c0_8 = arith.constant 0 : index
      %c0_9 = arith.constant 0 : index
      %11 = vector.load %arg2[%c0_8, %c0_9] : memref<128x32xf32, #tpu.memory_space<vmem>>, vector<128x32xf32>
      %c0_10 = arith.constant 0 : index
      %c0_11 = arith.constant 0 : index
      %12 = vector.load %arg3[%c0_10, %c0_11] : memref<1x32xf32, #tpu.memory_space<vmem>>, vector<1x32xf32>
      %c0_12 = arith.constant 0 : index
      %c0_13 = arith.constant 0 : index
      %13 = vector.load %arg4[%c0_12, %c0_13] : memref<1x32xf32, #tpu.memory_space<vmem>>, vector<1x32xf32>
      %cst_14 = arith.constant dense<0.000000e+00> : vector<128xf32>
      %14 = vector.multi_reduction <add>, %11, %cst_14 [1] : vector<128x32xf32> to vector<128xf32>
      %15 = vector.shape_cast %14 : vector<128xf32> to vector<128x1xf32>
      %cst_15 = arith.constant 3.200000e+01 : f32
      %16 = vector.broadcast %cst_15 : f32 to vector<128x1xf32>
      %17 = arith.divf %15, %16 : vector<128x1xf32>
      %18 = vector.broadcast %17 : vector<128x1xf32> to vector<128x32xf32>
      %19 = arith.subf %11, %18 : vector<128x32xf32>
      %20 = arith.mulf %19, %19 : vector<128x32xf32>
      %cst_16 = arith.constant dense<0.000000e+00> : vector<128xf32>
      %21 = vector.multi_reduction <add>, %20, %cst_16 [1] : vector<128x32xf32> to vector<128xf32>
      %22 = vector.shape_cast %21 : vector<128xf32> to vector<128x1xf32>
      %cst_17 = arith.constant 3.200000e+01 : f32
      %23 = vector.broadcast %cst_17 : f32 to vector<128x1xf32>
      %24 = arith.divf %22, %23 : vector<128x1xf32>
      %25 = vector.broadcast %17 : vector<128x1xf32> to vector<128x32xf32>
      %26 = arith.subf %11, %25 : vector<128x32xf32>
      %cst_18 = arith.constant 9.99999974E-6 : f32
      %27 = vector.broadcast %cst_18 : f32 to vector<128x1xf32>
      %28 = arith.addf %24, %27 : vector<128x1xf32>
      %29 = math.rsqrt %28 : vector<128x1xf32>
      %30 = vector.broadcast %29 : vector<128x1xf32> to vector<128x32xf32>
      %31 = arith.mulf %26, %30 : vector<128x32xf32>
      %32 = vector.broadcast %12 : vector<1x32xf32> to vector<128x32xf32>
      %33 = arith.mulf %31, %32 : vector<128x32xf32>
      %34 = vector.broadcast %13 : vector<1x32xf32> to vector<128x32xf32>
      %35 = arith.addf %33, %34 : vector<128x32xf32>
      %36 = arith.truncf %35 : vector<128x32xf32> to vector<128x32xbf16>
      %c0_19 = arith.constant 0 : index
      %c0_20 = arith.constant 0 : index
      %37 = vector.load %arg8[%c0_19, %c0_20] : memref<128x32xbf16, #tpu.memory_space<vmem>>, vector<128x32xbf16>
      tpu.vector_store %arg8[%c0_19, %c0_20], %36 {strides = array<i32>} : memref<128x32xbf16, #tpu.memory_space<vmem>>, vector<128x32xbf16>,
    } else {
    }
    %c0 = arith.constant 0 : index
    %c0_1 = arith.constant 0 : index
    %3 = vector.load %arg8[%c0, %c0_1] : memref<128x32xbf16, #tpu.memory_space<vmem>>, vector<128x32xbf16>
    %c0_2 = arith.constant 0 : index
    %c0_3 = arith.constant 0 : index
    %4 = vector.load %arg5[%c0_2, %c0_3] : memref<32x96xbf16, #tpu.memory_space<vmem>>, vector<32x96xbf16>
    %cst = arith.constant dense<0.000000e+00> : vector<128x96xf32>
    %5 = tpu.matmul %3, %4, %cst {dimension_numbers = #tpu.dot_dimension_numbers<[1], [0], [0], [1], [0, 0, 1, 1], [], []>} : vector<128x32xbf16>, vector<32x96xbf16>, vector<128x96xf32> -> vector<128x96xf32>
    %c0_4 = arith.constant 0 : index
    %c0_5 = arith.constant 0 : index
    %6 = vector.load %arg6[%c0_4, %c0_5] : memref<1x96xf32, #tpu.memory_space<vmem>>, vector<1x96xf32>
    %7 = vector.broadcast %6 : vector<1x96xf32> to vector<128x96xf32>
    %8 = arith.addf %5, %7 : vector<128x96xf32>
    %9 = arith.truncf %8 : vector<128x96xf32> to vector<128x96xbf16>
    %c0_6 = arith.constant 0 : index
    %c0_7 = arith.constant 0 : index
    %10 = vector.load %arg7[%c0_6, %c0_7] : memref<128x96xbf16, #tpu.memory_space<vmem>>, vector<128x96xbf16>
    tpu.vector_store %arg7[%c0_6, %c0_7], %9 {strides = array<i32>} : memref<128x96xbf16, #tpu.memory_space<vmem>>, vector<128x96xbf16>,
    return
  }
  func.func @transform_0(%arg0: i32, %arg1: i32) -> (i32, i32) {
    %c0_i32 = arith.constant 0 : i32
    %c0_i32_0 = arith.constant 0 : i32
    return %arg0, %c0_i32 : i32, i32
  }
  func.func @transform_1(%arg0: i32, %arg1: i32) -> (i32, i32) {
    %c0_i32 = arith.constant 0 : i32
    %c0_i32_0 = arith.constant 0 : i32
    %c0_i32_1 = arith.constant 0 : i32
    return %c0_i32, %c0_i32_0 : i32, i32
  }
  func.func @transform_2(%arg0: i32, %arg1: i32) -> (i32, i32) {
    %c0_i32 = arith.constant 0 : i32
    %c0_i32_0 = arith.constant 0 : i32
    %c0_i32_1 = arith.constant 0 : i32
    return %c0_i32, %c0_i32_0 : i32, i32
  }
  func.func @transform_3(%arg0: i32, %arg1: i32) -> (i32, i32) {
    %c0_i32 = arith.constant 0 : i32
    %c0_i32_0 = arith.constant 0 : i32
    return %c0_i32, %arg1 : i32, i32
  }
  func.func @transform_4(%arg0: i32, %arg1: i32) -> (i32, i32) {
    %c0_i32 = arith.constant 0 : i32
    %c0_i32_0 = arith.constant 0 : i32
    return %c0_i32, %arg1 : i32, i32
  }
  func.func @transform_5(%arg0: i32, %arg1: i32) -> (i32, i32) {
    %c0_i32 = arith.constant 0 : i32
    return %arg0, %arg1 : i32, i32
  }
}

module attributes {stable_mosaic.version = 11 : i64} {
  func.func @_self_attn_kernel(%arg0: i32, %arg1: i32, %arg2: memref<1x1x16x8xbf16, #tpu.memory_space<vmem>>, %arg3: memref<1x1x16x8xbf16, #tpu.memory_space<vmem>>, %arg4: memref<1x1x16x8xbf16, #tpu.memory_space<vmem>>, %arg5: memref<1x1x16x8xbf16, #tpu.memory_space<vmem>>) attributes {dimension_semantics = [#tpu.dimension_semantics<parallel>, #tpu.dimension_semantics<parallel>], iteration_bounds = array<i64: 8, 4>, scalar_prefetch = 0 : i64, scratch_operands = 0 : i64, tpu.core_type = #tpu.core_type<tc>, window_params = [{transform_indices = @transform_0, window_bounds = array<i64: 1, 1, 16, 8>}, {transform_indices = @transform_1, window_bounds = array<i64: 1, 1, 16, 8>}, {transform_indices = @transform_2, window_bounds = array<i64: 1, 1, 16, 8>}, {transform_indices = @transform_3, window_bounds = array<i64: 1, 1, 16, 8>}]} {
    %c0 = arith.constant 0 : index
    %c0_0 = arith.constant 0 : index
    %c0_1 = arith.constant 0 : index
    %c0_2 = arith.constant 0 : index
    %0 = vector.load %arg2[%c0, %c0_0, %c0_1, %c0_2] : memref<1x1x16x8xbf16, #tpu.memory_space<vmem>>, vector<1x1x16x8xbf16>
    %1 = vector.shape_cast %0 : vector<1x1x16x8xbf16> to vector<16x8xbf16>
    %c0_3 = arith.constant 0 : index
    %c0_4 = arith.constant 0 : index
    %c0_5 = arith.constant 0 : index
    %c0_6 = arith.constant 0 : index
    %2 = vector.load %arg3[%c0_3, %c0_4, %c0_5, %c0_6] : memref<1x1x16x8xbf16, #tpu.memory_space<vmem>>, vector<1x1x16x8xbf16>
    %3 = vector.shape_cast %2 : vector<1x1x16x8xbf16> to vector<16x8xbf16>
    %c0_7 = arith.constant 0 : index
    %c0_8 = arith.constant 0 : index
    %c0_9 = arith.constant 0 : index
    %c0_10 = arith.constant 0 : index
    %4 = vector.load %arg4[%c0_7, %c0_8, %c0_9, %c0_10] : memref<1x1x16x8xbf16, #tpu.memory_space<vmem>>, vector<1x1x16x8xbf16>
    %5 = vector.shape_cast %4 : vector<1x1x16x8xbf16> to vector<16x8xbf16>
    "tpu.trace_start"() <{level = 10 : i32, message = "qd,kd->qk"}> : () -> ()
    %cst = arith.constant dense<0.000000e+00> : vector<16x16xf32>
    %6 = tpu.matmul %1, %3, %cst {dimension_numbers = #tpu.dot_dimension_numbers<[1], [1], [0], [0], [0, 0, 1, 0], [], []>} : vector<16x8xbf16>, vector<16x8xbf16>, vector<16x16xf32> -> vector<16x16xf32>
    "tpu.trace_stop"() : () -> ()
    %cst_11 = arith.constant 0.353553385 : f32
    %7 = vector.broadcast %cst_11 : f32 to vector<16x16xf32>
    %8 = arith.mulf %6, %7 : vector<16x16xf32>
    %cst_12 = arith.constant dense<0xFF800000> : vector<16xf32>
    %9 = vector.multi_reduction <maximumf>, %8, %cst_12 [1] : vector<16x16xf32> to vector<16xf32>
    %10 = vector.shape_cast %9 : vector<16xf32> to vector<16x1xf32>
    %11 = vector.broadcast %10 : vector<16x1xf32> to vector<16x16xf32>
    %12 = arith.subf %8, %11 : vector<16x16xf32>
    %13 = math.exp %12 : vector<16x16xf32>
    %cst_13 = arith.constant dense<0.000000e+00> : vector<16xf32>
    %14 = vector.multi_reduction <add>, %13, %cst_13 [1] : vector<16x16xf32> to vector<16xf32>
    %15 = vector.shape_cast %14 : vector<16xf32> to vector<16x1xf32>
    %16 = tpu.reciprocal %15 {approx = true} : vector<16x1xf32> -> vector<16x1xf32>
    %17 = vector.broadcast %16 : vector<16x1xf32> to vector<16x16xf32>
    %18 = arith.mulf %13, %17 : vector<16x16xf32>
    %19 = arith.truncf %18 : vector<16x16xf32> to vector<16x16xbf16>
    "tpu.trace_start"() <{level = 10 : i32, message = "qk,kd->qd"}> : () -> ()
    %cst_14 = arith.constant dense<0.000000e+00> : vector<16x8xf32>
    %20 = tpu.matmul %19, %5, %cst_14 {dimension_numbers = #tpu.dot_dimension_numbers<[1], [0], [0], [1], [0, 0, 1, 1], [], []>} : vector<16x16xbf16>, vector<16x8xbf16>, vector<16x8xf32> -> vector<16x8xf32>
    "tpu.trace_stop"() : () -> ()
    %21 = arith.truncf %20 : vector<16x8xf32> to vector<16x8xbf16>
    %c0_15 = arith.constant 0 : index
    %c0_16 = arith.constant 0 : index
    %c0_17 = arith.constant 0 : index
    %c0_18 = arith.constant 0 : index
    %22 = vector.load %arg5[%c0_15, %c0_16, %c0_17, %c0_18] : memref<1x1x16x8xbf16, #tpu.memory_space<vmem>>, vector<1x1x16x8xbf16>
    %23 = vector.shape_cast %22 : vector<1x1x16x8xbf16> to vector<16x8xbf16>
    %24 = vector.shape_cast %21 : vector<16x8xbf16> to vector<1x1x16x8xbf16>
    tpu.vector_store %arg5[%c0_15, %c0_16, %c0_17, %c0_18], %24 {strides = array<i32>} : memref<1x1x16x8xbf16, #tpu.memory_space<vmem>>, vector<1x1x16x8xbf16>,
    return
  }
  func.func @transform_0(%arg0: i32, %arg1: i32) -> (i32, i32, i32, i32) {
    %c0_i32 = arith.constant 0 : i32
    %c0_i32_0 = arith.constant 0 : i32
    %c0_i32_1 = arith.constant 0 : i32
    return %arg0, %arg1, %c0_i32, %c0_i32_0 : i32, i32, i32, i32
  }
  func.func @transform_1(%arg0: i32, %arg1: i32) -> (i32, i32, i32, i32) {
    %c0_i32 = arith.constant 0 : i32
    %c0_i32_0 = arith.constant 0 : i32
    %c0_i32_1 = arith.constant 0 : i32
    return %arg0, %arg1, %c0_i32, %c0_i32_0 : i32, i32, i32, i32
  }
  func.func @transform_2(%arg0: i32, %arg1: i32) -> (i32, i32, i32, i32) {
    %c0_i32 = arith.constant 0 : i32
    %c0_i32_0 = arith.constant 0 : i32
    %c0_i32_1 = arith.constant 0 : i32
    return %arg0, %arg1, %c0_i32, %c0_i32_0 : i32, i32, i32, i32
  }
  func.func @transform_3(%arg0: i32, %arg1: i32) -> (i32, i32, i32, i32) {
    %c0_i32 = arith.constant 0 : i32
    %c0_i32_0 = arith.constant 0 : i32
    %c0_i32_1 = arith.constant 0 : i32
    return %arg0, %arg1, %c0_i32, %c0_i32_0 : i32, i32, i32, i32
  }
}

module attributes {stable_mosaic.version = 11 : i64} {
  func.func @_matmul_bias_res_kernel(%arg0: i32, %arg1: i32, %arg2: memref<128x32xbf16, #tpu.memory_space<vmem>>, %arg3: memref<32x32xbf16, #tpu.memory_space<vmem>>, %arg4: memref<1x32xf32, #tpu.memory_space<vmem>>, %arg5: memref<128x32xf32, #tpu.memory_space<vmem>>, %arg6: memref<128x32xf32, #tpu.memory_space<vmem>>) attributes {dimension_semantics = [#tpu.dimension_semantics<parallel>, #tpu.dimension_semantics<parallel>], iteration_bounds = array<i64: 1, 1>, scalar_prefetch = 0 : i64, scratch_operands = 0 : i64, tpu.core_type = #tpu.core_type<tc>, window_params = [{transform_indices = @transform_0, window_bounds = array<i64: 128, 32>}, {transform_indices = @transform_1, window_bounds = array<i64: 32, 32>}, {transform_indices = @transform_2, window_bounds = array<i64: 1, 32>}, {transform_indices = @transform_3, window_bounds = array<i64: 128, 32>}, {transform_indices = @transform_4, window_bounds = array<i64: 128, 32>}]} {
    %c0 = arith.constant 0 : index
    %c0_0 = arith.constant 0 : index
    %0 = vector.load %arg2[%c0, %c0_0] : memref<128x32xbf16, #tpu.memory_space<vmem>>, vector<128x32xbf16>
    %c0_1 = arith.constant 0 : index
    %c0_2 = arith.constant 0 : index
    %1 = vector.load %arg3[%c0_1, %c0_2] : memref<32x32xbf16, #tpu.memory_space<vmem>>, vector<32x32xbf16>
    %cst = arith.constant dense<0.000000e+00> : vector<128x32xf32>
    %2 = tpu.matmul %0, %1, %cst {dimension_numbers = #tpu.dot_dimension_numbers<[1], [0], [0], [1], [0, 0, 1, 1], [], []>} : vector<128x32xbf16>, vector<32x32xbf16>, vector<128x32xf32> -> vector<128x32xf32>
    %c0_3 = arith.constant 0 : index
    %c0_4 = arith.constant 0 : index
    %3 = vector.load %arg4[%c0_3, %c0_4] : memref<1x32xf32, #tpu.memory_space<vmem>>, vector<1x32xf32>
    %4 = vector.broadcast %3 : vector<1x32xf32> to vector<128x32xf32>
    %5 = arith.addf %2, %4 : vector<128x32xf32>
    %c0_5 = arith.constant 0 : index
    %c0_6 = arith.constant 0 : index
    %6 = vector.load %arg5[%c0_5, %c0_6] : memref<128x32xf32, #tpu.memory_space<vmem>>, vector<128x32xf32>
    %7 = arith.addf %5, %6 : vector<128x32xf32>
    %c0_7 = arith.constant 0 : index
    %c0_8 = arith.constant 0 : index
    %8 = vector.load %arg6[%c0_7, %c0_8] : memref<128x32xf32, #tpu.memory_space<vmem>>, vector<128x32xf32>
    tpu.vector_store %arg6[%c0_7, %c0_8], %7 {strides = array<i32>} : memref<128x32xf32, #tpu.memory_space<vmem>>, vector<128x32xf32>,
    return
  }
  func.func @transform_0(%arg0: i32, %arg1: i32) -> (i32, i32) {
    %c0_i32 = arith.constant 0 : i32
    %c0_i32_0 = arith.constant 0 : i32
    return %arg0, %c0_i32 : i32, i32
  }
  func.func @transform_1(%arg0: i32, %arg1: i32) -> (i32, i32) {
    %c0_i32 = arith.constant 0 : i32
    %c0_i32_0 = arith.constant 0 : i32
    return %c0_i32, %arg1 : i32, i32
  }
  func.func @transform_2(%arg0: i32, %arg1: i32) -> (i32, i32) {
    %c0_i32 = arith.constant 0 : i32
    %c0_i32_0 = arith.constant 0 : i32
    return %c0_i32, %arg1 : i32, i32
  }
  func.func @transform_3(%arg0: i32, %arg1: i32) -> (i32, i32) {
    %c0_i32 = arith.constant 0 : i32
    return %arg0, %arg1 : i32, i32
  }
  func.func @transform_4(%arg0: i32, %arg1: i32) -> (i32, i32) {
    %c0_i32 = arith.constant 0 : i32
    return %arg0, %arg1 : i32, i32
  }
}

module attributes {stable_mosaic.version = 11 : i64} {
  func.func @_ln_matmul_kernel(%arg0: i32, %arg1: i32, %arg2: memref<128x32xf32, #tpu.memory_space<vmem>>, %arg3: memref<1x32xf32, #tpu.memory_space<vmem>>, %arg4: memref<1x32xf32, #tpu.memory_space<vmem>>, %arg5: memref<32x32xbf16, #tpu.memory_space<vmem>>, %arg6: memref<1x32xf32, #tpu.memory_space<vmem>>, %arg7: memref<128x32xbf16, #tpu.memory_space<vmem>>, %arg8: memref<128x32xbf16, #tpu.memory_space<vmem>>) attributes {dimension_semantics = [#tpu.dimension_semantics<parallel>, #tpu.dimension_semantics<arbitrary>], iteration_bounds = array<i64: 1, 1>, scalar_prefetch = 0 : i64, scratch_operands = 1 : i64, tpu.core_type = #tpu.core_type<tc>, window_params = [{transform_indices = @transform_0, window_bounds = array<i64: 128, 32>}, {pipeline_mode = #tpu.pipeline_mode<synchronous>, transform_indices = @transform_1, window_bounds = array<i64: 1, 32>}, {pipeline_mode = #tpu.pipeline_mode<synchronous>, transform_indices = @transform_2, window_bounds = array<i64: 1, 32>}, {transform_indices = @transform_3, window_bounds = array<i64: 32, 32>}, {transform_indices = @transform_4, window_bounds = array<i64: 1, 32>}, {transform_indices = @transform_5, window_bounds = array<i64: 128, 32>}]} {
    %c0_i32 = arith.constant 0 : i32
    %0 = arith.cmpi eq, %arg1, %c0_i32 : i32
    %1 = arith.extui %0 : i1 to i32
    %c0_i32_0 = arith.constant 0 : i32
    %2 = arith.cmpi ne, %1, %c0_i32_0 : i32
    scf.if %2 {
      %c0_8 = arith.constant 0 : index
      %c0_9 = arith.constant 0 : index
      %11 = vector.load %arg2[%c0_8, %c0_9] : memref<128x32xf32, #tpu.memory_space<vmem>>, vector<128x32xf32>
      %c0_10 = arith.constant 0 : index
      %c0_11 = arith.constant 0 : index
      %12 = vector.load %arg3[%c0_10, %c0_11] : memref<1x32xf32, #tpu.memory_space<vmem>>, vector<1x32xf32>
      %c0_12 = arith.constant 0 : index
      %c0_13 = arith.constant 0 : index
      %13 = vector.load %arg4[%c0_12, %c0_13] : memref<1x32xf32, #tpu.memory_space<vmem>>, vector<1x32xf32>
      %cst_14 = arith.constant dense<0.000000e+00> : vector<128xf32>
      %14 = vector.multi_reduction <add>, %11, %cst_14 [1] : vector<128x32xf32> to vector<128xf32>
      %15 = vector.shape_cast %14 : vector<128xf32> to vector<128x1xf32>
      %cst_15 = arith.constant 3.200000e+01 : f32
      %16 = vector.broadcast %cst_15 : f32 to vector<128x1xf32>
      %17 = arith.divf %15, %16 : vector<128x1xf32>
      %18 = vector.broadcast %17 : vector<128x1xf32> to vector<128x32xf32>
      %19 = arith.subf %11, %18 : vector<128x32xf32>
      %20 = arith.mulf %19, %19 : vector<128x32xf32>
      %cst_16 = arith.constant dense<0.000000e+00> : vector<128xf32>
      %21 = vector.multi_reduction <add>, %20, %cst_16 [1] : vector<128x32xf32> to vector<128xf32>
      %22 = vector.shape_cast %21 : vector<128xf32> to vector<128x1xf32>
      %cst_17 = arith.constant 3.200000e+01 : f32
      %23 = vector.broadcast %cst_17 : f32 to vector<128x1xf32>
      %24 = arith.divf %22, %23 : vector<128x1xf32>
      %25 = vector.broadcast %17 : vector<128x1xf32> to vector<128x32xf32>
      %26 = arith.subf %11, %25 : vector<128x32xf32>
      %cst_18 = arith.constant 9.99999974E-6 : f32
      %27 = vector.broadcast %cst_18 : f32 to vector<128x1xf32>
      %28 = arith.addf %24, %27 : vector<128x1xf32>
      %29 = math.rsqrt %28 : vector<128x1xf32>
      %30 = vector.broadcast %29 : vector<128x1xf32> to vector<128x32xf32>
      %31 = arith.mulf %26, %30 : vector<128x32xf32>
      %32 = vector.broadcast %12 : vector<1x32xf32> to vector<128x32xf32>
      %33 = arith.mulf %31, %32 : vector<128x32xf32>
      %34 = vector.broadcast %13 : vector<1x32xf32> to vector<128x32xf32>
      %35 = arith.addf %33, %34 : vector<128x32xf32>
      %36 = arith.truncf %35 : vector<128x32xf32> to vector<128x32xbf16>
      %c0_19 = arith.constant 0 : index
      %c0_20 = arith.constant 0 : index
      %37 = vector.load %arg8[%c0_19, %c0_20] : memref<128x32xbf16, #tpu.memory_space<vmem>>, vector<128x32xbf16>
      tpu.vector_store %arg8[%c0_19, %c0_20], %36 {strides = array<i32>} : memref<128x32xbf16, #tpu.memory_space<vmem>>, vector<128x32xbf16>,
    } else {
    }
    %c0 = arith.constant 0 : index
    %c0_1 = arith.constant 0 : index
    %3 = vector.load %arg8[%c0, %c0_1] : memref<128x32xbf16, #tpu.memory_space<vmem>>, vector<128x32xbf16>
    %c0_2 = arith.constant 0 : index
    %c0_3 = arith.constant 0 : index
    %4 = vector.load %arg5[%c0_2, %c0_3] : memref<32x32xbf16, #tpu.memory_space<vmem>>, vector<32x32xbf16>
    %cst = arith.constant dense<0.000000e+00> : vector<128x32xf32>
    %5 = tpu.matmul %3, %4, %cst {dimension_numbers = #tpu.dot_dimension_numbers<[1], [0], [0], [1], [0, 0, 1, 1], [], []>} : vector<128x32xbf16>, vector<32x32xbf16>, vector<128x32xf32> -> vector<128x32xf32>
    %c0_4 = arith.constant 0 : index
    %c0_5 = arith.constant 0 : index
    %6 = vector.load %arg6[%c0_4, %c0_5] : memref<1x32xf32, #tpu.memory_space<vmem>>, vector<1x32xf32>
    %7 = vector.broadcast %6 : vector<1x32xf32> to vector<128x32xf32>
    %8 = arith.addf %5, %7 : vector<128x32xf32>
    %9 = arith.truncf %8 : vector<128x32xf32> to vector<128x32xbf16>
    %c0_6 = arith.constant 0 : index
    %c0_7 = arith.constant 0 : index
    %10 = vector.load %arg7[%c0_6, %c0_7] : memref<128x32xbf16, #tpu.memory_space<vmem>>, vector<128x32xbf16>
    tpu.vector_store %arg7[%c0_6, %c0_7], %9 {strides = array<i32>} : memref<128x32xbf16, #tpu.memory_space<vmem>>, vector<128x32xbf16>,
    return
  }
  func.func @transform_0(%arg0: i32, %arg1: i32) -> (i32, i32) {
    %c0_i32 = arith.constant 0 : i32
    %c0_i32_0 = arith.constant 0 : i32
    return %arg0, %c0_i32 : i32, i32
  }
  func.func @transform_1(%arg0: i32, %arg1: i32) -> (i32, i32) {
    %c0_i32 = arith.constant 0 : i32
    %c0_i32_0 = arith.constant 0 : i32
    %c0_i32_1 = arith.constant 0 : i32
    return %c0_i32, %c0_i32_0 : i32, i32
  }
  func.func @transform_2(%arg0: i32, %arg1: i32) -> (i32, i32) {
    %c0_i32 = arith.constant 0 : i32
    %c0_i32_0 = arith.constant 0 : i32
    %c0_i32_1 = arith.constant 0 : i32
    return %c0_i32, %c0_i32_0 : i32, i32
  }
  func.func @transform_3(%arg0: i32, %arg1: i32) -> (i32, i32) {
    %c0_i32 = arith.constant 0 : i32
    %c0_i32_0 = arith.constant 0 : i32
    return %c0_i32, %arg1 : i32, i32
  }
  func.func @transform_4(%arg0: i32, %arg1: i32) -> (i32, i32) {
    %c0_i32 = arith.constant 0 : i32
    %c0_i32_0 = arith.constant 0 : i32
    return %c0_i32, %arg1 : i32, i32
  }
  func.func @transform_5(%arg0: i32, %arg1: i32) -> (i32, i32) {
    %c0_i32 = arith.constant 0 : i32
    return %arg0, %arg1 : i32, i32
  }
}

module attributes {stable_mosaic.version = 11 : i64} {
  func.func @_matmul_kernel(%arg0: i32, %arg1: i32, %arg2: memref<16x32xf32, #tpu.memory_space<vmem>>, %arg3: memref<32x64xbf16, #tpu.memory_space<vmem>>, %arg4: memref<16x64xbf16, #tpu.memory_space<vmem>>) attributes {dimension_semantics = [#tpu.dimension_semantics<parallel>, #tpu.dimension_semantics<parallel>], iteration_bounds = array<i64: 1, 1>, scalar_prefetch = 0 : i64, scratch_operands = 0 : i64, tpu.core_type = #tpu.core_type<tc>, window_params = [{transform_indices = @transform_0, window_bounds = array<i64: 16, 32>}, {transform_indices = @transform_1, window_bounds = array<i64: 32, 64>}, {transform_indices = @transform_2, window_bounds = array<i64: 16, 64>}]} {
    %c0 = arith.constant 0 : index
    %c0_0 = arith.constant 0 : index
    %0 = vector.load %arg2[%c0, %c0_0] : memref<16x32xf32, #tpu.memory_space<vmem>>, vector<16x32xf32>
    %1 = arith.truncf %0 : vector<16x32xf32> to vector<16x32xbf16>
    %c0_1 = arith.constant 0 : index
    %c0_2 = arith.constant 0 : index
    %2 = vector.load %arg3[%c0_1, %c0_2] : memref<32x64xbf16, #tpu.memory_space<vmem>>, vector<32x64xbf16>
    %cst = arith.constant dense<0.000000e+00> : vector<16x64xf32>
    %3 = tpu.matmul %1, %2, %cst {dimension_numbers = #tpu.dot_dimension_numbers<[1], [0], [0], [1], [0, 0, 1, 1], [], []>} : vector<16x32xbf16>, vector<32x64xbf16>, vector<16x64xf32> -> vector<16x64xf32>
    %4 = arith.truncf %3 : vector<16x64xf32> to vector<16x64xbf16>
    %c0_3 = arith.constant 0 : index
    %c0_4 = arith.constant 0 : index
    %5 = vector.load %arg4[%c0_3, %c0_4] : memref<16x64xbf16, #tpu.memory_space<vmem>>, vector<16x64xbf16>
    tpu.vector_store %arg4[%c0_3, %c0_4], %4 {strides = array<i32>} : memref<16x64xbf16, #tpu.memory_space<vmem>>, vector<16x64xbf16>,
    return
  }
  func.func @transform_0(%arg0: i32, %arg1: i32) -> (i32, i32) {
    %c0_i32 = arith.constant 0 : i32
    %c0_i32_0 = arith.constant 0 : i32
    return %arg0, %c0_i32 : i32, i32
  }
  func.func @transform_1(%arg0: i32, %arg1: i32) -> (i32, i32) {
    %c0_i32 = arith.constant 0 : i32
    %c0_i32_0 = arith.constant 0 : i32
    return %c0_i32, %arg1 : i32, i32
  }
  func.func @transform_2(%arg0: i32, %arg1: i32) -> (i32, i32) {
    %c0_i32 = arith.constant 0 : i32
    return %arg0, %arg1 : i32, i32
  }
}

module attributes {stable_mosaic.version = 11 : i64} {
  func.func @_cross_attn_kernel(%arg0: i32, %arg1: i32, %arg2: memref<1x64x8xbf16, #tpu.memory_space<vmem>>, %arg3: memref<1x8x8xbf16, #tpu.memory_space<vmem>>, %arg4: memref<1x8x8xbf16, #tpu.memory_space<vmem>>, %arg5: memref<1x64x8xbf16, #tpu.memory_space<vmem>>) attributes {dimension_semantics = [#tpu.dimension_semantics<parallel>, #tpu.dimension_semantics<parallel>], iteration_bounds = array<i64: 8, 1>, scalar_prefetch = 0 : i64, scratch_operands = 0 : i64, tpu.core_type = #tpu.core_type<tc>, window_params = [{transform_indices = @transform_0, window_bounds = array<i64: 1, 64, 8>}, {transform_indices = @transform_1, window_bounds = array<i64: 1, 8, 8>}, {transform_indices = @transform_2, window_bounds = array<i64: 1, 8, 8>}, {transform_indices = @transform_3, window_bounds = array<i64: 1, 64, 8>}]} {
    %c0 = arith.constant 0 : index
    %c0_0 = arith.constant 0 : index
    %c0_1 = arith.constant 0 : index
    %0 = vector.load %arg2[%c0, %c0_0, %c0_1] : memref<1x64x8xbf16, #tpu.memory_space<vmem>>, vector<1x64x8xbf16>
    %1 = vector.shape_cast %0 : vector<1x64x8xbf16> to vector<64x8xbf16>
    %c0_2 = arith.constant 0 : index
    %c0_3 = arith.constant 0 : index
    %c0_4 = arith.constant 0 : index
    %2 = vector.load %arg3[%c0_2, %c0_3, %c0_4] : memref<1x8x8xbf16, #tpu.memory_space<vmem>>, vector<1x8x8xbf16>
    %3 = vector.shape_cast %2 : vector<1x8x8xbf16> to vector<8x8xbf16>
    %c0_5 = arith.constant 0 : index
    %c0_6 = arith.constant 0 : index
    %c0_7 = arith.constant 0 : index
    %4 = vector.load %arg4[%c0_5, %c0_6, %c0_7] : memref<1x8x8xbf16, #tpu.memory_space<vmem>>, vector<1x8x8xbf16>
    %5 = vector.shape_cast %4 : vector<1x8x8xbf16> to vector<8x8xbf16>
    "tpu.trace_start"() <{level = 10 : i32, message = "qd,kd->qk"}> : () -> ()
    %cst = arith.constant dense<0.000000e+00> : vector<64x8xf32>
    %6 = tpu.matmul %1, %3, %cst {dimension_numbers = #tpu.dot_dimension_numbers<[1], [1], [0], [0], [0, 0, 1, 0], [], []>} : vector<64x8xbf16>, vector<8x8xbf16>, vector<64x8xf32> -> vector<64x8xf32>
    "tpu.trace_stop"() : () -> ()
    %cst_8 = arith.constant 0.353553385 : f32
    %7 = vector.broadcast %cst_8 : f32 to vector<64x8xf32>
    %8 = arith.mulf %6, %7 : vector<64x8xf32>
    %cst_9 = arith.constant dense<0xFF800000> : vector<64xf32>
    %9 = vector.multi_reduction <maximumf>, %8, %cst_9 [1] : vector<64x8xf32> to vector<64xf32>
    %10 = vector.shape_cast %9 : vector<64xf32> to vector<64x1xf32>
    %11 = vector.broadcast %10 : vector<64x1xf32> to vector<64x8xf32>
    %12 = arith.subf %8, %11 : vector<64x8xf32>
    %13 = math.exp %12 : vector<64x8xf32>
    %cst_10 = arith.constant dense<0.000000e+00> : vector<64xf32>
    %14 = vector.multi_reduction <add>, %13, %cst_10 [1] : vector<64x8xf32> to vector<64xf32>
    %15 = vector.shape_cast %14 : vector<64xf32> to vector<64x1xf32>
    %16 = tpu.reciprocal %15 {approx = true} : vector<64x1xf32> -> vector<64x1xf32>
    %17 = vector.broadcast %16 : vector<64x1xf32> to vector<64x8xf32>
    %18 = arith.mulf %13, %17 : vector<64x8xf32>
    %19 = arith.truncf %18 : vector<64x8xf32> to vector<64x8xbf16>
    "tpu.trace_start"() <{level = 10 : i32, message = "qk,kd->qd"}> : () -> ()
    %cst_11 = arith.constant dense<0.000000e+00> : vector<64x8xf32>
    %20 = tpu.matmul %19, %5, %cst_11 {dimension_numbers = #tpu.dot_dimension_numbers<[1], [0], [0], [1], [0, 0, 1, 1], [], []>} : vector<64x8xbf16>, vector<8x8xbf16>, vector<64x8xf32> -> vector<64x8xf32>
    "tpu.trace_stop"() : () -> ()
    %21 = arith.truncf %20 : vector<64x8xf32> to vector<64x8xbf16>
    %c0_12 = arith.constant 0 : index
    %c0_13 = arith.constant 0 : index
    %c0_14 = arith.constant 0 : index
    %22 = vector.load %arg5[%c0_12, %c0_13, %c0_14] : memref<1x64x8xbf16, #tpu.memory_space<vmem>>, vector<1x64x8xbf16>
    %23 = vector.shape_cast %22 : vector<1x64x8xbf16> to vector<64x8xbf16>
    %24 = vector.shape_cast %21 : vector<64x8xbf16> to vector<1x64x8xbf16>
    tpu.vector_store %arg5[%c0_12, %c0_13, %c0_14], %24 {strides = array<i32>} : memref<1x64x8xbf16, #tpu.memory_space<vmem>>, vector<1x64x8xbf16>,
    return
  }
  func.func @transform_0(%arg0: i32, %arg1: i32) -> (i32, i32, i32) {
    %c0_i32 = arith.constant 0 : i32
    %c0_i32_0 = arith.constant 0 : i32
    return %arg0, %arg1, %c0_i32 : i32, i32, i32
  }
  func.func @transform_1(%arg0: i32, %arg1: i32) -> (i32, i32, i32) {
    %c0_i32 = arith.constant 0 : i32
    %c0_i32_0 = arith.constant 0 : i32
    %c0_i32_1 = arith.constant 0 : i32
    return %arg0, %c0_i32, %c0_i32_0 : i32, i32, i32
  }
  func.func @transform_2(%arg0: i32, %arg1: i32) -> (i32, i32, i32) {
    %c0_i32 = arith.constant 0 : i32
    %c0_i32_0 = arith.constant 0 : i32
    %c0_i32_1 = arith.constant 0 : i32
    return %arg0, %c0_i32, %c0_i32_0 : i32, i32, i32
  }
  func.func @transform_3(%arg0: i32, %arg1: i32) -> (i32, i32, i32) {
    %c0_i32 = arith.constant 0 : i32
    %c0_i32_0 = arith.constant 0 : i32
    return %arg0, %arg1, %c0_i32 : i32, i32, i32
  }
}

module attributes {stable_mosaic.version = 11 : i64} {
  func.func @_ln_mlp_res_kernel(%arg0: i32, %arg1: memref<128x32xf32, #tpu.memory_space<vmem>>, %arg2: memref<1x32xf32, #tpu.memory_space<vmem>>, %arg3: memref<1x32xf32, #tpu.memory_space<vmem>>, %arg4: memref<32x32xbf16, #tpu.memory_space<vmem>>, %arg5: memref<1x32xf32, #tpu.memory_space<vmem>>, %arg6: memref<32x32xbf16, #tpu.memory_space<vmem>>, %arg7: memref<1x32xf32, #tpu.memory_space<vmem>>, %arg8: memref<128x32xf32, #tpu.memory_space<vmem>>) attributes {dimension_semantics = [#tpu.dimension_semantics<parallel>], iteration_bounds = array<i64: 1>, scalar_prefetch = 0 : i64, scratch_operands = 0 : i64, tpu.core_type = #tpu.core_type<tc>, window_params = [{transform_indices = @transform_0, window_bounds = array<i64: 128, 32>}, {pipeline_mode = #tpu.pipeline_mode<synchronous>, transform_indices = @transform_1, window_bounds = array<i64: 1, 32>}, {pipeline_mode = #tpu.pipeline_mode<synchronous>, transform_indices = @transform_2, window_bounds = array<i64: 1, 32>}, {pipeline_mode = #tpu.pipeline_mode<synchronous>, transform_indices = @transform_3, window_bounds = array<i64: 32, 32>}, {pipeline_mode = #tpu.pipeline_mode<synchronous>, transform_indices = @transform_4, window_bounds = array<i64: 1, 32>}, {pipeline_mode = #tpu.pipeline_mode<synchronous>, transform_indices = @transform_5, window_bounds = array<i64: 32, 32>}, {pipeline_mode = #tpu.pipeline_mode<synchronous>, transform_indices = @transform_6, window_bounds = array<i64: 1, 32>}, {transform_indices = @transform_7, window_bounds = array<i64: 128, 32>}]} {
    %c0 = arith.constant 0 : index
    %c0_0 = arith.constant 0 : index
    %0 = vector.load %arg1[%c0, %c0_0] : memref<128x32xf32, #tpu.memory_space<vmem>>, vector<128x32xf32>
    %c0_1 = arith.constant 0 : index
    %c0_2 = arith.constant 0 : index
    %1 = vector.load %arg2[%c0_1, %c0_2] : memref<1x32xf32, #tpu.memory_space<vmem>>, vector<1x32xf32>
    %c0_3 = arith.constant 0 : index
    %c0_4 = arith.constant 0 : index
    %2 = vector.load %arg3[%c0_3, %c0_4] : memref<1x32xf32, #tpu.memory_space<vmem>>, vector<1x32xf32>
    %cst = arith.constant dense<0.000000e+00> : vector<128xf32>
    %3 = vector.multi_reduction <add>, %0, %cst [1] : vector<128x32xf32> to vector<128xf32>
    %4 = vector.shape_cast %3 : vector<128xf32> to vector<128x1xf32>
    %cst_5 = arith.constant 3.200000e+01 : f32
    %5 = vector.broadcast %cst_5 : f32 to vector<128x1xf32>
    %6 = arith.divf %4, %5 : vector<128x1xf32>
    %7 = vector.broadcast %6 : vector<128x1xf32> to vector<128x32xf32>
    %8 = arith.subf %0, %7 : vector<128x32xf32>
    %9 = arith.mulf %8, %8 : vector<128x32xf32>
    %cst_6 = arith.constant dense<0.000000e+00> : vector<128xf32>
    %10 = vector.multi_reduction <add>, %9, %cst_6 [1] : vector<128x32xf32> to vector<128xf32>
    %11 = vector.shape_cast %10 : vector<128xf32> to vector<128x1xf32>
    %cst_7 = arith.constant 3.200000e+01 : f32
    %12 = vector.broadcast %cst_7 : f32 to vector<128x1xf32>
    %13 = arith.divf %11, %12 : vector<128x1xf32>
    %14 = vector.broadcast %6 : vector<128x1xf32> to vector<128x32xf32>
    %15 = arith.subf %0, %14 : vector<128x32xf32>
    %cst_8 = arith.constant 9.99999974E-6 : f32
    %16 = vector.broadcast %cst_8 : f32 to vector<128x1xf32>
    %17 = arith.addf %13, %16 : vector<128x1xf32>
    %18 = math.rsqrt %17 : vector<128x1xf32>
    %19 = vector.broadcast %18 : vector<128x1xf32> to vector<128x32xf32>
    %20 = arith.mulf %15, %19 : vector<128x32xf32>
    %21 = vector.broadcast %1 : vector<1x32xf32> to vector<128x32xf32>
    %22 = arith.mulf %20, %21 : vector<128x32xf32>
    %23 = vector.broadcast %2 : vector<1x32xf32> to vector<128x32xf32>
    %24 = arith.addf %22, %23 : vector<128x32xf32>
    %25 = arith.truncf %24 : vector<128x32xf32> to vector<128x32xbf16>
    %c0_9 = arith.constant 0 : index
    %c0_10 = arith.constant 0 : index
    %26 = vector.load %arg4[%c0_9, %c0_10] : memref<32x32xbf16, #tpu.memory_space<vmem>>, vector<32x32xbf16>
    %cst_11 = arith.constant dense<0.000000e+00> : vector<128x32xf32>
    %27 = tpu.matmul %25, %26, %cst_11 {dimension_numbers = #tpu.dot_dimension_numbers<[1], [0], [0], [1], [0, 0, 1, 1], [], []>} : vector<128x32xbf16>, vector<32x32xbf16>, vector<128x32xf32> -> vector<128x32xf32>
    %c0_12 = arith.constant 0 : index
    %c0_13 = arith.constant 0 : index
    %28 = vector.load %arg5[%c0_12, %c0_13] : memref<1x32xf32, #tpu.memory_space<vmem>>, vector<1x32xf32>
    %29 = vector.broadcast %28 : vector<1x32xf32> to vector<128x32xf32>
    %30 = arith.addf %27, %29 : vector<128x32xf32>
    %cst_14 = arith.constant 5.000000e-01 : f32
    %31 = vector.broadcast %cst_14 : f32 to vector<128x32xf32>
    %32 = arith.mulf %31, %30 : vector<128x32xf32>
    %cst_15 = arith.constant 0.707106769 : f32
    %33 = vector.broadcast %cst_15 : f32 to vector<128x32xf32>
    %34 = arith.mulf %30, %33 : vector<128x32xf32>
    %cst_16 = arith.constant 0.000000e+00 : f32
    %35 = vector.broadcast %cst_16 : f32 to vector<128x32xf32>
    %36 = arith.cmpf oge, %34, %35 : vector<128x32xf32>
    %cst_17 = arith.constant 1.000000e+00 : f32
    %cst_18 = arith.constant -1.000000e+00 : f32
    %37 = vector.broadcast %cst_17 : f32 to vector<128x32xf32>
    %38 = vector.broadcast %cst_18 : f32 to vector<128x32xf32>
    %39 = arith.select %36, %37, %38 : vector<128x32xi1>, vector<128x32xf32>
    %40 = math.absf %34 : vector<128x32xf32>
    %cst_19 = arith.constant 0.327591091 : f32
    %41 = vector.broadcast %cst_19 : f32 to vector<128x32xf32>
    %42 = arith.mulf %41, %40 : vector<128x32xf32>
    %cst_20 = arith.constant 1.000000e+00 : f32
    %43 = vector.broadcast %cst_20 : f32 to vector<128x32xf32>
    %44 = arith.addf %43, %42 : vector<128x32xf32>
    %cst_21 = arith.constant 1.000000e+00 : f32
    %45 = vector.broadcast %cst_21 : f32 to vector<128x32xf32>
    %46 = arith.divf %45, %44 : vector<128x32xf32>
    %cst_22 = arith.constant 1.06140542 : f32
    %47 = vector.broadcast %cst_22 : f32 to vector<128x32xf32>
    %48 = arith.mulf %47, %46 : vector<128x32xf32>
    %cst_23 = arith.constant -1.45315206 : f32
    %49 = vector.broadcast %cst_23 : f32 to vector<128x32xf32>
    %50 = arith.addf %48, %49 : vector<128x32xf32>
    %51 = arith.mulf %50, %46 : vector<128x32xf32>
    %cst_24 = arith.constant 1.42141378 : f32
    %52 = vector.broadcast %cst_24 : f32 to vector<128x32xf32>
    %53 = arith.addf %51, %52 : vector<128x32xf32>
    %54 = arith.mulf %53, %46 : vector<128x32xf32>
    %cst_25 = arith.constant -0.284496725 : f32
    %55 = vector.broadcast %cst_25 : f32 to vector<128x32xf32>
    %56 = arith.addf %54, %55 : vector<128x32xf32>
    %57 = arith.mulf %56, %46 : vector<128x32xf32>
    %cst_26 = arith.constant 0.254829586 : f32
    %58 = vector.broadcast %cst_26 : f32 to vector<128x32xf32>
    %59 = arith.addf %57, %58 : vector<128x32xf32>
    %60 = arith.mulf %59, %46 : vector<128x32xf32>
    %cst_27 = arith.constant 0.000000e+00 : f32
    %61 = vector.broadcast %cst_27 : f32 to vector<128x32xf32>
    %62 = arith.subf %61, %40 : vector<128x32xf32>
    %63 = arith.mulf %62, %40 : vector<128x32xf32>
    %64 = math.exp %63 : vector<128x32xf32>
    %65 = arith.mulf %60, %64 : vector<128x32xf32>
    %cst_28 = arith.constant 1.000000e+00 : f32
    %66 = vector.broadcast %cst_28 : f32 to vector<128x32xf32>
    %67 = arith.subf %66, %65 : vector<128x32xf32>
    %68 = arith.mulf %39, %67 : vector<128x32xf32>
    %cst_29 = arith.constant 1.000000e+00 : f32
    %69 = vector.broadcast %cst_29 : f32 to vector<128x32xf32>
    %70 = arith.addf %69, %68 : vector<128x32xf32>
    %71 = arith.mulf %32, %70 : vector<128x32xf32>
    %72 = arith.truncf %71 : vector<128x32xf32> to vector<128x32xbf16>
    %c0_30 = arith.constant 0 : index
    %c0_31 = arith.constant 0 : index
    %73 = vector.load %arg6[%c0_30, %c0_31] : memref<32x32xbf16, #tpu.memory_space<vmem>>, vector<32x32xbf16>
    %cst_32 = arith.constant dense<0.000000e+00> : vector<128x32xf32>
    %74 = tpu.matmul %72, %73, %cst_32 {dimension_numbers = #tpu.dot_dimension_numbers<[1], [0], [0], [1], [0, 0, 1, 1], [], []>} : vector<128x32xbf16>, vector<32x32xbf16>, vector<128x32xf32> -> vector<128x32xf32>
    %c0_33 = arith.constant 0 : index
    %c0_34 = arith.constant 0 : index
    %75 = vector.load %arg7[%c0_33, %c0_34] : memref<1x32xf32, #tpu.memory_space<vmem>>, vector<1x32xf32>
    %76 = vector.broadcast %75 : vector<1x32xf32> to vector<128x32xf32>
    %77 = arith.addf %74, %76 : vector<128x32xf32>
    %78 = arith.addf %0, %77 : vector<128x32xf32>
    %c0_35 = arith.constant 0 : index
    %c0_36 = arith.constant 0 : index
    %79 = vector.load %arg8[%c0_35, %c0_36] : memref<128x32xf32, #tpu.memory_space<vmem>>, vector<128x32xf32>
    tpu.vector_store %arg8[%c0_35, %c0_36], %78 {strides = array<i32>} : memref<128x32xf32, #tpu.memory_space<vmem>>, vector<128x32xf32>,
    return
  }
  func.func @transform_0(%arg0: i32) -> (i32, i32) {
    %c0_i32 = arith.constant 0 : i32
    %c0_i32_0 = arith.constant 0 : i32
    return %arg0, %c0_i32 : i32, i32
  }
  func.func @transform_1(%arg0: i32) -> (i32, i32) {
    %c0_i32 = arith.constant 0 : i32
    %c0_i32_0 = arith.constant 0 : i32
    %c0_i32_1 = arith.constant 0 : i32
    return %c0_i32, %c0_i32_0 : i32, i32
  }
  func.func @transform_2(%arg0: i32) -> (i32, i32) {
    %c0_i32 = arith.constant 0 : i32
    %c0_i32_0 = arith.constant 0 : i32
    %c0_i32_1 = arith.constant 0 : i32
    return %c0_i32, %c0_i32_0 : i32, i32
  }
  func.func @transform_3(%arg0: i32) -> (i32, i32) {
    %c0_i32 = arith.constant 0 : i32
    %c0_i32_0 = arith.constant 0 : i32
    %c0_i32_1 = arith.constant 0 : i32
    return %c0_i32, %c0_i32_0 : i32, i32
  }
  func.func @transform_4(%arg0: i32) -> (i32, i32) {
    %c0_i32 = arith.constant 0 : i32
    %c0_i32_0 = arith.constant 0 : i32
    %c0_i32_1 = arith.constant 0 : i32
    return %c0_i32, %c0_i32_0 : i32, i32
  }
  func.func @transform_5(%arg0: i32) -> (i32, i32) {
    %c0_i32 = arith.constant 0 : i32
    %c0_i32_0 = arith.constant 0 : i32
    %c0_i32_1 = arith.constant 0 : i32
    return %c0_i32, %c0_i32_0 : i32, i32
  }
  func.func @transform_6(%arg0: i32) -> (i32, i32) {
    %c0_i32 = arith.constant 0 : i32
    %c0_i32_0 = arith.constant 0 : i32
    %c0_i32_1 = arith.constant 0 : i32
    return %c0_i32, %c0_i32_0 : i32, i32
  }
  func.func @transform_7(%arg0: i32) -> (i32, i32) {
    %c0_i32 = arith.constant 0 : i32
    %c0_i32_0 = arith.constant 0 : i32
    return %arg0, %c0_i32 : i32, i32
  }
}

module attributes {stable_mosaic.version = 11 : i64} {
  func.func @_self_attn_kernel(%arg0: i32, %arg1: i32, %arg2: memref<1x1x8x8xbf16, #tpu.memory_space<vmem>>, %arg3: memref<1x1x8x8xbf16, #tpu.memory_space<vmem>>, %arg4: memref<1x1x8x8xbf16, #tpu.memory_space<vmem>>, %arg5: memref<1x1x8x8xbf16, #tpu.memory_space<vmem>>) attributes {dimension_semantics = [#tpu.dimension_semantics<parallel>, #tpu.dimension_semantics<parallel>], iteration_bounds = array<i64: 8, 8>, scalar_prefetch = 0 : i64, scratch_operands = 0 : i64, tpu.core_type = #tpu.core_type<tc>, window_params = [{transform_indices = @transform_0, window_bounds = array<i64: 1, 1, 8, 8>}, {transform_indices = @transform_1, window_bounds = array<i64: 1, 1, 8, 8>}, {transform_indices = @transform_2, window_bounds = array<i64: 1, 1, 8, 8>}, {transform_indices = @transform_3, window_bounds = array<i64: 1, 1, 8, 8>}]} {
    %c0 = arith.constant 0 : index
    %c0_0 = arith.constant 0 : index
    %c0_1 = arith.constant 0 : index
    %c0_2 = arith.constant 0 : index
    %0 = vector.load %arg2[%c0, %c0_0, %c0_1, %c0_2] : memref<1x1x8x8xbf16, #tpu.memory_space<vmem>>, vector<1x1x8x8xbf16>
    %1 = vector.shape_cast %0 : vector<1x1x8x8xbf16> to vector<8x8xbf16>
    %c0_3 = arith.constant 0 : index
    %c0_4 = arith.constant 0 : index
    %c0_5 = arith.constant 0 : index
    %c0_6 = arith.constant 0 : index
    %2 = vector.load %arg3[%c0_3, %c0_4, %c0_5, %c0_6] : memref<1x1x8x8xbf16, #tpu.memory_space<vmem>>, vector<1x1x8x8xbf16>
    %3 = vector.shape_cast %2 : vector<1x1x8x8xbf16> to vector<8x8xbf16>
    %c0_7 = arith.constant 0 : index
    %c0_8 = arith.constant 0 : index
    %c0_9 = arith.constant 0 : index
    %c0_10 = arith.constant 0 : index
    %4 = vector.load %arg4[%c0_7, %c0_8, %c0_9, %c0_10] : memref<1x1x8x8xbf16, #tpu.memory_space<vmem>>, vector<1x1x8x8xbf16>
    %5 = vector.shape_cast %4 : vector<1x1x8x8xbf16> to vector<8x8xbf16>
    "tpu.trace_start"() <{level = 10 : i32, message = "qd,kd->qk"}> : () -> ()
    %cst = arith.constant dense<0.000000e+00> : vector<8x8xf32>
    %6 = tpu.matmul %1, %3, %cst {dimension_numbers = #tpu.dot_dimension_numbers<[1], [1], [0], [0], [0, 0, 1, 0], [], []>} : vector<8x8xbf16>, vector<8x8xbf16>, vector<8x8xf32> -> vector<8x8xf32>
    "tpu.trace_stop"() : () -> ()
    %cst_11 = arith.constant 0.353553385 : f32
    %7 = vector.broadcast %cst_11 : f32 to vector<8x8xf32>
    %8 = arith.mulf %6, %7 : vector<8x8xf32>
    %cst_12 = arith.constant dense<0xFF800000> : vector<8xf32>
    %9 = vector.multi_reduction <maximumf>, %8, %cst_12 [1] : vector<8x8xf32> to vector<8xf32>
    %10 = vector.shape_cast %9 : vector<8xf32> to vector<8x1xf32>
    %11 = vector.broadcast %10 : vector<8x1xf32> to vector<8x8xf32>
    %12 = arith.subf %8, %11 : vector<8x8xf32>
    %13 = math.exp %12 : vector<8x8xf32>
    %cst_13 = arith.constant dense<0.000000e+00> : vector<8xf32>
    %14 = vector.multi_reduction <add>, %13, %cst_13 [1] : vector<8x8xf32> to vector<8xf32>
    %15 = vector.shape_cast %14 : vector<8xf32> to vector<8x1xf32>
    %16 = tpu.reciprocal %15 {approx = true} : vector<8x1xf32> -> vector<8x1xf32>
    %17 = vector.broadcast %16 : vector<8x1xf32> to vector<8x8xf32>
    %18 = arith.mulf %13, %17 : vector<8x8xf32>
    %19 = arith.truncf %18 : vector<8x8xf32> to vector<8x8xbf16>
    "tpu.trace_start"() <{level = 10 : i32, message = "qk,kd->qd"}> : () -> ()
    %cst_14 = arith.constant dense<0.000000e+00> : vector<8x8xf32>
    %20 = tpu.matmul %19, %5, %cst_14 {dimension_numbers = #tpu.dot_dimension_numbers<[1], [0], [0], [1], [0, 0, 1, 1], [], []>} : vector<8x8xbf16>, vector<8x8xbf16>, vector<8x8xf32> -> vector<8x8xf32>
    "tpu.trace_stop"() : () -> ()
    %21 = arith.truncf %20 : vector<8x8xf32> to vector<8x8xbf16>
    %c0_15 = arith.constant 0 : index
    %c0_16 = arith.constant 0 : index
    %c0_17 = arith.constant 0 : index
    %c0_18 = arith.constant 0 : index
    %22 = vector.load %arg5[%c0_15, %c0_16, %c0_17, %c0_18] : memref<1x1x8x8xbf16, #tpu.memory_space<vmem>>, vector<1x1x8x8xbf16>
    %23 = vector.shape_cast %22 : vector<1x1x8x8xbf16> to vector<8x8xbf16>
    %24 = vector.shape_cast %21 : vector<8x8xbf16> to vector<1x1x8x8xbf16>
    tpu.vector_store %arg5[%c0_15, %c0_16, %c0_17, %c0_18], %24 {strides = array<i32>} : memref<1x1x8x8xbf16, #tpu.memory_space<vmem>>, vector<1x1x8x8xbf16>,
    return
  }
  func.func @transform_0(%arg0: i32, %arg1: i32) -> (i32, i32, i32, i32) {
    %c0_i32 = arith.constant 0 : i32
    %c0_i32_0 = arith.constant 0 : i32
    %c0_i32_1 = arith.constant 0 : i32
    return %arg0, %arg1, %c0_i32, %c0_i32_0 : i32, i32, i32, i32
  }
  func.func @transform_1(%arg0: i32, %arg1: i32) -> (i32, i32, i32, i32) {
    %c0_i32 = arith.constant 0 : i32
    %c0_i32_0 = arith.constant 0 : i32
    %c0_i32_1 = arith.constant 0 : i32
    return %arg0, %arg1, %c0_i32, %c0_i32_0 : i32, i32, i32, i32
  }
  func.func @transform_2(%arg0: i32, %arg1: i32) -> (i32, i32, i32, i32) {
    %c0_i32 = arith.constant 0 : i32
    %c0_i32_0 = arith.constant 0 : i32
    %c0_i32_1 = arith.constant 0 : i32
    return %arg0, %arg1, %c0_i32, %c0_i32_0 : i32, i32, i32, i32
  }
  func.func @transform_3(%arg0: i32, %arg1: i32) -> (i32, i32, i32, i32) {
    %c0_i32 = arith.constant 0 : i32
    %c0_i32_0 = arith.constant 0 : i32
    %c0_i32_1 = arith.constant 0 : i32
    return %arg0, %arg1, %c0_i32, %c0_i32_0 : i32, i32, i32, i32
  }
}

module attributes {stable_mosaic.version = 11 : i64} {
  func.func @_ln_matmul_kernel(%arg0: i32, %arg1: i32, %arg2: memref<128x32xf32, #tpu.memory_space<vmem>>, %arg3: memref<1x32xf32, #tpu.memory_space<vmem>>, %arg4: memref<1x32xf32, #tpu.memory_space<vmem>>, %arg5: memref<32x64xbf16, #tpu.memory_space<vmem>>, %arg6: memref<1x64xf32, #tpu.memory_space<vmem>>, %arg7: memref<128x64xf32, #tpu.memory_space<vmem>>, %arg8: memref<128x32xbf16, #tpu.memory_space<vmem>>) attributes {dimension_semantics = [#tpu.dimension_semantics<parallel>, #tpu.dimension_semantics<arbitrary>], iteration_bounds = array<i64: 1, 1>, scalar_prefetch = 0 : i64, scratch_operands = 1 : i64, tpu.core_type = #tpu.core_type<tc>, window_params = [{transform_indices = @transform_0, window_bounds = array<i64: 128, 32>}, {pipeline_mode = #tpu.pipeline_mode<synchronous>, transform_indices = @transform_1, window_bounds = array<i64: 1, 32>}, {pipeline_mode = #tpu.pipeline_mode<synchronous>, transform_indices = @transform_2, window_bounds = array<i64: 1, 32>}, {transform_indices = @transform_3, window_bounds = array<i64: 32, 64>}, {transform_indices = @transform_4, window_bounds = array<i64: 1, 64>}, {transform_indices = @transform_5, window_bounds = array<i64: 128, 64>}]} {
    %c0_i32 = arith.constant 0 : i32
    %0 = arith.cmpi eq, %arg1, %c0_i32 : i32
    %1 = arith.extui %0 : i1 to i32
    %c0_i32_0 = arith.constant 0 : i32
    %2 = arith.cmpi ne, %1, %c0_i32_0 : i32
    scf.if %2 {
      %c0_8 = arith.constant 0 : index
      %c0_9 = arith.constant 0 : index
      %10 = vector.load %arg2[%c0_8, %c0_9] : memref<128x32xf32, #tpu.memory_space<vmem>>, vector<128x32xf32>
      %c0_10 = arith.constant 0 : index
      %c0_11 = arith.constant 0 : index
      %11 = vector.load %arg3[%c0_10, %c0_11] : memref<1x32xf32, #tpu.memory_space<vmem>>, vector<1x32xf32>
      %c0_12 = arith.constant 0 : index
      %c0_13 = arith.constant 0 : index
      %12 = vector.load %arg4[%c0_12, %c0_13] : memref<1x32xf32, #tpu.memory_space<vmem>>, vector<1x32xf32>
      %cst_14 = arith.constant dense<0.000000e+00> : vector<128xf32>
      %13 = vector.multi_reduction <add>, %10, %cst_14 [1] : vector<128x32xf32> to vector<128xf32>
      %14 = vector.shape_cast %13 : vector<128xf32> to vector<128x1xf32>
      %cst_15 = arith.constant 3.200000e+01 : f32
      %15 = vector.broadcast %cst_15 : f32 to vector<128x1xf32>
      %16 = arith.divf %14, %15 : vector<128x1xf32>
      %17 = vector.broadcast %16 : vector<128x1xf32> to vector<128x32xf32>
      %18 = arith.subf %10, %17 : vector<128x32xf32>
      %19 = arith.mulf %18, %18 : vector<128x32xf32>
      %cst_16 = arith.constant dense<0.000000e+00> : vector<128xf32>
      %20 = vector.multi_reduction <add>, %19, %cst_16 [1] : vector<128x32xf32> to vector<128xf32>
      %21 = vector.shape_cast %20 : vector<128xf32> to vector<128x1xf32>
      %cst_17 = arith.constant 3.200000e+01 : f32
      %22 = vector.broadcast %cst_17 : f32 to vector<128x1xf32>
      %23 = arith.divf %21, %22 : vector<128x1xf32>
      %24 = vector.broadcast %16 : vector<128x1xf32> to vector<128x32xf32>
      %25 = arith.subf %10, %24 : vector<128x32xf32>
      %cst_18 = arith.constant 9.99999974E-6 : f32
      %26 = vector.broadcast %cst_18 : f32 to vector<128x1xf32>
      %27 = arith.addf %23, %26 : vector<128x1xf32>
      %28 = math.rsqrt %27 : vector<128x1xf32>
      %29 = vector.broadcast %28 : vector<128x1xf32> to vector<128x32xf32>
      %30 = arith.mulf %25, %29 : vector<128x32xf32>
      %31 = vector.broadcast %11 : vector<1x32xf32> to vector<128x32xf32>
      %32 = arith.mulf %30, %31 : vector<128x32xf32>
      %33 = vector.broadcast %12 : vector<1x32xf32> to vector<128x32xf32>
      %34 = arith.addf %32, %33 : vector<128x32xf32>
      %35 = arith.truncf %34 : vector<128x32xf32> to vector<128x32xbf16>
      %c0_19 = arith.constant 0 : index
      %c0_20 = arith.constant 0 : index
      %36 = vector.load %arg8[%c0_19, %c0_20] : memref<128x32xbf16, #tpu.memory_space<vmem>>, vector<128x32xbf16>
      tpu.vector_store %arg8[%c0_19, %c0_20], %35 {strides = array<i32>} : memref<128x32xbf16, #tpu.memory_space<vmem>>, vector<128x32xbf16>,
    } else {
    }
    %c0 = arith.constant 0 : index
    %c0_1 = arith.constant 0 : index
    %3 = vector.load %arg8[%c0, %c0_1] : memref<128x32xbf16, #tpu.memory_space<vmem>>, vector<128x32xbf16>
    %c0_2 = arith.constant 0 : index
    %c0_3 = arith.constant 0 : index
    %4 = vector.load %arg5[%c0_2, %c0_3] : memref<32x64xbf16, #tpu.memory_space<vmem>>, vector<32x64xbf16>
    %cst = arith.constant dense<0.000000e+00> : vector<128x64xf32>
    %5 = tpu.matmul %3, %4, %cst {dimension_numbers = #tpu.dot_dimension_numbers<[1], [0], [0], [1], [0, 0, 1, 1], [], []>} : vector<128x32xbf16>, vector<32x64xbf16>, vector<128x64xf32> -> vector<128x64xf32>
    %c0_4 = arith.constant 0 : index
    %c0_5 = arith.constant 0 : index
    %6 = vector.load %arg6[%c0_4, %c0_5] : memref<1x64xf32, #tpu.memory_space<vmem>>, vector<1x64xf32>
    %7 = vector.broadcast %6 : vector<1x64xf32> to vector<128x64xf32>
    %8 = arith.addf %5, %7 : vector<128x64xf32>
    %c0_6 = arith.constant 0 : index
    %c0_7 = arith.constant 0 : index
    %9 = vector.load %arg7[%c0_6, %c0_7] : memref<128x64xf32, #tpu.memory_space<vmem>>, vector<128x64xf32>
    tpu.vector_store %arg7[%c0_6, %c0_7], %8 {strides = array<i32>} : memref<128x64xf32, #tpu.memory_space<vmem>>, vector<128x64xf32>,
    return
  }
  func.func @transform_0(%arg0: i32, %arg1: i32) -> (i32, i32) {
    %c0_i32 = arith.constant 0 : i32
    %c0_i32_0 = arith.constant 0 : i32
    return %arg0, %c0_i32 : i32, i32
  }
  func.func @transform_1(%arg0: i32, %arg1: i32) -> (i32, i32) {
    %c0_i32 = arith.constant 0 : i32
    %c0_i32_0 = arith.constant 0 : i32
    %c0_i32_1 = arith.constant 0 : i32
    return %c0_i32, %c0_i32_0 : i32, i32
  }
  func.func @transform_2(%arg0: i32, %arg1: i32) -> (i32, i32) {
    %c0_i32 = arith.constant 0 : i32
    %c0_i32_0 = arith.constant 0 : i32
    %c0_i32_1 = arith.constant 0 : i32
    return %c0_i32, %c0_i32_0 : i32, i32
  }
  func.func @transform_3(%arg0: i32, %arg1: i32) -> (i32, i32) {
    %c0_i32 = arith.constant 0 : i32
    %c0_i32_0 = arith.constant 0 : i32
    return %c0_i32, %arg1 : i32, i32
  }
  func.func @transform_4(%arg0: i32, %arg1: i32) -> (i32, i32) {
    %c0_i32 = arith.constant 0 : i32
    %c0_i32_0 = arith.constant 0 : i32
    return %c0_i32, %arg1 : i32, i32
  }
  func.func @transform_5(%arg0: i32, %arg1: i32) -> (i32, i32) {
    %c0_i32 = arith.constant 0 : i32
    return %arg0, %arg1 : i32, i32
  }
}

</mosaic_0001>

<bundles_post_ra>
// kernel: _lambda_.18
= control target key start
LH: loop header
LB: loop body
LE: loop exit
PB: predicated region body
PF: predicated region fallthrough
CT: control target
= control target key end

     0   :  { %vm78_vm0 = vcmask 523264   ;;  %vm200_vm1 = vcmask 261120   ;;  %s437_s1 = inlined_call_operand.vmem [shape: bf16[64,32], index: 1, kind: input, shape index: {}]   ;;  %s438_s0 = inlined_call_operand.vmem [shape: f32[128,64], index: 0, kind: input, shape index: {}]   ;;  %s439_s2 = inlined_call_operand.vmem [shape: f32[1,32], index: 2, kind: input, shape index: {}]   ;;  %s440_s3 = inlined_call_operand.vmem [shape: f32[128,32], index: 3, kind: output, shape index: {}]  }
   0x1   :  { %v278_v0 = vld [vmem:[%s437_s1 + $0x18] sm:$0xff]   ;;  %v279_v1 = vld [vmem:[%s437_s1 + $0x10] sm:$0xff]   ;;  %v280_v2 = vld [vmem:[%s437_s1 + $0x8] sm:$0xff]  }
   0x2   :  { %246 = vmatprep.subr.bf16.mxu0 %v278_v0  ;;  %270 = vmatprep.subr.bf16.mxu1 %v278_v0  ;;  %v15_v3 = vld [vmem:[%s438_s0] sm:$0xff]  ;;  %v16_v4 = vld [vmem:[%s438_s0 + $0x8] sm:$0xff]  ;;  %v17_v10 = vld [vmem:[%s438_s0 + $0x10] sm:$0xff] }
   0x3   :  { %247 = vmatpush3.bf16.msra.mxu0 %v278_v0  ;;  %274 = vmatpush3.bf16.msra.mxu1 %v278_v0  ;;  %v23_v5 = vld [vmem:[%s438_s0 + $0x40] sm:$0xff]  ;;  %v31_v6 = vpack.c.bf16 %v16_v4, %v15_v3  ;;  %v24_v7 = vld [vmem:[%s438_s0 + $0x48] sm:$0xff]  ;;  %v18_v11 = vld [vmem:[%s438_s0 + $0x18] sm:$0xff] }
   0x4   :  { %248 = vmatprep.subr.bf16.mxu0 %v279_v1  ;;  %271 = vmatprep.subr.bf16.mxu1 %v279_v1  ;;  %v35_v8 = vpack.c.bf16 %v24_v7, %v23_v5  ;;  %v281_v9 = vld [vmem:[%s437_s1] sm:$0xff]   ;;  %v25_v12 = vld [vmem:[%s438_s0 + $0x50] sm:$0xff]  ;;  %v26_v13 = vld [vmem:[%s438_s0 + $0x58] sm:$0xff]  ;;  %v32_v18 = vpack.c.bf16 %v18_v11, %v17_v10 }
   0x5   :  { %254 = vmatprep.mubr.msk.bf16.mxu0 %vm78_vm0, %v31_v6  ;;  %v19_v14 = vld [vmem:[%s438_s0 + $0x20] sm:$0xff]  ;;  %v20_v15 = vld [vmem:[%s438_s0 + $0x28] sm:$0xff]  ;;  %v36_v19 = vpack.c.bf16 %v26_v13, %v25_v12  ;;  %v21_v22 = vld [vmem:[%s438_s0 + $0x30] sm:$0xff] }
   0x6   :  { %262 = vmatprep.mubr.msk.bf16.mxu1 %vm78_vm0, %v35_v8  ;;  %v27_v16 = vld [vmem:[%s438_s0 + $0x60] sm:$0xff]  ;;  %v28_v17 = vld [vmem:[%s438_s0 + $0x68] sm:$0xff]  ;;  %v33_v20 = vpack.c.bf16 %v20_v15, %v19_v14  ;;  %v22_v23 = vld [vmem:[%s438_s0 + $0x38] sm:$0xff] }
   0x7   :  { %249 = vmatpush3.bf16.msra.mxu0 %v279_v1  ;;  %275 = vmatpush3.bf16.msra.mxu1 %v279_v1  ;;  %v37_v21 = vpack.c.bf16 %v28_v17, %v27_v16  ;;  %v29_v24 = vld [vmem:[%s438_s0 + $0x70] sm:$0xff]  ;;  %v30_v25 = vld [vmem:[%s438_s0 + $0x78] sm:$0xff]  ;;  %v34_v26 = vpack.c.bf16 %v22_v23, %v21_v22  ;;  %v221_v28 = vld [vmem:[%s439_s2] ss:$0 sm:$0xff] }
   0x8   :  { %250 = vmatprep.subr.bf16.mxu0 %v280_v2  ;;  %272 = vmatprep.subr.bf16.mxu1 %v280_v2  ;;  %v38_v27 = vpack.c.bf16 %v30_v25, %v29_v24 }
   0xb   :  { %251 = vmatpush3.bf16.msra.mxu0 %v280_v2  ;;  %276 = vmatpush3.bf16.msra.mxu1 %v280_v2 }
   0xc   :  { %252 = vmatprep.subr.bf16.mxu0 %v281_v9  ;;  %273 = vmatprep.subr.bf16.mxu1 %v281_v9 }
   0xf   :  { %253 = vmatpush3.bf16.msra.mxu0 %v281_v9  ;;  %277 = vmatpush3.bf16.msra.mxu1 %v281_v9 }
  0x12   :  { %255 = vmatmul.mubr.msk.bf16.vlgmr.msra.gmra.mxu0 %vm78_vm0, %v32_v18  ;;  %263 = vmatmul.mubr.msk.bf16.vlgmr.msra.gmra.mxu1 %vm78_vm0, %v36_v19 }
  0x13   :  { %258 = vmatprep.mubr.msk.bf16.mxu0 %vm78_vm0, %v33_v20  ;;  %266 = vmatprep.mubr.msk.bf16.mxu1 %vm78_vm0, %v37_v21 }
  0x1a   :  { %259 = vmatmul.mubr.msk.bf16.gmra.mxu0 %vm78_vm0, %v34_v26  ;;  %267 = vmatmul.mubr.msk.bf16.gmra.mxu1 %vm78_vm0, %v38_v27 }
  0xd2   :  { %v256_v29 = vpop.f32.mrf.mxu0  ;;  %v264_v30 = vpop.f32.mrf.mxu1 }
  0xd3   :  { %v146_v31 = vadd.f32 %v256_v29, %v221_v28  ;;  %v178_v32 = vadd.f32 %v264_v30, %v221_v28 }
  0xd4   :  { %v137_v33 = vpop.f32.mrf.mxu0  ;;  %v169_v34 = vpop.f32.mrf.mxu1 }
  0xd5   :  { %203 = vst.msk [vmem:[%s440_s3 + $0x10] sm:$0xff] %vm200_vm1, %v146_v31  ;;  %211 = vst.msk [vmem:[%s440_s3 + $0x50] sm:$0xff] %vm200_vm1, %v178_v32  ;;  %v138_v35 = vadd.f32 %v221_v28, %v137_v33  ;;  %v170_v36 = vadd.f32 %v221_v28, %v169_v34 }
  0xd6   :  { %v257_v37 = vpop.f32.mrf.mxu0  ;;  %v265_v38 = vpop.f32.mrf.mxu1 }
  0xd7   :  { %201 = vst.msk [vmem:[%s440_s3] sm:$0xff] %vm200_vm1, %v138_v35  ;;  %209 = vst.msk [vmem:[%s440_s3 + $0x40] sm:$0xff] %vm200_vm1, %v170_v36  ;;  %v149_v39 = vadd.f32 %v257_v37, %v221_v28  ;;  %v181_v40 = vadd.f32 %v265_v38, %v221_v28 }
  0xd8   :  { %v140_v41 = vpop.f32.mrf.mxu0  ;;  %v172_v42 = vpop.f32.mrf.mxu1 }
  0xd9   :  { %204 = vst.msk [vmem:[%s440_s3 + $0x18] sm:$0xff] %vm200_vm1, %v149_v39  ;;  %212 = vst.msk [vmem:[%s440_s3 + $0x58] sm:$0xff] %vm200_vm1, %v181_v40  ;;  %v141_v43 = vadd.f32 %v221_v28, %v140_v41  ;;  %v173_v44 = vadd.f32 %v221_v28, %v172_v42 }
  0xda   :  { %v260_v45 = vpop.f32.mrf.mxu0  ;;  %v268_v46 = vpop.f32.mrf.mxu1 }
  0xdb   :  { %202 = vst.msk [vmem:[%s440_s3 + $0x8] sm:$0xff] %vm200_vm1, %v141_v43  ;;  %210 = vst.msk [vmem:[%s440_s3 + $0x48] sm:$0xff] %vm200_vm1, %v173_v44  ;;  %v162_v47 = vadd.f32 %v260_v45, %v221_v28  ;;  %v194_v48 = vadd.f32 %v268_v46, %v221_v28 }
  0xdc   :  { %v153_v49 = vpop.f32.mrf.mxu0  ;;  %v185_v50 = vpop.f32.mrf.mxu1 }
  0xdd   :  { %207 = vst.msk [vmem:[%s440_s3 + $0x30] sm:$0xff] %vm200_vm1, %v162_v47  ;;  %215 = vst.msk [vmem:[%s440_s3 + $0x70] sm:$0xff] %vm200_vm1, %v194_v48  ;;  %v154_v51 = vadd.f32 %v221_v28, %v153_v49  ;;  %v186_v52 = vadd.f32 %v221_v28, %v185_v50 }
  0xde   :  { %v261_v53 = vpop.f32.mrf.mxu0  ;;  %v269_v54 = vpop.f32.mrf.mxu1 }
  0xdf   :  { %205 = vst.msk [vmem:[%s440_s3 + $0x20] sm:$0xff] %vm200_vm1, %v154_v51  ;;  %213 = vst.msk [vmem:[%s440_s3 + $0x60] sm:$0xff] %vm200_vm1, %v186_v52  ;;  %v165_v55 = vadd.f32 %v261_v53, %v221_v28  ;;  %v197_v56 = vadd.f32 %v269_v54, %v221_v28 }
  0xe0   :  { %v156_v57 = vpop.f32.mrf.mxu0  ;;  %v188_v58 = vpop.f32.mrf.mxu1 }
  0xe1   :  { %208 = vst.msk [vmem:[%s440_s3 + $0x38] sm:$0xff] %vm200_vm1, %v165_v55  ;;  %216 = vst.msk [vmem:[%s440_s3 + $0x78] sm:$0xff] %vm200_vm1, %v197_v56  ;;  %v157_v59 = vadd.f32 %v221_v28, %v156_v57  ;;  %v189_v60 = vadd.f32 %v221_v28, %v188_v58 }
  0xe3   :  { %206 = vst.msk [vmem:[%s440_s3 + $0x28] sm:$0xff] %vm200_vm1, %v157_v59  ;;  %214 = vst.msk [vmem:[%s440_s3 + $0x68] sm:$0xff] %vm200_vm1, %v189_v60 }

// kernel: _lambda_.19
= control target key start
LH: loop header
LB: loop body
LE: loop exit
PB: predicated region body
PF: predicated region fallthrough
CT: control target
= control target key end

     0   :  { %vm43_vm0 = vcmask 261120   ;;  %vm361_vm1 = vcmask 257024   ;;  %vm643_vm2 = vcmask 781312   ;;  %s1212_s0 = inlined_call_operand.vmem [shape: f32[128,32], index: 0, kind: input, shape index: {}]   ;;  %s1213_s3 = inlined_call_operand.vmem [shape: bf16[32,96], index: 3, kind: input, shape index: {}]   ;;  %s1214_s1 = inlined_call_operand.vmem [shape: f32[1,32], index: 1, kind: input, shape index: {}]   ;;  %s1215_s2 = inlined_call_operand.vmem [shape: f32[1,32], index: 2, kind: input, shape index: {}]   ;;  %s1216_s4 = inlined_call_operand.vmem [shape: f32[1,96], index: 4, kind: input, shape index: {}]   ;;  %s1217_s5 = inlined_call_operand.vmem [shape: bf16[128,96], index: 5, kind: output, shape index: {}]  }
   0x1   :  { %v25_v0 = vld [vmem:[%s1212_s0] sm:$0xff]  ;;  %v26_v2 = vld [vmem:[%s1212_s0 + $0x8] sm:$0xff]  ;;  %v27_v8 = vld [vmem:[%s1212_s0 + $0x10] sm:$0xff] }
   0x2   :  { %v33_v1 = vld [vmem:[%s1212_s0 + $0x40] sm:$0xff]  ;;  %v44_v3 = vsel %vm43_vm0, %v25_v0, 0.0  ;;  %v34_v5 = vld [vmem:[%s1212_s0 + $0x48] sm:$0xff]  ;;  %v47_v6 = vsel %vm43_vm0, %v26_v2, 0.0  ;;  %v28_v9 = vld [vmem:[%s1212_s0 + $0x18] sm:$0xff]  ;;  %v50_v10 = vsel %vm43_vm0, %v27_v8, 0.0 }
   0x3   :  { %v68_v4 = vsel %vm43_vm0, %v33_v1, 0.0  ;;  %45 = vadd.xlane.f32.xlu0 %v44_v3  ;;  %v71_v7 = vsel %vm43_vm0, %v34_v5, 0.0  ;;  %v53_v11 = vsel %vm43_vm0, %v28_v9, 0.0  ;;  %v882_v12 = vld [vmem:[%s1212_s0 + $0x50] sm:$0xff]  ;;  %v887_v13 = vld [vmem:[%s1212_s0 + $0x58] sm:$0xff]  ;;  %v896_v16 = vld [vmem:[%s1212_s0 + $0x20] sm:$0xff] }
   0x4   :  { %69 = vadd.xlane.f32.xlu1 %v68_v4  ;;  %v74_v14 = vsel %vm43_vm0, %v882_v12, 0.0  ;;  %v77_v15 = vsel %vm43_vm0, %v887_v13, 0.0  ;;  %v901_v17 = vld [vmem:[%s1212_s0 + $0x28] sm:$0xff]  ;;  %v56_v18 = vsel %vm43_vm0, %v896_v16, 0.0  ;;  %v910_v20 = vld [vmem:[%s1212_s0 + $0x60] sm:$0xff]  ;;  %v924_v24 = vld [vmem:[%s1212_s0 + $0x30] sm:$0xff] }
   0x5   :  { %v59_v19 = vsel %vm43_vm0, %v901_v17, 0.0  ;;  %v915_v21 = vld [vmem:[%s1212_s0 + $0x68] sm:$0xff]  ;;  %v80_v22 = vsel %vm43_vm0, %v910_v20, 0.0  ;;  %v929_v25 = vld [vmem:[%s1212_s0 + $0x38] sm:$0xff]  ;;  %v62_v26 = vsel %vm43_vm0, %v924_v24, 0.0  ;;  %v938_v28 = vld [vmem:[%s1212_s0 + $0x70] sm:$0xff] }
   0x6   :  { %v83_v23 = vsel %vm43_vm0, %v915_v21, 0.0  ;;  %v65_v27 = vsel %vm43_vm0, %v929_v25, 0.0  ;;  %v943_v29 = vld [vmem:[%s1212_s0 + $0x78] sm:$0xff]  ;;  %v86_v30 = vsel %vm43_vm0, %v938_v28, 0.0 }
   0x7   :  { %48 = vadd.xlane.f32.xlu0 %v47_v6  ;;  %v89_v31 = vsel %vm43_vm0, %v943_v29, 0.0 }
   0x8   :  { %72 = vadd.xlane.f32.xlu1 %v71_v7 }
   0xb   :  { %51 = vadd.xlane.f32.xlu0 %v50_v10 }
   0xc   :  { %54 = vadd.xlane.f32.xlu1 %v53_v11 }
   0xf   :  { %75 = vadd.xlane.f32.xlu0 %v74_v14 }
  0x10   :  { %78 = vadd.xlane.f32.xlu1 %v77_v15 }
  0x13   :  { %57 = vadd.xlane.f32.xlu0 %v56_v18 }
  0x14   :  { %60 = vadd.xlane.f32.xlu1 %v59_v19 }
  0x17   :  { %81 = vadd.xlane.f32.xlu0 %v80_v22 }
  0x18   :  { %84 = vadd.xlane.f32.xlu1 %v83_v23 }
  0x1b   :  { %63 = vadd.xlane.f32.xlu0 %v62_v26 }
  0x1c   :  { %66 = vadd.xlane.f32.xlu1 %v65_v27 }
  0x1f   :  { %87 = vadd.xlane.f32.xlu0 %v86_v30 }
  0x20   :  { %90 = vadd.xlane.f32.xlu1 %v89_v31 }
  0x8c   :  { %v46_v32 = vpop.xlane.xlu0 %45 }
  0x8d   :  { %v70_v33 = vpop.xlane.xlu1 %69  ;;  %v93_v34 = vmul.f32 0.03125, %v46_v32 }
  0x8e   :  { %v101_v35 = vmul.f32 0.03125, %v70_v33 }
  0x8f   :  { %v949_v36 = vsub.f32 %v25_v0, %v93_v34 }
  0x90   :  { %v951_v37 = vsub.f32 %v33_v1, %v101_v35  ;;  %v49_v38 = vpop.xlane.xlu0 %48 }
  0x91   :  { %v73_v39 = vpop.xlane.xlu1 %72  ;;  %v94_v40 = vmul.f32 0.03125, %v49_v38  ;;  %v125_v42 = vmul.f32 %v949_v36, %v949_v36 }
  0x92   :  { %v102_v41 = vmul.f32 0.03125, %v73_v39  ;;  %v133_v43 = vmul.f32 %v951_v37, %v951_v37 }
  0x93   :  { %v957_v44 = vsub.f32 %v26_v2, %v94_v40  ;;  %v141_v46 = vsel %vm43_vm0, %v125_v42, 0.0 }
  0x94   :  { %v959_v45 = vsub.f32 %v34_v5, %v102_v41  ;;  %142 = vadd.xlane.f32.xlu0 %v141_v46  ;;  %v52_v47 = vpop.xlane.xlu0 %51  ;;  %v165_v49 = vsel %vm43_vm0, %v133_v43, 0.0 }
  0x95   :  { %v55_v48 = vpop.xlane.xlu1 %54  ;;  %v95_v50 = vmul.f32 0.03125, %v52_v47  ;;  %v126_v52 = vmul.f32 %v957_v44, %v957_v44 }
  0x96   :  { %v96_v51 = vmul.f32 0.03125, %v55_v48  ;;  %v134_v53 = vmul.f32 %v959_v45, %v959_v45 }
  0x97   :  { %v967_v54 = vsub.f32 %v27_v8, %v95_v50  ;;  %v144_v56 = vsel %vm43_vm0, %v126_v52, 0.0 }
  0x98   :  { %v969_v55 = vsub.f32 %v28_v9, %v96_v51  ;;  %166 = vadd.xlane.f32.xlu0 %v165_v49  ;;  %145 = vadd.xlane.f32.xlu1 %v144_v56  ;;  %v76_v57 = vpop.xlane.xlu0 %75  ;;  %v168_v59 = vsel %vm43_vm0, %v134_v53, 0.0  ;;  %v785_v53 = vld [vmem:[%s1213_s3] sm:$0xff]  }
  0x99   :  { %v79_v58 = vpop.xlane.xlu1 %78  ;;  %v103_v60 = vmul.f32 0.03125, %v76_v57  ;;  %v127_v62 = vmul.f32 %v967_v54, %v967_v54 }
  0x9a   :  { %v104_v61 = vmul.f32 0.03125, %v79_v58  ;;  %v128_v63 = vmul.f32 %v969_v55, %v969_v55 }
  0x9b   :  { %v978_v0 = vsub.f32 %v882_v12, %v103_v60  ;;  %v147_v2 = vsel %vm43_vm0, %v127_v62, 0.0 }
  0x9c   :  { %v981_v1 = vsub.f32 %v887_v13, %v104_v61  ;;  %169 = vadd.xlane.f32.xlu1 %v168_v59  ;;  %148 = vadd.xlane.f32.xlu0 %v147_v2  ;;  %v58_v3 = vpop.xlane.xlu0 %57  ;;  %v150_v5 = vsel %vm43_vm0, %v128_v63, 0.0 }
  0x9d   :  { %v61_v4 = vpop.xlane.xlu1 %60  ;;  %v97_v6 = vmul.f32 0.03125, %v58_v3  ;;  %v135_v8 = vmul.f32 %v978_v0, %v978_v0 }
  0x9e   :  { %v98_v7 = vmul.f32 0.03125, %v61_v4  ;;  %v136_v9 = vmul.f32 %v981_v1, %v981_v1 }
  0x9f   :  { %v990_v10 = vsub.f32 %v896_v16, %v97_v6  ;;  %v171_v12 = vsel %vm43_vm0, %v135_v8, 0.0 }
  0xa0   :  { %v993_v11 = vsub.f32 %v901_v17, %v98_v7  ;;  %151 = vadd.xlane.f32.xlu1 %v150_v5  ;;  %172 = vadd.xlane.f32.xlu0 %v171_v12  ;;  %v82_v13 = vpop.xlane.xlu0 %81  ;;  %v174_v15 = vsel %vm43_vm0, %v136_v9, 0.0 }
  0xa1   :  { %v85_v14 = vpop.xlane.xlu1 %84  ;;  %v105_v18 = vmul.f32 0.03125, %v82_v13  ;;  %v129_v22 = vmul.f32 %v990_v10, %v990_v10 }
  0xa2   :  { %v106_v19 = vmul.f32 0.03125, %v85_v14  ;;  %v130_v16 = vmul.f32 %v993_v11, %v993_v11 }
  0xa3   :  { %v1002_v23 = vsub.f32 %v910_v20, %v105_v18  ;;  %v153_v26 = vsel %vm43_vm0, %v129_v22, 0.0 }
  0xa4   :  { %v1005_v17 = vsub.f32 %v915_v21, %v106_v19  ;;  %175 = vadd.xlane.f32.xlu1 %v174_v15  ;;  %154 = vadd.xlane.f32.xlu0 %v153_v26  ;;  %v64_v27 = vpop.xlane.xlu0 %63  ;;  %v156_v31 = vsel %vm43_vm0, %v130_v16, 0.0 }
  0xa5   :  { %v67_v30 = vpop.xlane.xlu1 %66  ;;  %v99_v32 = vmul.f32 0.03125, %v64_v27  ;;  %v137_v34 = vmul.f32 %v1002_v23, %v1002_v23 }
  0xa6   :  { %v100_v33 = vmul.f32 0.03125, %v67_v30  ;;  %v138_v20 = vmul.f32 %v1005_v17, %v1005_v17  ;;  %v1048_v30 = vld [vmem:[%s1214_s1] ss:$0 sm:$0xff] }
  0xa7   :  { %v1014_v35 = vsub.f32 %v924_v24, %v99_v32  ;;  %v177_v38 = vsel %vm43_vm0, %v137_v34, 0.0  ;;  %v1054_v34 = vld [vmem:[%s1215_s2] ss:$0 sm:$0xff] }
  0xa8   :  { %v1017_v21 = vsub.f32 %v929_v25, %v100_v33  ;;  %157 = vadd.xlane.f32.xlu1 %v156_v31  ;;  %178 = vadd.xlane.f32.xlu0 %v177_v38  ;;  %v88_v39 = vpop.xlane.xlu0 %87  ;;  %v180_v41 = vsel %vm43_vm0, %v138_v20, 0.0 }
  0xa9   :  { %v91_v40 = vpop.xlane.xlu1 %90  ;;  %v107_v42 = vmul.f32 0.03125, %v88_v39  ;;  %v131_v46 = vmul.f32 %v1014_v35, %v1014_v35 }
  0xaa   :  { %v108_v43 = vmul.f32 0.03125, %v91_v40  ;;  %v132_v24 = vmul.f32 %v1017_v21, %v1017_v21 }
  0xab   :  { %v1026_v47 = vsub.f32 %v938_v28, %v107_v42  ;;  %v159_v48 = vsel %vm43_vm0, %v131_v46, 0.0 }
  0xac   :  { %v1029_v25 = vsub.f32 %v943_v29, %v108_v43  ;;  %181 = vadd.xlane.f32.xlu1 %v180_v41  ;;  %160 = vadd.xlane.f32.xlu0 %v159_v48  ;;  %v162_v49 = vsel %vm43_vm0, %v132_v24, 0.0  ;;  %v783_v29 = vld [vmem:[%s1213_s3 + $0x8] sm:$0xff]  }
  0xad   :  { %v139_v50 = vmul.f32 %v1026_v47, %v1026_v47  ;;  %759 = vmatprep.subr.bf16.mxu0 %v783_v29  ;;  %779 = vmatprep.subr.bf16.mxu1 %v783_v29 }
  0xae   :  { %v140_v51 = vmul.f32 %v1029_v25, %v1029_v25  ;;  %760 = vmatpush3.bf16.msra.mxu0 %v783_v29  ;;  %781 = vmatpush3.bf16.msra.mxu1 %v783_v29 }
  0xaf   :  { %v183_v52 = vsel %vm43_vm0, %v139_v50, 0.0  ;;  %761 = vmatprep.subr.bf16.mxu0 %v785_v53  ;;  %780 = vmatprep.subr.bf16.mxu1 %v785_v53 }
  0xb0   :  { %163 = vadd.xlane.f32.xlu1 %v162_v49  ;;  %184 = vadd.xlane.f32.xlu0 %v183_v52  ;;  %v186_v28 = vsel %vm43_vm0, %v140_v51, 0.0 }
  0xb2   :  { %762 = vmatpush3.bf16.msra.mxu0 %v785_v53  ;;  %782 = vmatpush3.bf16.msra.mxu1 %v785_v53 }
  0xb4   :  { %187 = vadd.xlane.f32.xlu1 %v186_v28 }
 0x11d   :  { %v143_v56 = vpop.xlane.xlu0 %142 }
 0x11e   :  { %v189_v57 = vmul.f32 0.03125, %v143_v56 }
 0x120   :  { %v205_v58 = vadd.f32 1e-05, %v189_v57 }
 0x121   :  { %v146_v59 = vpop.xlane.xlu1 %145  ;;  %v167_v60 = vpop.xlane.xlu0 %166 }
 0x122   :  { %793 = vrsqrt.f32 %v205_v58  ;;  %v190_v61 = vmul.f32 0.03125, %v146_v59  ;;  %v197_v62 = vmul.f32 0.03125, %v167_v60 }
 0x124   :  { %v206_v63 = vadd.f32 1e-05, %v190_v61  ;;  %v213_v2 = vadd.f32 1e-05, %v197_v62 }
 0x125   :  { %v170_v3 = vpop.xlane.xlu1 %169  ;;  %v149_v4 = vpop.xlane.xlu0 %148 }
 0x126   :  { %795 = vrsqrt.f32 %v206_v63  ;;  %v198_v5 = vmul.f32 0.03125, %v170_v3  ;;  %v191_v6 = vmul.f32 0.03125, %v149_v4 }
 0x127   :  { %797 = vrsqrt.f32 %v213_v2 }
 0x128   :  { %v214_v7 = vadd.f32 1e-05, %v198_v5  ;;  %v207_v8 = vadd.f32 1e-05, %v191_v6 }
 0x129   :  { %v152_v9 = vpop.xlane.xlu1 %151  ;;  %v173_v12 = vpop.xlane.xlu0 %172 }
 0x12a   :  { %799 = vrsqrt.f32 %v214_v7  ;;  %v192_v13 = vmul.f32 0.03125, %v152_v9  ;;  %v199_v14 = vmul.f32 0.03125, %v173_v12 }
 0x12b   :  { %801 = vrsqrt.f32 %v207_v8 }
 0x12c   :  { %v208_v15 = vadd.f32 1e-05, %v192_v13  ;;  %v215_v18 = vadd.f32 1e-05, %v199_v14 }
 0x12d   :  { %v176_v19 = vpop.xlane.xlu1 %175  ;;  %v155_v22 = vpop.xlane.xlu0 %154 }
 0x12e   :  { %803 = vrsqrt.f32 %v208_v15  ;;  %v200_v16 = vmul.f32 0.03125, %v176_v19  ;;  %v193_v26 = vmul.f32 0.03125, %v155_v22 }
 0x12f   :  { %v794_v27 = vpop.eup %793  ;;  %805 = vrsqrt.f32 %v215_v18 }
 0x130   :  { %v237_v31 = vmul.f32 %v794_v27, %v949_v36  ;;  %v216_v32 = vadd.f32 1e-05, %v200_v16  ;;  %v209_v33 = vadd.f32 1e-05, %v193_v26 }
 0x131   :  { %v158_v20 = vpop.xlane.xlu1 %157  ;;  %v179_v38 = vpop.xlane.xlu0 %178 }
 0x132   :  { %v259_v39 = vmul.f32 %v1048_v30, %v237_v31  ;;  %807 = vrsqrt.f32 %v216_v32  ;;  %v194_v40 = vmul.f32 0.03125, %v158_v20  ;;  %v201_v41 = vmul.f32 0.03125, %v179_v38 }
 0x133   :  { %v796_v42 = vpop.eup %795  ;;  %809 = vrsqrt.f32 %v209_v33 }
 0x134   :  { %v798_v43 = vpop.eup %797  ;;  %v281_v46 = vadd.f32 %v1054_v34, %v259_v39  ;;  %v238_v36 = vmul.f32 %v796_v42, %v957_v44  ;;  %v210_v24 = vadd.f32 1e-05, %v194_v40  ;;  %v217_v48 = vadd.f32 1e-05, %v201_v41 }
 0x135   :  { %v245_v49 = vmul.f32 %v798_v43, %v951_v37  ;;  %v182_v50 = vpop.xlane.xlu1 %181  ;;  %v161_v51 = vpop.xlane.xlu0 %160 }
 0x136   :  { %v717_v52 = vpack.c.bf16 %v281_v46, %v281_v46  ;;  %v260_v28 = vmul.f32 %v1048_v30, %v238_v36  ;;  %811 = vrsqrt.f32 %v210_v24  ;;  %v202_v29 = vmul.f32 0.03125, %v182_v50 }
 0x137   :  { %v800_v53 = vpop.eup %799  ;;  %v267_v56 = vmul.f32 %v1048_v30, %v245_v49  ;;  %813 = vrsqrt.f32 %v217_v48  ;;  %v195_v57 = vmul.f32 0.03125, %v161_v51 }
 0x138   :  { %v802_v58 = vpop.eup %801  ;;  %362 = vst.msk [vmem:[#allocation2] sm:$0xf] %vm361_vm1, %v717_v52  ;;  %v282_v44 = vadd.f32 %v1054_v34, %v260_v28  ;;  %v246_v59 = vmul.f32 %v800_v53, %v959_v45  ;;  %v218_v37 = vadd.f32 1e-05, %v202_v29 }
 0x139   :  { %v289_v60 = vadd.f32 %v1054_v34, %v267_v56  ;;  %v239_v61 = vmul.f32 %v802_v58, %v967_v54  ;;  %v211_v62 = vadd.f32 1e-05, %v195_v57  ;;  %v164_v63 = vpop.xlane.xlu1 %163  ;;  %v185_v2 = vpop.xlane.xlu0 %184 }
 0x13a   :  { %v718_v3 = vpack.c.bf16 %v282_v44, %v282_v44  ;;  %v268_v4 = vmul.f32 %v1048_v30, %v246_v59  ;;  %815 = vrsqrt.f32 %v218_v37  ;;  %v196_v5 = vmul.f32 0.03125, %v164_v63 }
 0x13b   :  { %v804_v6 = vpop.eup %803  ;;  %v725_v7 = vpack.c.bf16 %v289_v60, %v289_v60  ;;  %v261_v8 = vmul.f32 %v1048_v30, %v239_v61  ;;  %817 = vrsqrt.f32 %v211_v62  ;;  %v203_v9 = vmul.f32 0.03125, %v185_v2 }
 0x13c   :  { %v806_v45 = vpop.eup %805  ;;  %363 = vst.msk [vmem:[#allocation2 + $0x4] sm:$0xf] %vm361_vm1, %v718_v3  ;;  %v290_v12 = vadd.f32 %v1054_v34, %v268_v4  ;;  %v240_v54 = vmul.f32 %v804_v6, %v969_v55  ;;  %v212_v13 = vadd.f32 1e-05, %v196_v5 }
 0x13d   :  { %370 = vst.msk [vmem:[#allocation2 + $0x20] sm:$0xf] %vm361_vm1, %v725_v7  ;;  %v283_v14 = vadd.f32 %v1054_v34, %v261_v8  ;;  %v247_v15 = vmul.f32 %v806_v45, %v978_v0  ;;  %v219_v18 = vadd.f32 1e-05, %v203_v9  ;;  %v188_v19 = vpop.xlane.xlu1 %187 }
 0x13e   :  { %v726_v22 = vpack.c.bf16 %v290_v12, %v290_v12  ;;  %v262_v16 = vmul.f32 %v1048_v30, %v240_v54  ;;  %819 = vrsqrt.f32 %v212_v13  ;;  %v204_v26 = vmul.f32 0.03125, %v188_v19 }
 0x13f   :  { %v808_v27 = vpop.eup %807  ;;  %v719_v31 = vpack.c.bf16 %v283_v14, %v283_v14  ;;  %v269_v32 = vmul.f32 %v1048_v30, %v247_v15  ;;  %821 = vrsqrt.f32 %v219_v18 }
 0x140   :  { %v810_v55 = vpop.eup %809  ;;  %371 = vst.msk [vmem:[#allocation2 + $0x24] sm:$0xf] %vm361_vm1, %v726_v22  ;;  %v284_v33 = vadd.f32 %v1054_v34, %v262_v16  ;;  %v248_v20 = vmul.f32 %v808_v27, %v981_v1  ;;  %v220_v0 = vadd.f32 1e-05, %v204_v26 }
 0x141   :  { %364 = vst.msk [vmem:[#allocation2 + $0x8] sm:$0xf] %vm361_vm1, %v719_v31  ;;  %v291_v38 = vadd.f32 %v1054_v34, %v269_v32  ;;  %v241_v39 = vmul.f32 %v810_v55, %v990_v10 }
 0x142   :  { %v720_v40 = vpack.c.bf16 %v284_v33, %v284_v33  ;;  %v270_v41 = vmul.f32 %v1048_v30, %v248_v20  ;;  %823 = vrsqrt.f32 %v220_v0 }
 0x143   :  { %v812_v42 = vpop.eup %811  ;;  %v727_v43 = vpack.c.bf16 %v291_v38, %v291_v38  ;;  %v263_v46 = vmul.f32 %v1048_v30, %v241_v39  ;;  %v784_v36 = vld [vmem:[#allocation2] sm:$0xff]  }
 0x144   :  { %v814_v24 = vpop.eup %813  ;;  %365 = vst.msk [vmem:[#allocation2 + $0xc] sm:$0xf] %vm361_vm1, %v720_v40  ;;  %v292_v1 = vadd.f32 %v1054_v34, %v270_v41  ;;  %v242_v48 = vmul.f32 %v812_v42, %v993_v11  ;;  %763 = vmatprep.mubr.msk.bf16.mxu0 %vm43_vm0, %v784_v36 }
 0x145   :  { %372 = vst.msk [vmem:[#allocation2 + $0x28] sm:$0xf] %vm361_vm1, %v727_v43  ;;  %v285_v10 = vadd.f32 %v1054_v34, %v263_v46  ;;  %v249_v49 = vmul.f32 %v814_v24, %v1002_v23 }
 0x146   :  { %v728_v50 = vpack.c.bf16 %v292_v1, %v292_v1  ;;  %v264_v51 = vmul.f32 %v1048_v30, %v242_v48 }
 0x147   :  { %v816_v52 = vpop.eup %815  ;;  %v721_v28 = vpack.c.bf16 %v285_v10, %v285_v10  ;;  %v271_v29 = vmul.f32 %v1048_v30, %v249_v49  ;;  %v786_v53 = vld [vmem:[#allocation2 + $0x20] sm:$0xff]  }
 0x148   :  { %v818_v56 = vpop.eup %817  ;;  %373 = vst.msk [vmem:[#allocation2 + $0x2c] sm:$0xf] %vm361_vm1, %v728_v50  ;;  %v286_v11 = vadd.f32 %v1054_v34, %v264_v51  ;;  %v250_v57 = vmul.f32 %v816_v52, %v1005_v17  ;;  %771 = vmatprep.mubr.msk.bf16.mxu1 %vm43_vm0, %v786_v53 }
 0x149   :  { %366 = vst.msk [vmem:[#allocation2 + $0x10] sm:$0xf] %vm361_vm1, %v721_v28  ;;  %v293_v23 = vadd.f32 %v1054_v34, %v271_v29  ;;  %v243_v58 = vmul.f32 %v818_v56, %v1014_v35 }
 0x14a   :  { %v722_v44 = vpack.c.bf16 %v286_v11, %v286_v11  ;;  %v272_v59 = vmul.f32 %v1048_v30, %v250_v57 }
 0x14b   :  { %v820_v37 = vpop.eup %819  ;;  %v729_v60 = vpack.c.bf16 %v293_v23, %v293_v23  ;;  %v265_v61 = vmul.f32 %v1048_v30, %v243_v58  ;;  %v787_v62 = vld [vmem:[#allocation2 + $0x8] sm:$0xff]  }
 0x14c   :  { %v822_v63 = vpop.eup %821  ;;  %367 = vst.msk [vmem:[#allocation2 + $0x14] sm:$0xf] %vm361_vm1, %v722_v44  ;;  %v294_v17 = vadd.f32 %v1054_v34, %v272_v59  ;;  %v244_v2 = vmul.f32 %v820_v37, %v1017_v21  ;;  %764 = vmatmul.mubr.msk.bf16.vlgmr.msra.gmra.mxu0 %vm43_vm0, %v787_v62 }
 0x14d   :  { %374 = vst.msk [vmem:[#allocation2 + $0x30] sm:$0xf] %vm361_vm1, %v729_v60  ;;  %v287_v35 = vadd.f32 %v1054_v34, %v265_v61  ;;  %v251_v3 = vmul.f32 %v822_v63, %v1026_v47 }
 0x14e   :  { %v730_v4 = vpack.c.bf16 %v294_v17, %v294_v17  ;;  %v266_v5 = vmul.f32 %v1048_v30, %v244_v2 }
 0x14f   :  { %v824_v6 = vpop.eup %823  ;;  %v723_v7 = vpack.c.bf16 %v287_v35, %v287_v35  ;;  %v273_v8 = vmul.f32 %v1048_v30, %v251_v3  ;;  %v788_v9 = vld [vmem:[#allocation2 + $0x28] sm:$0xff]  }
 0x150   :  { %375 = vst.msk [vmem:[#allocation2 + $0x34] sm:$0xf] %vm361_vm1, %v730_v4  ;;  %v288_v21 = vadd.f32 %v1054_v34, %v266_v5  ;;  %v252_v45 = vmul.f32 %v824_v6, %v1029_v25  ;;  %772 = vmatmul.mubr.msk.bf16.vlgmr.msra.gmra.mxu1 %vm43_vm0, %v788_v9 }
 0x151   :  { %368 = vst.msk [vmem:[#allocation2 + $0x18] sm:$0xf] %vm361_vm1, %v723_v7  ;;  %v295_v47 = vadd.f32 %v1054_v34, %v273_v8 }
 0x152   :  { %v724_v12 = vpack.c.bf16 %v288_v21, %v288_v21  ;;  %v274_v54 = vmul.f32 %v1048_v30, %v252_v45 }
 0x153   :  { %v731_v13 = vpack.c.bf16 %v295_v47, %v295_v47  ;;  %v789_v14 = vld [vmem:[#allocation2 + $0x10] sm:$0xff]  }
 0x154   :  { %369 = vst.msk [vmem:[#allocation2 + $0x1c] sm:$0xf] %vm361_vm1, %v724_v12  ;;  %v296_v15 = vadd.f32 %v1054_v34, %v274_v54  ;;  %767 = vmatprep.mubr.msk.bf16.mxu0 %vm43_vm0, %v789_v14  ;;  %v1130_v34 = vld [vmem:[%s1216_s4] ss:$0 sm:$0xff] }
 0x155   :  { %376 = vst.msk [vmem:[#allocation2 + $0x38] sm:$0xf] %vm361_vm1, %v731_v13 }
 0x156   :  { %v732_v25 = vpack.c.bf16 %v296_v15, %v296_v15 }
 0x157   :  { %v790_v18 = vld [vmem:[#allocation2 + $0x30] sm:$0xff]  }
 0x158   :  { %377 = vst.msk [vmem:[#allocation2 + $0x3c] sm:$0xf] %vm361_vm1, %v732_v25  ;;  %775 = vmatprep.mubr.msk.bf16.mxu1 %vm43_vm0, %v790_v18 }
 0x15b   :  { %v791_v19 = vld [vmem:[#allocation2 + $0x18] sm:$0xff]  }
 0x15c   :  { %768 = vmatmul.mubr.msk.bf16.gmra.mxu0 %vm43_vm0, %v791_v19 }
 0x15f   :  { %v792_v30 = vld [vmem:[#allocation2 + $0x38] sm:$0xff]  }
 0x160   :  { %776 = vmatmul.mubr.msk.bf16.gmra.mxu1 %vm43_vm0, %v792_v30 }
 0x20c   :  { %v765_v22 = vpop.f32.mrf.mxu0 }
 0x20d   :  { %v525_v16 = vadd.f32 %v765_v22, %v1130_v34 }
 0x20e   :  { %v516_v26 = vpop.f32.mrf.mxu0 }
 0x20f   :  { %v735_v27 = vpack.c.bf16 %v525_v16, %v525_v16  ;;  %v517_v31 = vadd.f32 %v1130_v34, %v516_v26 }
 0x210   :  { %v766_v32 = vpop.f32.mrf.mxu0  ;;  %v773_v55 = vpop.f32.mrf.mxu1 }
 0x211   :  { %646 = vst.msk [vmem:[%s1217_s5 + $0x8] sm:$0xf] %vm643_vm2, %v735_v27  ;;  %v733_v33 = vpack.c.bf16 %v517_v31, %v517_v31  ;;  %v528_v20 = vadd.f32 %v766_v32, %v1130_v34  ;;  %v557_v0 = vadd.f32 %v773_v55, %v1130_v34 }
 0x212   :  { %v519_v38 = vpop.f32.mrf.mxu0  ;;  %v548_v39 = vpop.f32.mrf.mxu1 }
 0x213   :  { %644 = vst.msk [vmem:[%s1217_s5] sm:$0xf] %vm643_vm2, %v733_v33  ;;  %v736_v40 = vpack.c.bf16 %v528_v20, %v528_v20  ;;  %v743_v41 = vpack.c.bf16 %v557_v0, %v557_v0  ;;  %v520_v42 = vadd.f32 %v1130_v34, %v519_v38  ;;  %v549_v43 = vadd.f32 %v1130_v34, %v548_v39 }
 0x214   :  { %v774_v46 = vpop.f32.mrf.mxu1 }
 0x215   :  { %647 = vst.msk [vmem:[%s1217_s5 + $0xc] sm:$0xf] %vm643_vm2, %v736_v40  ;;  %654 = vst.msk [vmem:[%s1217_s5 + $0x28] sm:$0xf] %vm643_vm2, %v743_v41  ;;  %v734_v36 = vpack.c.bf16 %v520_v42, %v520_v42  ;;  %v741_v24 = vpack.c.bf16 %v549_v43, %v549_v43  ;;  %v560_v1 = vadd.f32 %v774_v46, %v1130_v34 }
 0x216   :  { %v551_v48 = vpop.f32.mrf.mxu1 }
 0x217   :  { %645 = vst.msk [vmem:[%s1217_s5 + $0x4] sm:$0xf] %vm643_vm2, %v734_v36  ;;  %652 = vst.msk [vmem:[%s1217_s5 + $0x20] sm:$0xf] %vm643_vm2, %v741_v24  ;;  %v744_v10 = vpack.c.bf16 %v560_v1, %v560_v1  ;;  %v552_v49 = vadd.f32 %v1130_v34, %v551_v48 }
 0x219   :  { %655 = vst.msk [vmem:[%s1217_s5 + $0x2c] sm:$0xf] %vm643_vm2, %v744_v10  ;;  %v742_v50 = vpack.c.bf16 %v552_v49, %v552_v49 }
 0x21b   :  { %653 = vst.msk [vmem:[%s1217_s5 + $0x24] sm:$0xf] %vm643_vm2, %v742_v50 }
 0x21c   :  { %v769_v51 = vpop.f32.mrf.mxu0 }
 0x21d   :  { %v541_v52 = vadd.f32 %v769_v51, %v1130_v34 }
 0x21e   :  { %v532_v28 = vpop.f32.mrf.mxu0 }
 0x21f   :  { %v739_v29 = vpack.c.bf16 %v541_v52, %v541_v52  ;;  %v533_v53 = vadd.f32 %v1130_v34, %v532_v28 }
 0x220   :  { %v770_v56 = vpop.f32.mrf.mxu0  ;;  %v777_v11 = vpop.f32.mrf.mxu1 }
 0x221   :  { %650 = vst.msk [vmem:[%s1217_s5 + $0x18] sm:$0xf] %vm643_vm2, %v739_v29  ;;  %v737_v57 = vpack.c.bf16 %v533_v53, %v533_v53  ;;  %v544_v23 = vadd.f32 %v770_v56, %v1130_v34  ;;  %v573_v58 = vadd.f32 %v777_v11, %v1130_v34 }
 0x222   :  { %v535_v44 = vpop.f32.mrf.mxu0  ;;  %v564_v59 = vpop.f32.mrf.mxu1 }
 0x223   :  { %648 = vst.msk [vmem:[%s1217_s5 + $0x10] sm:$0xf] %vm643_vm2, %v737_v57  ;;  %v740_v37 = vpack.c.bf16 %v544_v23, %v544_v23  ;;  %v747_v60 = vpack.c.bf16 %v573_v58, %v573_v58  ;;  %v536_v61 = vadd.f32 %v1130_v34, %v535_v44  ;;  %v565_v62 = vadd.f32 %v1130_v34, %v564_v59 }
 0x224   :  { %v778_v63 = vpop.f32.mrf.mxu1 }
 0x225   :  { %651 = vst.msk [vmem:[%s1217_s5 + $0x1c] sm:$0xf] %vm643_vm2, %v740_v37  ;;  %658 = vst.msk [vmem:[%s1217_s5 + $0x38] sm:$0xf] %vm643_vm2, %v747_v60  ;;  %v738_v17 = vpack.c.bf16 %v536_v61, %v536_v61  ;;  %v745_v2 = vpack.c.bf16 %v565_v62, %v565_v62  ;;  %v576_v35 = vadd.f32 %v778_v63, %v1130_v34 }
 0x226   :  { %v567_v3 = vpop.f32.mrf.mxu1 }
 0x227   :  { %649 = vst.msk [vmem:[%s1217_s5 + $0x14] sm:$0xf] %vm643_vm2, %v738_v17  ;;  %656 = vst.msk [vmem:[%s1217_s5 + $0x30] sm:$0xf] %vm643_vm2, %v745_v2  ;;  %v748_v4 = vpack.c.bf16 %v576_v35, %v576_v35  ;;  %v568_v5 = vadd.f32 %v1130_v34, %v567_v3 }
 0x229   :  { %659 = vst.msk [vmem:[%s1217_s5 + $0x3c] sm:$0xf] %vm643_vm2, %v748_v4  ;;  %v746_v6 = vpack.c.bf16 %v568_v5, %v568_v5 }
 0x22b   :  { %657 = vst.msk [vmem:[%s1217_s5 + $0x34] sm:$0xf] %vm643_vm2, %v746_v6 }

// kernel: _lambda_.20
= control target key start
LH: loop header
LB: loop body
LE: loop exit
PB: predicated region body
PF: predicated region fallthrough
CT: control target
= control target key end

     0   :  { %s723_s12 = smov 0   ;;  %s725_s13 = smov 0   ;;  %s791_s0 = inlined_call_operand.vmem [shape: bf16[8,4,16,8], index: 0, kind: input, shape index: {}]   ;;  %s792_s1 = inlined_call_operand.vmem [shape: bf16[8,4,16,8], index: 1, kind: input, shape index: {}]   ;;  %s793_s2 = inlined_call_operand.vmem [shape: bf16[8,4,16,8], index: 2, kind: input, shape index: {}]   ;;  %s794_s3 = inlined_call_operand.vmem [shape: bf16[8,4,16,8], index: 3, kind: output, shape index: {}]  }
   0x1   :  { %s727_s14 = smov 0   ;;  %s729_s15 = smov 0  }
   0x2   :  { %s731_s16 = smov 0  }
   0x3 LB: > { %s22_s17 = sadd.s32 1, %s691_s14  ;;  %s25_s18 = sadd.s32 1, %s695_s15  ;;  %s699_s16 = sphi %s731_s16, %s13_s16   ;;  %s695_s15 = sphi %s729_s15, %s798_s15   ;;  %s691_s14 = sphi %s727_s14, %s797_s14   ;;  %s687_s13 = sphi %s725_s13, %s796_s13   ;;  %s683_s12 = sphi %s723_s12, %s795_s12  }
   0x4   : > { %p23_p0 = scmp.ge.s32.totalorder %s22_s17, 4  ;;  %p568_p1 = scmp.ge.s32.totalorder %s699_s16, 1 }
   0x5   : > { %p189_p2 = scmp.lt.s32.totalorder %s699_s16, 33 }
   0x6   : > { %s800_s17 = smov (%p23_p0, %s22_s17), 0  ;;  %s802_s18 = smov (!%p23_p0, %s25_s18), %s695_s15 }
   0x7   : > { %p190_p3 = pnand %p568_p1, %p189_p2  ;;  %p27_p4 = scmp.ge.s32.totalorder %s802_s18, 8 }
   0x8   : > { %p239_p5 = scmp.lt.s32.totalorder (!%p190_p3), %s687_s13, 7  ;;  %p241_p6 = scmp.lt.s32.totalorder (!%p190_p3), %s683_s12, 3 }
   0x9   : > { %s804_s18 = smov (%p27_p4, %s802_s18), 0  ;;  %193 = sbr.rel (%p190_p3) target bundleno = 741 (0x2e5), region = 32 }
   0xe   : > { %v701_v0 = vmov 0.0   ;;  %vm702_vm0 = vmmov 0   ;;  %s806_s13 = smov (!%p239_p5, %s687_s13), 7  ;;  %s808_s12 = smov (!%p241_p6, %s683_s12), 3  ;;  %vm292_vm1 = vcmask 64512   ;;  %vm342_vm2 = vcmask 130048  }
   0xf   : > { %596 = vmatprep.subr.bf16.mxu0 %v701_v0  ;;  %598 = vmatprep.mubr.msk.bf16.mxu0 %vm702_vm0, %v701_v0  ;;  %s570_s19 = sshll.u32 %s806_s13, 3  ;;  %s569_s20 = sshll.u32 %s808_s12, 1  ;;  %vm424_vm3 = vcmask 60416  }
  0x10   : > { %602 = vmatprep.subr.bf16.mxu1 %v701_v0  ;;  %604 = vmatprep.mubr.msk.bf16.mxu1 %vm702_vm0, %v701_v0  ;;  %s245_s21 = sadd.s32 %s570_s19, %s569_s20 }
  0x11   : > { %s753_s22 = sshll.u32 %s245_s21, 2 }
  0x12   : > { %s256_s25 = scalar_lea.vmem %s792_s1, %s753_s22  ;;  %s247_s28 = scalar_lea.vmem %s791_s0, %s753_s22 }
  0x13   : > { %v650_v1 = vld [vmem:[%s256_s25] sm:$0xff]   ;;  %s265_s4 = scalar_lea.vmem %s793_s2, %s753_s22  ;;  %s274_s7 = scalar_lea.vmem %s794_s3, %s753_s22 }
  0x14   : > { %v297_v2 = vsel %vm292_vm1, %v650_v1, 0  ;;  %v651_v3 = vld [vmem:[%s247_s28] sm:$0xff]  }
  0x15   : > { %597 = vmatpush3.bf16.xpose.msra.mxu0 %v297_v2  ;;  %v652_v22 = vld [vmem:[%s265_s4] sm:$0xff]  }
  0x16   : > { %603 = vmatpush3.bf16.msra.mxu1 %v652_v22 }
  0x1c   : > { %599 = vmatmul.mubr.msk.bf16.vlgmr.msra.gmra.mxu0 %vm292_vm1, %v651_v3 }
  0xdc   : > { %v333_v4 = vpop.f32.mrf.mxu0 }
  0xdd   : > { %v340_v5 = vmul.f32 0.35355338, %v333_v4 }
  0xde   : > { %v600_v6 = vpop.f32.mrf.mxu0 }
  0xdf   : > { %v343_v7 = vsel %vm342_vm2, %v340_v5, -inf }
  0xe0   : > { %344 = vmax.xlane.f32.xlu0 %v343_v7  ;;  %v336_v8 = vpop.f32.mrf.mxu0 }
  0xe1   : > { %v341_v9 = vmul.f32 0.35355338, %v336_v8 }
  0xe2   : > { %v601_v10 = vpop.f32.mrf.mxu0 }
  0xe3   : > { %v346_v11 = vsel %vm342_vm2, %v341_v9, -inf }
  0xe4   : > { %347 = vmax.xlane.f32.xlu0 %v346_v11 }
 0x169   : > { %v345_v12 = vpop.xlane.xlu0 %344 }
 0x16a   : > { %v349_v13 = vsub.f32 %v340_v5, %v345_v12 }
 0x16c   : > { %v351_v14 = vmul.f32 1.442695, %v349_v13 }
 0x16d   : > { %v348_v15 = vpop.xlane.xlu0 %347 }
 0x16e   : > { %653 = vpow2.f32 %v351_v14  ;;  %v350_v16 = vsub.f32 %v341_v9, %v348_v15 }
 0x170   : > { %v353_v17 = vmul.f32 1.442695, %v350_v16 }
 0x172   : > { %655 = vpow2.f32 %v353_v17 }
 0x17b   : > { %v654_v18 = vpop.eup %653 }
 0x17c   : > { %v355_v19 = vsel %vm342_vm2, %v654_v18, 0.0 }
 0x17d   : > { %356 = vadd.xlane.f32.xlu1 %v355_v19 }
 0x17f   : > { %v656_v20 = vpop.eup %655 }
 0x180   : > { %v358_v21 = vsel %vm342_vm2, %v656_v20, 0.0 }
 0x181   : > { %359 = vadd.xlane.f32.xlu1 %v358_v21 }
 0x206   : > { %v357_v23 = vpop.xlane.xlu1 %356 }
 0x207   : > { %657 = vrcp.f32 %v357_v23 }
 0x20a   : > { %v360_v24 = vpop.xlane.xlu1 %359 }
 0x20b   : > { %659 = vrcp.f32 %v360_v24 }
 0x214   : > { %v658_v25 = vpop.eup %657 }
 0x215   : > { %v363_v27 = vmul.f32 %v658_v25, %v654_v18 }
 0x218   : > { %v660_v26 = vpop.eup %659 }
 0x219   : > { %v364_v28 = vmul.f32 %v660_v26, %v656_v20 }
 0x21b   : > { %v365_v29 = vpack.c.bf16 %v364_v28, %v363_v27 }
 0x21d   : > { %605 = vmatmul.mubr.msk.bf16.vlgmr.msra.gmra.mxu1 %vm342_vm2, %v365_v29 }
 0x2dd   : > { %v409_v30 = vpop.f32.mrf.mxu1 }
 0x2de   : > { %v590_v31 = vpack.c.bf16 %v409_v30, %v409_v30 }
 0x2df   : > { %v606_v32 = vpop.f32.mrf.mxu1 }
 0x2e0   : > { %425 = vst.msk [vmem:[%s274_s7] sm:$0xf] %vm424_vm3, %v590_v31 }
 0x2e1   : > { %v412_v33 = vpop.f32.mrf.mxu1 }
 0x2e2   : > { %v591_v34 = vpack.c.bf16 %v412_v33, %v412_v33 }
 0x2e3   : > { %v607_v35 = vpop.f32.mrf.mxu1 }
 0x2e4   : > { %426 = vst.msk [vmem:[%s274_s7 + $0x4] sm:$0xf] %vm424_vm3, %v591_v34 }
 0x2e5 PF: > { %s13_s16 = sadd.s32 1, %s699_s16   ;;  %s795_s12 = smov %s691_s14 }
 0x2e6   : > { %p10_p7 = scmp.ge.s32.totalorder %s13_s16, 34   ;;  %s796_s13 = smov %s695_s15 }
 0x2e7   : > { %s797_s14 = smov %s800_s17  ;;  %s798_s15 = smov %s804_s18 }
 0x2e8   :  { %12 = sbr.rel (!%p10_p7) target bundleno = 3 (0x3), region = 68 }

// kernel: _lambda_.21
= control target key start
LH: loop header
LB: loop body
LE: loop exit
PB: predicated region body
PF: predicated region fallthrough
CT: control target
= control target key end

     0   :  { %vm97_vm0 = vcmask 261120   ;;  %s530_s1 = inlined_call_operand.vmem [shape: bf16[32,32], index: 1, kind: input, shape index: {}]   ;;  %s531_s0 = inlined_call_operand.vmem [shape: bf16[128,32], index: 0, kind: input, shape index: {}]   ;;  %s532_s2 = inlined_call_operand.vmem [shape: f32[1,32], index: 2, kind: input, shape index: {}]   ;;  %s533_s3 = inlined_call_operand.vmem [shape: f32[128,32], index: 3, kind: input, shape index: {}]   ;;  %s534_s4 = inlined_call_operand.vmem [shape: f32[128,32], index: 4, kind: output, shape index: {}]  }
   0x1   :  { %v324_v0 = vld [vmem:[%s530_s1 + $0x8] sm:$0xff]   ;;  %v325_v1 = vld [vmem:[%s530_s1] sm:$0xff]   ;;  %v330_v6 = vld [vmem:[%s531_s0 + $0x10] sm:$0xff]  }
   0x2   :  { %300 = vmatprep.subr.bf16.mxu0 %v324_v0  ;;  %320 = vmatprep.subr.bf16.mxu1 %v324_v0  ;;  %v326_v2 = vld [vmem:[%s531_s0] sm:$0xff]   ;;  %v328_v4 = vld [vmem:[%s531_s0 + $0x8] sm:$0xff]   ;;  %v331_v7 = vld [vmem:[%s531_s0 + $0x30] sm:$0xff]  }
   0x3   :  { %301 = vmatpush3.bf16.msra.mxu0 %v324_v0  ;;  %322 = vmatpush3.bf16.msra.mxu1 %v324_v0  ;;  %v327_v3 = vld [vmem:[%s531_s0 + $0x20] sm:$0xff]   ;;  %v329_v5 = vld [vmem:[%s531_s0 + $0x28] sm:$0xff]   ;;  %v332_v8 = vld [vmem:[%s531_s0 + $0x18] sm:$0xff]  }
   0x4   :  { %302 = vmatprep.subr.bf16.mxu0 %v325_v1  ;;  %321 = vmatprep.subr.bf16.mxu1 %v325_v1  ;;  %v333_v9 = vld [vmem:[%s531_s0 + $0x38] sm:$0xff]   ;;  %v400_v10 = vld [vmem:[%s532_s2] ss:$0 sm:$0xff]  ;;  %v221_v12 = vld [vmem:[%s533_s3 + $0x10] sm:$0xff] }
   0x5   :  { %304 = vmatprep.mubr.msk.bf16.mxu0 %vm97_vm0, %v326_v2  ;;  %312 = vmatprep.mubr.msk.bf16.mxu1 %vm97_vm0, %v327_v3  ;;  %v229_v14 = vld [vmem:[%s533_s3 + $0x50] sm:$0xff]  ;;  %v219_v18 = vld [vmem:[%s533_s3] sm:$0xff]  ;;  %v222_v26 = vld [vmem:[%s533_s3 + $0x18] sm:$0xff] }
   0x6   :  { %v227_v20 = vld [vmem:[%s533_s3 + $0x40] sm:$0xff]  ;;  %v230_v28 = vld [vmem:[%s533_s3 + $0x58] sm:$0xff]  ;;  %v220_v34 = vld [vmem:[%s533_s3 + $0x8] sm:$0xff] }
   0x7   :  { %303 = vmatpush3.bf16.msra.mxu0 %v325_v1  ;;  %323 = vmatpush3.bf16.msra.mxu1 %v325_v1  ;;  %v228_v36 = vld [vmem:[%s533_s3 + $0x48] sm:$0xff]  ;;  %v225_v42 = vld [vmem:[%s533_s3 + $0x30] sm:$0xff]  ;;  %v223_v50 = vld [vmem:[%s533_s3 + $0x20] sm:$0xff] }
   0x8   :  { %v233_v44 = vld [vmem:[%s533_s3 + $0x70] sm:$0xff]  ;;  %v231_v52 = vld [vmem:[%s533_s3 + $0x60] sm:$0xff]  ;;  %v226_v58 = vld [vmem:[%s533_s3 + $0x38] sm:$0xff] }
   0x9   :  { %v234_v60 = vld [vmem:[%s533_s3 + $0x78] sm:$0xff]  ;;  %v224_v2 = vld [vmem:[%s533_s3 + $0x28] sm:$0xff] }
   0xa   :  { %305 = vmatmul.mubr.msk.bf16.vlgmr.msra.gmra.mxu0 %vm97_vm0, %v328_v4  ;;  %313 = vmatmul.mubr.msk.bf16.vlgmr.msra.gmra.mxu1 %vm97_vm0, %v329_v5  ;;  %v232_v4 = vld [vmem:[%s533_s3 + $0x68] sm:$0xff] }
   0xb   :  { %308 = vmatprep.mubr.msk.bf16.mxu0 %vm97_vm0, %v330_v6  ;;  %316 = vmatprep.mubr.msk.bf16.mxu1 %vm97_vm0, %v331_v7 }
  0x12   :  { %309 = vmatmul.mubr.msk.bf16.gmra.mxu0 %vm97_vm0, %v332_v8  ;;  %317 = vmatmul.mubr.msk.bf16.gmra.mxu1 %vm97_vm0, %v333_v9 }
  0xca   :  { %v306_v11 = vpop.f32.mrf.mxu0  ;;  %v314_v13 = vpop.f32.mrf.mxu1 }
  0xcb   :  { %v165_v15 = vadd.f32 %v306_v11, %v400_v10  ;;  %v197_v16 = vadd.f32 %v314_v13, %v400_v10 }
  0xcc   :  { %v156_v17 = vpop.f32.mrf.mxu0  ;;  %v188_v19 = vpop.f32.mrf.mxu1 }
  0xcd   :  { %v237_v21 = vadd.f32 %v221_v12, %v165_v15  ;;  %v245_v22 = vadd.f32 %v229_v14, %v197_v16  ;;  %v157_v23 = vadd.f32 %v400_v10, %v156_v17  ;;  %v189_v24 = vadd.f32 %v400_v10, %v188_v19 }
  0xce   :  { %v307_v25 = vpop.f32.mrf.mxu0  ;;  %v315_v27 = vpop.f32.mrf.mxu1 }
  0xcf   :  { %253 = vst.msk [vmem:[%s534_s4 + $0x10] sm:$0xff] %vm97_vm0, %v237_v21  ;;  %261 = vst.msk [vmem:[%s534_s4 + $0x50] sm:$0xff] %vm97_vm0, %v245_v22  ;;  %v235_v29 = vadd.f32 %v219_v18, %v157_v23  ;;  %v243_v30 = vadd.f32 %v227_v20, %v189_v24  ;;  %v168_v31 = vadd.f32 %v307_v25, %v400_v10 }
  0xd0   :  { %v200_v32 = vadd.f32 %v315_v27, %v400_v10  ;;  %v159_v33 = vpop.f32.mrf.mxu0  ;;  %v191_v35 = vpop.f32.mrf.mxu1 }
  0xd1   :  { %251 = vst.msk [vmem:[%s534_s4] sm:$0xff] %vm97_vm0, %v235_v29  ;;  %259 = vst.msk [vmem:[%s534_s4 + $0x40] sm:$0xff] %vm97_vm0, %v243_v30  ;;  %v238_v37 = vadd.f32 %v222_v26, %v168_v31  ;;  %v160_v39 = vadd.f32 %v400_v10, %v159_v33  ;;  %v192_v40 = vadd.f32 %v400_v10, %v191_v35 }
  0xd2   :  { %v246_v38 = vadd.f32 %v230_v28, %v200_v32  ;;  %v310_v41 = vpop.f32.mrf.mxu0  ;;  %v318_v43 = vpop.f32.mrf.mxu1 }
  0xd3   :  { %254 = vst.msk [vmem:[%s534_s4 + $0x18] sm:$0xff] %vm97_vm0, %v238_v37  ;;  %v236_v45 = vadd.f32 %v220_v34, %v160_v39  ;;  %v244_v46 = vadd.f32 %v228_v36, %v192_v40  ;;  %v181_v47 = vadd.f32 %v310_v41, %v400_v10  ;;  %v213_v48 = vadd.f32 %v318_v43, %v400_v10 }
  0xd4   :  { %262 = vst.msk [vmem:[%s534_s4 + $0x58] sm:$0xff] %vm97_vm0, %v246_v38  ;;  %v172_v49 = vpop.f32.mrf.mxu0  ;;  %v204_v51 = vpop.f32.mrf.mxu1 }
  0xd5   :  { %252 = vst.msk [vmem:[%s534_s4 + $0x8] sm:$0xff] %vm97_vm0, %v236_v45  ;;  %260 = vst.msk [vmem:[%s534_s4 + $0x48] sm:$0xff] %vm97_vm0, %v244_v46  ;;  %v241_v53 = vadd.f32 %v225_v42, %v181_v47  ;;  %v249_v54 = vadd.f32 %v233_v44, %v213_v48  ;;  %v173_v55 = vadd.f32 %v400_v10, %v172_v49 }
  0xd6   :  { %v205_v56 = vadd.f32 %v400_v10, %v204_v51  ;;  %v311_v57 = vpop.f32.mrf.mxu0  ;;  %v319_v59 = vpop.f32.mrf.mxu1 }
  0xd7   :  { %257 = vst.msk [vmem:[%s534_s4 + $0x30] sm:$0xff] %vm97_vm0, %v241_v53  ;;  %265 = vst.msk [vmem:[%s534_s4 + $0x70] sm:$0xff] %vm97_vm0, %v249_v54  ;;  %v239_v61 = vadd.f32 %v223_v50, %v173_v55  ;;  %v184_v63 = vadd.f32 %v311_v57, %v400_v10  ;;  %v216_v0 = vadd.f32 %v319_v59, %v400_v10 }
  0xd8   :  { %v247_v62 = vadd.f32 %v231_v52, %v205_v56  ;;  %v175_v1 = vpop.f32.mrf.mxu0  ;;  %v207_v3 = vpop.f32.mrf.mxu1 }
  0xd9   :  { %255 = vst.msk [vmem:[%s534_s4 + $0x20] sm:$0xff] %vm97_vm0, %v239_v61  ;;  %v242_v5 = vadd.f32 %v226_v58, %v184_v63  ;;  %v250_v6 = vadd.f32 %v234_v60, %v216_v0  ;;  %v176_v7 = vadd.f32 %v400_v10, %v175_v1  ;;  %v208_v8 = vadd.f32 %v400_v10, %v207_v3 }
  0xda   :  { %263 = vst.msk [vmem:[%s534_s4 + $0x60] sm:$0xff] %vm97_vm0, %v247_v62 }
  0xdb   :  { %258 = vst.msk [vmem:[%s534_s4 + $0x38] sm:$0xff] %vm97_vm0, %v242_v5  ;;  %266 = vst.msk [vmem:[%s534_s4 + $0x78] sm:$0xff] %vm97_vm0, %v250_v6  ;;  %v240_v9 = vadd.f32 %v224_v2, %v176_v7  ;;  %v248_v11 = vadd.f32 %v232_v4, %v208_v8 }
  0xdd   :  { %256 = vst.msk [vmem:[%s534_s4 + $0x28] sm:$0xff] %vm97_vm0, %v240_v9  ;;  %264 = vst.msk [vmem:[%s534_s4 + $0x68] sm:$0xff] %vm97_vm0, %v248_v11 }

// kernel: _lambda_.23
= control target key start
LH: loop header
LB: loop body
LE: loop exit
PB: predicated region body
PF: predicated region fallthrough
CT: control target
= control target key end

     0   :  { %v113_v0 = vmov 0.0   ;;  %vm114_vm0 = vmmov 0   ;;  %vm31_vm1 = vcmask 261120   ;;  %vm84_vm2 = vcmask 519168   ;;  %s148_s1 = inlined_call_operand.vmem [shape: bf16[32,64], index: 1, kind: input, shape index: {}]   ;;  %s149_s0 = inlined_call_operand.vmem [shape: f32[16,32], index: 0, kind: input, shape index: {}]   ;;  %s150_s2 = inlined_call_operand.vmem [shape: bf16[16,64], index: 2, kind: output, shape index: {}]  }
   0x1   :  { %101 = vmatprep.subr.bf16.mxu0 %v113_v0  ;;  %v111_v1 = vld [vmem:[%s148_s1 + $0x8] sm:$0xff]   ;;  %105 = vmatprep.mubr.msk.bf16.mxu0 %vm114_vm0, %v113_v0  ;;  %v112_v2 = vld [vmem:[%s148_s1] sm:$0xff]  }
   0x2   :  { %102 = vmatpush3.bf16.msra.mxu0 %v111_v1  ;;  %v12_v3 = vld [vmem:[%s149_s0] sm:$0xff]  ;;  %v13_v4 = vld [vmem:[%s149_s0 + $0x8] sm:$0xff] }
   0x3   :  { %103 = vmatprep.subr.bf16.mxu0 %v113_v0  ;;  %v14_v5 = vpack.c.bf16 %v13_v4, %v12_v3 }
   0x6   :  { %104 = vmatpush3.bf16.msra.mxu0 %v112_v2 }
   0x9   :  { %106 = vmatmul.mubr.msk.bf16.vlgmr.msra.gmra.mxu0 %vm31_vm1, %v14_v5 }
  0xc9   :  { %v69_v6 = vpop.f32.mrf.mxu0 }
  0xca   :  { %v96_v7 = vpack.c.bf16 %v69_v6, %v69_v6 }
  0xcb   :  { %v107_v8 = vpop.f32.mrf.mxu0 }
  0xcc   :  { %85 = vst.msk [vmem:[%s150_s2] sm:$0xf] %vm84_vm2, %v96_v7 }
  0xcd   :  { %v72_v9 = vpop.f32.mrf.mxu0 }
  0xce   :  { %v97_v10 = vpack.c.bf16 %v72_v9, %v72_v9 }
  0xcf   :  { %v108_v11 = vpop.f32.mrf.mxu0 }
  0xd0   :  { %86 = vst.msk [vmem:[%s150_s2 + $0x4] sm:$0xf] %vm84_vm2, %v97_v10 }

// kernel: _lambda_.22
= control target key start
LH: loop header
LB: loop body
LE: loop exit
PB: predicated region body
PF: predicated region fallthrough
CT: control target
= control target key end

     0   :  { %vm43_vm0 = vcmask 261120   ;;  %vm361_vm1 = vcmask 257024   ;;  %s1194_s0 = inlined_call_operand.vmem [shape: f32[128,32], index: 0, kind: input, shape index: {}]   ;;  %s1195_s3 = inlined_call_operand.vmem [shape: bf16[32,32], index: 3, kind: input, shape index: {}]   ;;  %s1196_s1 = inlined_call_operand.vmem [shape: f32[1,32], index: 1, kind: input, shape index: {}]   ;;  %s1197_s2 = inlined_call_operand.vmem [shape: f32[1,32], index: 2, kind: input, shape index: {}]   ;;  %s1198_s4 = inlined_call_operand.vmem [shape: f32[1,32], index: 4, kind: input, shape index: {}]   ;;  %s1199_s5 = inlined_call_operand.vmem [shape: bf16[128,32], index: 5, kind: output, shape index: {}]  }
   0x1   :  { %v25_v0 = vld [vmem:[%s1194_s0] sm:$0xff]  ;;  %v26_v2 = vld [vmem:[%s1194_s0 + $0x8] sm:$0xff]  ;;  %v27_v8 = vld [vmem:[%s1194_s0 + $0x10] sm:$0xff] }
   0x2   :  { %v33_v1 = vld [vmem:[%s1194_s0 + $0x40] sm:$0xff]  ;;  %v44_v3 = vsel %vm43_vm0, %v25_v0, 0.0  ;;  %v34_v5 = vld [vmem:[%s1194_s0 + $0x48] sm:$0xff]  ;;  %v47_v6 = vsel %vm43_vm0, %v26_v2, 0.0  ;;  %v28_v9 = vld [vmem:[%s1194_s0 + $0x18] sm:$0xff]  ;;  %v50_v10 = vsel %vm43_vm0, %v27_v8, 0.0 }
   0x3   :  { %v68_v4 = vsel %vm43_vm0, %v33_v1, 0.0  ;;  %45 = vadd.xlane.f32.xlu0 %v44_v3  ;;  %v71_v7 = vsel %vm43_vm0, %v34_v5, 0.0  ;;  %v53_v11 = vsel %vm43_vm0, %v28_v9, 0.0  ;;  %v882_v12 = vld [vmem:[%s1194_s0 + $0x50] sm:$0xff]  ;;  %v887_v13 = vld [vmem:[%s1194_s0 + $0x58] sm:$0xff]  ;;  %v896_v16 = vld [vmem:[%s1194_s0 + $0x20] sm:$0xff] }
   0x4   :  { %69 = vadd.xlane.f32.xlu1 %v68_v4  ;;  %v74_v14 = vsel %vm43_vm0, %v882_v12, 0.0  ;;  %v77_v15 = vsel %vm43_vm0, %v887_v13, 0.0  ;;  %v901_v17 = vld [vmem:[%s1194_s0 + $0x28] sm:$0xff]  ;;  %v56_v18 = vsel %vm43_vm0, %v896_v16, 0.0  ;;  %v910_v20 = vld [vmem:[%s1194_s0 + $0x60] sm:$0xff]  ;;  %v924_v24 = vld [vmem:[%s1194_s0 + $0x30] sm:$0xff] }
   0x5   :  { %v59_v19 = vsel %vm43_vm0, %v901_v17, 0.0  ;;  %v915_v21 = vld [vmem:[%s1194_s0 + $0x68] sm:$0xff]  ;;  %v80_v22 = vsel %vm43_vm0, %v910_v20, 0.0  ;;  %v929_v25 = vld [vmem:[%s1194_s0 + $0x38] sm:$0xff]  ;;  %v62_v26 = vsel %vm43_vm0, %v924_v24, 0.0  ;;  %v938_v28 = vld [vmem:[%s1194_s0 + $0x70] sm:$0xff] }
   0x6   :  { %v83_v23 = vsel %vm43_vm0, %v915_v21, 0.0  ;;  %v65_v27 = vsel %vm43_vm0, %v929_v25, 0.0  ;;  %v943_v29 = vld [vmem:[%s1194_s0 + $0x78] sm:$0xff]  ;;  %v86_v30 = vsel %vm43_vm0, %v938_v28, 0.0 }
   0x7   :  { %48 = vadd.xlane.f32.xlu0 %v47_v6  ;;  %v89_v31 = vsel %vm43_vm0, %v943_v29, 0.0 }
   0x8   :  { %72 = vadd.xlane.f32.xlu1 %v71_v7 }
   0xb   :  { %51 = vadd.xlane.f32.xlu0 %v50_v10 }
   0xc   :  { %54 = vadd.xlane.f32.xlu1 %v53_v11 }
   0xf   :  { %75 = vadd.xlane.f32.xlu0 %v74_v14 }
  0x10   :  { %78 = vadd.xlane.f32.xlu1 %v77_v15 }
  0x13   :  { %57 = vadd.xlane.f32.xlu0 %v56_v18 }
  0x14   :  { %60 = vadd.xlane.f32.xlu1 %v59_v19 }
  0x17   :  { %81 = vadd.xlane.f32.xlu0 %v80_v22 }
  0x18   :  { %84 = vadd.xlane.f32.xlu1 %v83_v23 }
  0x1b   :  { %63 = vadd.xlane.f32.xlu0 %v62_v26 }
  0x1c   :  { %66 = vadd.xlane.f32.xlu1 %v65_v27 }
  0x1f   :  { %87 = vadd.xlane.f32.xlu0 %v86_v30 }
  0x20   :  { %90 = vadd.xlane.f32.xlu1 %v89_v31 }
  0x8c   :  { %v46_v32 = vpop.xlane.xlu0 %45 }
  0x8d   :  { %v70_v33 = vpop.xlane.xlu1 %69  ;;  %v93_v34 = vmul.f32 0.03125, %v46_v32 }
  0x8e   :  { %v101_v35 = vmul.f32 0.03125, %v70_v33 }
  0x8f   :  { %v949_v36 = vsub.f32 %v25_v0, %v93_v34 }
  0x90   :  { %v951_v37 = vsub.f32 %v33_v1, %v101_v35  ;;  %v49_v38 = vpop.xlane.xlu0 %48 }
  0x91   :  { %v73_v39 = vpop.xlane.xlu1 %72  ;;  %v94_v40 = vmul.f32 0.03125, %v49_v38  ;;  %v125_v42 = vmul.f32 %v949_v36, %v949_v36 }
  0x92   :  { %v102_v41 = vmul.f32 0.03125, %v73_v39  ;;  %v133_v43 = vmul.f32 %v951_v37, %v951_v37 }
  0x93   :  { %v957_v44 = vsub.f32 %v26_v2, %v94_v40  ;;  %v141_v46 = vsel %vm43_vm0, %v125_v42, 0.0 }
  0x94   :  { %v959_v45 = vsub.f32 %v34_v5, %v102_v41  ;;  %142 = vadd.xlane.f32.xlu0 %v141_v46  ;;  %v52_v47 = vpop.xlane.xlu0 %51  ;;  %v165_v49 = vsel %vm43_vm0, %v133_v43, 0.0 }
  0x95   :  { %v55_v48 = vpop.xlane.xlu1 %54  ;;  %v95_v50 = vmul.f32 0.03125, %v52_v47  ;;  %v126_v52 = vmul.f32 %v957_v44, %v957_v44 }
  0x96   :  { %v96_v51 = vmul.f32 0.03125, %v55_v48  ;;  %v134_v53 = vmul.f32 %v959_v45, %v959_v45 }
  0x97   :  { %v967_v54 = vsub.f32 %v27_v8, %v95_v50  ;;  %v144_v56 = vsel %vm43_vm0, %v126_v52, 0.0 }
  0x98   :  { %v969_v55 = vsub.f32 %v28_v9, %v96_v51  ;;  %166 = vadd.xlane.f32.xlu0 %v165_v49  ;;  %145 = vadd.xlane.f32.xlu1 %v144_v56  ;;  %v76_v57 = vpop.xlane.xlu0 %75  ;;  %v168_v59 = vsel %vm43_vm0, %v134_v53, 0.0  ;;  %v785_v53 = vld [vmem:[%s1195_s3] sm:$0xff]  }
  0x99   :  { %v79_v58 = vpop.xlane.xlu1 %78  ;;  %v103_v60 = vmul.f32 0.03125, %v76_v57  ;;  %v127_v62 = vmul.f32 %v967_v54, %v967_v54 }
  0x9a   :  { %v104_v61 = vmul.f32 0.03125, %v79_v58  ;;  %v128_v63 = vmul.f32 %v969_v55, %v969_v55 }
  0x9b   :  { %v978_v0 = vsub.f32 %v882_v12, %v103_v60  ;;  %v147_v2 = vsel %vm43_vm0, %v127_v62, 0.0 }
  0x9c   :  { %v981_v1 = vsub.f32 %v887_v13, %v104_v61  ;;  %169 = vadd.xlane.f32.xlu1 %v168_v59  ;;  %148 = vadd.xlane.f32.xlu0 %v147_v2  ;;  %v58_v3 = vpop.xlane.xlu0 %57  ;;  %v150_v5 = vsel %vm43_vm0, %v128_v63, 0.0 }
  0x9d   :  { %v61_v4 = vpop.xlane.xlu1 %60  ;;  %v97_v6 = vmul.f32 0.03125, %v58_v3  ;;  %v135_v8 = vmul.f32 %v978_v0, %v978_v0 }
  0x9e   :  { %v98_v7 = vmul.f32 0.03125, %v61_v4  ;;  %v136_v9 = vmul.f32 %v981_v1, %v981_v1 }
  0x9f   :  { %v990_v10 = vsub.f32 %v896_v16, %v97_v6  ;;  %v171_v12 = vsel %vm43_vm0, %v135_v8, 0.0 }
  0xa0   :  { %v993_v11 = vsub.f32 %v901_v17, %v98_v7  ;;  %151 = vadd.xlane.f32.xlu1 %v150_v5  ;;  %172 = vadd.xlane.f32.xlu0 %v171_v12  ;;  %v82_v13 = vpop.xlane.xlu0 %81  ;;  %v174_v15 = vsel %vm43_vm0, %v136_v9, 0.0 }
  0xa1   :  { %v85_v14 = vpop.xlane.xlu1 %84  ;;  %v105_v18 = vmul.f32 0.03125, %v82_v13  ;;  %v129_v22 = vmul.f32 %v990_v10, %v990_v10 }
  0xa2   :  { %v106_v19 = vmul.f32 0.03125, %v85_v14  ;;  %v130_v16 = vmul.f32 %v993_v11, %v993_v11 }
  0xa3   :  { %v1002_v23 = vsub.f32 %v910_v20, %v105_v18  ;;  %v153_v26 = vsel %vm43_vm0, %v129_v22, 0.0 }
  0xa4   :  { %v1005_v17 = vsub.f32 %v915_v21, %v106_v19  ;;  %175 = vadd.xlane.f32.xlu1 %v174_v15  ;;  %154 = vadd.xlane.f32.xlu0 %v153_v26  ;;  %v64_v27 = vpop.xlane.xlu0 %63  ;;  %v156_v31 = vsel %vm43_vm0, %v130_v16, 0.0 }
  0xa5   :  { %v67_v30 = vpop.xlane.xlu1 %66  ;;  %v99_v32 = vmul.f32 0.03125, %v64_v27  ;;  %v137_v34 = vmul.f32 %v1002_v23, %v1002_v23 }
  0xa6   :  { %v100_v33 = vmul.f32 0.03125, %v67_v30  ;;  %v138_v20 = vmul.f32 %v1005_v17, %v1005_v17  ;;  %v1048_v30 = vld [vmem:[%s1196_s1] ss:$0 sm:$0xff] }
  0xa7   :  { %v1014_v35 = vsub.f32 %v924_v24, %v99_v32  ;;  %v177_v38 = vsel %vm43_vm0, %v137_v34, 0.0  ;;  %v1054_v34 = vld [vmem:[%s1197_s2] ss:$0 sm:$0xff] }
  0xa8   :  { %v1017_v21 = vsub.f32 %v929_v25, %v100_v33  ;;  %157 = vadd.xlane.f32.xlu1 %v156_v31  ;;  %178 = vadd.xlane.f32.xlu0 %v177_v38  ;;  %v88_v39 = vpop.xlane.xlu0 %87  ;;  %v180_v41 = vsel %vm43_vm0, %v138_v20, 0.0 }
  0xa9   :  { %v91_v40 = vpop.xlane.xlu1 %90  ;;  %v107_v42 = vmul.f32 0.03125, %v88_v39  ;;  %v131_v46 = vmul.f32 %v1014_v35, %v1014_v35 }
  0xaa   :  { %v108_v43 = vmul.f32 0.03125, %v91_v40  ;;  %v132_v24 = vmul.f32 %v1017_v21, %v1017_v21 }
  0xab   :  { %v1026_v47 = vsub.f32 %v938_v28, %v107_v42  ;;  %v159_v48 = vsel %vm43_vm0, %v131_v46, 0.0 }
  0xac   :  { %v1029_v25 = vsub.f32 %v943_v29, %v108_v43  ;;  %181 = vadd.xlane.f32.xlu1 %v180_v41  ;;  %160 = vadd.xlane.f32.xlu0 %v159_v48  ;;  %v162_v49 = vsel %vm43_vm0, %v132_v24, 0.0  ;;  %v783_v29 = vld [vmem:[%s1195_s3 + $0x8] sm:$0xff]  }
  0xad   :  { %v139_v50 = vmul.f32 %v1026_v47, %v1026_v47  ;;  %759 = vmatprep.subr.bf16.mxu0 %v783_v29  ;;  %779 = vmatprep.subr.bf16.mxu1 %v783_v29 }
  0xae   :  { %v140_v51 = vmul.f32 %v1029_v25, %v1029_v25  ;;  %760 = vmatpush3.bf16.msra.mxu0 %v783_v29  ;;  %781 = vmatpush3.bf16.msra.mxu1 %v783_v29 }
  0xaf   :  { %v183_v52 = vsel %vm43_vm0, %v139_v50, 0.0  ;;  %761 = vmatprep.subr.bf16.mxu0 %v785_v53  ;;  %780 = vmatprep.subr.bf16.mxu1 %v785_v53 }
  0xb0   :  { %163 = vadd.xlane.f32.xlu1 %v162_v49  ;;  %184 = vadd.xlane.f32.xlu0 %v183_v52  ;;  %v186_v28 = vsel %vm43_vm0, %v140_v51, 0.0 }
  0xb2   :  { %762 = vmatpush3.bf16.msra.mxu0 %v785_v53  ;;  %782 = vmatpush3.bf16.msra.mxu1 %v785_v53 }
  0xb4   :  { %187 = vadd.xlane.f32.xlu1 %v186_v28 }
 0x11d   :  { %v143_v56 = vpop.xlane.xlu0 %142 }
 0x11e   :  { %v189_v57 = vmul.f32 0.03125, %v143_v56 }
 0x120   :  { %v205_v58 = vadd.f32 1e-05, %v189_v57 }
 0x121   :  { %v146_v59 = vpop.xlane.xlu1 %145  ;;  %v167_v60 = vpop.xlane.xlu0 %166 }
 0x122   :  { %793 = vrsqrt.f32 %v205_v58  ;;  %v190_v61 = vmul.f32 0.03125, %v146_v59  ;;  %v197_v62 = vmul.f32 0.03125, %v167_v60 }
 0x124   :  { %v206_v63 = vadd.f32 1e-05, %v190_v61  ;;  %v213_v2 = vadd.f32 1e-05, %v197_v62 }
 0x125   :  { %v170_v3 = vpop.xlane.xlu1 %169  ;;  %v149_v4 = vpop.xlane.xlu0 %148 }
 0x126   :  { %795 = vrsqrt.f32 %v206_v63  ;;  %v198_v5 = vmul.f32 0.03125, %v170_v3  ;;  %v191_v6 = vmul.f32 0.03125, %v149_v4 }
 0x127   :  { %797 = vrsqrt.f32 %v213_v2 }
 0x128   :  { %v214_v7 = vadd.f32 1e-05, %v198_v5  ;;  %v207_v8 = vadd.f32 1e-05, %v191_v6 }
 0x129   :  { %v152_v9 = vpop.xlane.xlu1 %151  ;;  %v173_v12 = vpop.xlane.xlu0 %172 }
 0x12a   :  { %799 = vrsqrt.f32 %v214_v7  ;;  %v192_v13 = vmul.f32 0.03125, %v152_v9  ;;  %v199_v14 = vmul.f32 0.03125, %v173_v12 }
 0x12b   :  { %801 = vrsqrt.f32 %v207_v8 }
 0x12c   :  { %v208_v15 = vadd.f32 1e-05, %v192_v13  ;;  %v215_v18 = vadd.f32 1e-05, %v199_v14 }
 0x12d   :  { %v176_v19 = vpop.xlane.xlu1 %175  ;;  %v155_v22 = vpop.xlane.xlu0 %154 }
 0x12e   :  { %803 = vrsqrt.f32 %v208_v15  ;;  %v200_v16 = vmul.f32 0.03125, %v176_v19  ;;  %v193_v26 = vmul.f32 0.03125, %v155_v22 }
 0x12f   :  { %v794_v27 = vpop.eup %793  ;;  %805 = vrsqrt.f32 %v215_v18 }
 0x130   :  { %v237_v31 = vmul.f32 %v794_v27, %v949_v36  ;;  %v216_v32 = vadd.f32 1e-05, %v200_v16  ;;  %v209_v33 = vadd.f32 1e-05, %v193_v26 }
 0x131   :  { %v158_v20 = vpop.xlane.xlu1 %157  ;;  %v179_v38 = vpop.xlane.xlu0 %178 }
 0x132   :  { %v259_v39 = vmul.f32 %v1048_v30, %v237_v31  ;;  %807 = vrsqrt.f32 %v216_v32  ;;  %v194_v40 = vmul.f32 0.03125, %v158_v20  ;;  %v201_v41 = vmul.f32 0.03125, %v179_v38 }
 0x133   :  { %v796_v42 = vpop.eup %795  ;;  %809 = vrsqrt.f32 %v209_v33 }
 0x134   :  { %v798_v43 = vpop.eup %797  ;;  %v281_v46 = vadd.f32 %v1054_v34, %v259_v39  ;;  %v238_v36 = vmul.f32 %v796_v42, %v957_v44  ;;  %v210_v24 = vadd.f32 1e-05, %v194_v40  ;;  %v217_v48 = vadd.f32 1e-05, %v201_v41 }
 0x135   :  { %v245_v49 = vmul.f32 %v798_v43, %v951_v37  ;;  %v182_v50 = vpop.xlane.xlu1 %181  ;;  %v161_v51 = vpop.xlane.xlu0 %160 }
 0x136   :  { %v717_v52 = vpack.c.bf16 %v281_v46, %v281_v46  ;;  %v260_v28 = vmul.f32 %v1048_v30, %v238_v36  ;;  %811 = vrsqrt.f32 %v210_v24  ;;  %v202_v29 = vmul.f32 0.03125, %v182_v50 }
 0x137   :  { %v800_v53 = vpop.eup %799  ;;  %v267_v56 = vmul.f32 %v1048_v30, %v245_v49  ;;  %813 = vrsqrt.f32 %v217_v48  ;;  %v195_v57 = vmul.f32 0.03125, %v161_v51 }
 0x138   :  { %v802_v58 = vpop.eup %801  ;;  %362 = vst.msk [vmem:[#allocation2] sm:$0xf] %vm361_vm1, %v717_v52  ;;  %v282_v44 = vadd.f32 %v1054_v34, %v260_v28  ;;  %v246_v59 = vmul.f32 %v800_v53, %v959_v45  ;;  %v218_v37 = vadd.f32 1e-05, %v202_v29 }
 0x139   :  { %v289_v60 = vadd.f32 %v1054_v34, %v267_v56  ;;  %v239_v61 = vmul.f32 %v802_v58, %v967_v54  ;;  %v211_v62 = vadd.f32 1e-05, %v195_v57  ;;  %v164_v63 = vpop.xlane.xlu1 %163  ;;  %v185_v2 = vpop.xlane.xlu0 %184 }
 0x13a   :  { %v718_v3 = vpack.c.bf16 %v282_v44, %v282_v44  ;;  %v268_v4 = vmul.f32 %v1048_v30, %v246_v59  ;;  %815 = vrsqrt.f32 %v218_v37  ;;  %v196_v5 = vmul.f32 0.03125, %v164_v63 }
 0x13b   :  { %v804_v6 = vpop.eup %803  ;;  %v725_v7 = vpack.c.bf16 %v289_v60, %v289_v60  ;;  %v261_v8 = vmul.f32 %v1048_v30, %v239_v61  ;;  %817 = vrsqrt.f32 %v211_v62  ;;  %v203_v9 = vmul.f32 0.03125, %v185_v2 }
 0x13c   :  { %v806_v45 = vpop.eup %805  ;;  %363 = vst.msk [vmem:[#allocation2 + $0x4] sm:$0xf] %vm361_vm1, %v718_v3  ;;  %v290_v12 = vadd.f32 %v1054_v34, %v268_v4  ;;  %v240_v54 = vmul.f32 %v804_v6, %v969_v55  ;;  %v212_v13 = vadd.f32 1e-05, %v196_v5 }
 0x13d   :  { %370 = vst.msk [vmem:[#allocation2 + $0x20] sm:$0xf] %vm361_vm1, %v725_v7  ;;  %v283_v14 = vadd.f32 %v1054_v34, %v261_v8  ;;  %v247_v15 = vmul.f32 %v806_v45, %v978_v0  ;;  %v219_v18 = vadd.f32 1e-05, %v203_v9  ;;  %v188_v19 = vpop.xlane.xlu1 %187 }
 0x13e   :  { %v726_v22 = vpack.c.bf16 %v290_v12, %v290_v12  ;;  %v262_v16 = vmul.f32 %v1048_v30, %v240_v54  ;;  %819 = vrsqrt.f32 %v212_v13  ;;  %v204_v26 = vmul.f32 0.03125, %v188_v19 }
 0x13f   :  { %v808_v27 = vpop.eup %807  ;;  %v719_v31 = vpack.c.bf16 %v283_v14, %v283_v14  ;;  %v269_v32 = vmul.f32 %v1048_v30, %v247_v15  ;;  %821 = vrsqrt.f32 %v219_v18 }
 0x140   :  { %v810_v55 = vpop.eup %809  ;;  %371 = vst.msk [vmem:[#allocation2 + $0x24] sm:$0xf] %vm361_vm1, %v726_v22  ;;  %v284_v33 = vadd.f32 %v1054_v34, %v262_v16  ;;  %v248_v20 = vmul.f32 %v808_v27, %v981_v1  ;;  %v220_v0 = vadd.f32 1e-05, %v204_v26 }
 0x141   :  { %364 = vst.msk [vmem:[#allocation2 + $0x8] sm:$0xf] %vm361_vm1, %v719_v31  ;;  %v291_v38 = vadd.f32 %v1054_v34, %v269_v32  ;;  %v241_v39 = vmul.f32 %v810_v55, %v990_v10 }
 0x142   :  { %v720_v40 = vpack.c.bf16 %v284_v33, %v284_v33  ;;  %v270_v41 = vmul.f32 %v1048_v30, %v248_v20  ;;  %823 = vrsqrt.f32 %v220_v0 }
 0x143   :  { %v812_v42 = vpop.eup %811  ;;  %v727_v43 = vpack.c.bf16 %v291_v38, %v291_v38  ;;  %v263_v46 = vmul.f32 %v1048_v30, %v241_v39  ;;  %v784_v36 = vld [vmem:[#allocation2] sm:$0xff]  }
 0x144   :  { %v814_v24 = vpop.eup %813  ;;  %365 = vst.msk [vmem:[#allocation2 + $0xc] sm:$0xf] %vm361_vm1, %v720_v40  ;;  %v292_v1 = vadd.f32 %v1054_v34, %v270_v41  ;;  %v242_v48 = vmul.f32 %v812_v42, %v993_v11  ;;  %763 = vmatprep.mubr.msk.bf16.mxu0 %vm43_vm0, %v784_v36 }
 0x145   :  { %372 = vst.msk [vmem:[#allocation2 + $0x28] sm:$0xf] %vm361_vm1, %v727_v43  ;;  %v285_v10 = vadd.f32 %v1054_v34, %v263_v46  ;;  %v249_v49 = vmul.f32 %v814_v24, %v1002_v23 }
 0x146   :  { %v728_v50 = vpack.c.bf16 %v292_v1, %v292_v1  ;;  %v264_v51 = vmul.f32 %v1048_v30, %v242_v48 }
 0x147   :  { %v816_v52 = vpop.eup %815  ;;  %v721_v28 = vpack.c.bf16 %v285_v10, %v285_v10  ;;  %v271_v29 = vmul.f32 %v1048_v30, %v249_v49  ;;  %v786_v53 = vld [vmem:[#allocation2 + $0x20] sm:$0xff]  }
 0x148   :  { %v818_v56 = vpop.eup %817  ;;  %373 = vst.msk [vmem:[#allocation2 + $0x2c] sm:$0xf] %vm361_vm1, %v728_v50  ;;  %v286_v11 = vadd.f32 %v1054_v34, %v264_v51  ;;  %v250_v57 = vmul.f32 %v816_v52, %v1005_v17  ;;  %771 = vmatprep.mubr.msk.bf16.mxu1 %vm43_vm0, %v786_v53 }
 0x149   :  { %366 = vst.msk [vmem:[#allocation2 + $0x10] sm:$0xf] %vm361_vm1, %v721_v28  ;;  %v293_v23 = vadd.f32 %v1054_v34, %v271_v29  ;;  %v243_v58 = vmul.f32 %v818_v56, %v1014_v35 }
 0x14a   :  { %v722_v44 = vpack.c.bf16 %v286_v11, %v286_v11  ;;  %v272_v59 = vmul.f32 %v1048_v30, %v250_v57 }
 0x14b   :  { %v820_v37 = vpop.eup %819  ;;  %v729_v60 = vpack.c.bf16 %v293_v23, %v293_v23  ;;  %v265_v61 = vmul.f32 %v1048_v30, %v243_v58  ;;  %v787_v62 = vld [vmem:[#allocation2 + $0x8] sm:$0xff]  }
 0x14c   :  { %v822_v63 = vpop.eup %821  ;;  %367 = vst.msk [vmem:[#allocation2 + $0x14] sm:$0xf] %vm361_vm1, %v722_v44  ;;  %v294_v17 = vadd.f32 %v1054_v34, %v272_v59  ;;  %v244_v2 = vmul.f32 %v820_v37, %v1017_v21  ;;  %764 = vmatmul.mubr.msk.bf16.vlgmr.msra.gmra.mxu0 %vm43_vm0, %v787_v62 }
 0x14d   :  { %374 = vst.msk [vmem:[#allocation2 + $0x30] sm:$0xf] %vm361_vm1, %v729_v60  ;;  %v287_v35 = vadd.f32 %v1054_v34, %v265_v61  ;;  %v251_v3 = vmul.f32 %v822_v63, %v1026_v47 }
 0x14e   :  { %v730_v4 = vpack.c.bf16 %v294_v17, %v294_v17  ;;  %v266_v5 = vmul.f32 %v1048_v30, %v244_v2 }
 0x14f   :  { %v824_v6 = vpop.eup %823  ;;  %v723_v7 = vpack.c.bf16 %v287_v35, %v287_v35  ;;  %v273_v8 = vmul.f32 %v1048_v30, %v251_v3  ;;  %v788_v9 = vld [vmem:[#allocation2 + $0x28] sm:$0xff]  }
 0x150   :  { %375 = vst.msk [vmem:[#allocation2 + $0x34] sm:$0xf] %vm361_vm1, %v730_v4  ;;  %v288_v21 = vadd.f32 %v1054_v34, %v266_v5  ;;  %v252_v45 = vmul.f32 %v824_v6, %v1029_v25  ;;  %772 = vmatmul.mubr.msk.bf16.vlgmr.msra.gmra.mxu1 %vm43_vm0, %v788_v9 }
 0x151   :  { %368 = vst.msk [vmem:[#allocation2 + $0x18] sm:$0xf] %vm361_vm1, %v723_v7  ;;  %v295_v47 = vadd.f32 %v1054_v34, %v273_v8 }
 0x152   :  { %v724_v12 = vpack.c.bf16 %v288_v21, %v288_v21  ;;  %v274_v54 = vmul.f32 %v1048_v30, %v252_v45 }
 0x153   :  { %v731_v13 = vpack.c.bf16 %v295_v47, %v295_v47  ;;  %v789_v14 = vld [vmem:[#allocation2 + $0x10] sm:$0xff]  }
 0x154   :  { %369 = vst.msk [vmem:[#allocation2 + $0x1c] sm:$0xf] %vm361_vm1, %v724_v12  ;;  %v296_v15 = vadd.f32 %v1054_v34, %v274_v54  ;;  %767 = vmatprep.mubr.msk.bf16.mxu0 %vm43_vm0, %v789_v14  ;;  %v682_v34 = vld [vmem:[%s1198_s4] ss:$0 sm:$0xff] }
 0x155   :  { %376 = vst.msk [vmem:[#allocation2 + $0x38] sm:$0xf] %vm361_vm1, %v731_v13 }
 0x156   :  { %v732_v25 = vpack.c.bf16 %v296_v15, %v296_v15 }
 0x157   :  { %v790_v18 = vld [vmem:[#allocation2 + $0x30] sm:$0xff]  }
 0x158   :  { %377 = vst.msk [vmem:[#allocation2 + $0x3c] sm:$0xf] %vm361_vm1, %v732_v25  ;;  %775 = vmatprep.mubr.msk.bf16.mxu1 %vm43_vm0, %v790_v18 }
 0x15b   :  { %v791_v19 = vld [vmem:[#allocation2 + $0x18] sm:$0xff]  }
 0x15c   :  { %768 = vmatmul.mubr.msk.bf16.gmra.mxu0 %vm43_vm0, %v791_v19 }
 0x15f   :  { %v792_v30 = vld [vmem:[#allocation2 + $0x38] sm:$0xff]  }
 0x160   :  { %776 = vmatmul.mubr.msk.bf16.gmra.mxu1 %vm43_vm0, %v792_v30 }
 0x20c   :  { %v765_v22 = vpop.f32.mrf.mxu0 }
 0x20d   :  { %v525_v16 = vadd.f32 %v765_v22, %v682_v34 }
 0x20e   :  { %v516_v26 = vpop.f32.mrf.mxu0 }
 0x20f   :  { %v735_v27 = vpack.c.bf16 %v525_v16, %v525_v16  ;;  %v517_v31 = vadd.f32 %v682_v34, %v516_v26 }
 0x210   :  { %v766_v32 = vpop.f32.mrf.mxu0  ;;  %v773_v55 = vpop.f32.mrf.mxu1 }
 0x211   :  { %646 = vst.msk [vmem:[%s1199_s5 + $0x8] sm:$0xf] %vm361_vm1, %v735_v27  ;;  %v733_v33 = vpack.c.bf16 %v517_v31, %v517_v31  ;;  %v528_v20 = vadd.f32 %v766_v32, %v682_v34  ;;  %v557_v0 = vadd.f32 %v773_v55, %v682_v34 }
 0x212   :  { %v519_v38 = vpop.f32.mrf.mxu0  ;;  %v548_v39 = vpop.f32.mrf.mxu1 }
 0x213   :  { %644 = vst.msk [vmem:[%s1199_s5] sm:$0xf] %vm361_vm1, %v733_v33  ;;  %v736_v40 = vpack.c.bf16 %v528_v20, %v528_v20  ;;  %v743_v41 = vpack.c.bf16 %v557_v0, %v557_v0  ;;  %v520_v42 = vadd.f32 %v682_v34, %v519_v38  ;;  %v549_v43 = vadd.f32 %v682_v34, %v548_v39 }
 0x214   :  { %v774_v46 = vpop.f32.mrf.mxu1 }
 0x215   :  { %647 = vst.msk [vmem:[%s1199_s5 + $0xc] sm:$0xf] %vm361_vm1, %v736_v40  ;;  %654 = vst.msk [vmem:[%s1199_s5 + $0x28] sm:$0xf] %vm361_vm1, %v743_v41  ;;  %v734_v36 = vpack.c.bf16 %v520_v42, %v520_v42  ;;  %v741_v24 = vpack.c.bf16 %v549_v43, %v549_v43  ;;  %v560_v1 = vadd.f32 %v774_v46, %v682_v34 }
 0x216   :  { %v551_v48 = vpop.f32.mrf.mxu1 }
 0x217   :  { %645 = vst.msk [vmem:[%s1199_s5 + $0x4] sm:$0xf] %vm361_vm1, %v734_v36  ;;  %652 = vst.msk [vmem:[%s1199_s5 + $0x20] sm:$0xf] %vm361_vm1, %v741_v24  ;;  %v744_v10 = vpack.c.bf16 %v560_v1, %v560_v1  ;;  %v552_v49 = vadd.f32 %v682_v34, %v551_v48 }
 0x219   :  { %655 = vst.msk [vmem:[%s1199_s5 + $0x2c] sm:$0xf] %vm361_vm1, %v744_v10  ;;  %v742_v50 = vpack.c.bf16 %v552_v49, %v552_v49 }
 0x21b   :  { %653 = vst.msk [vmem:[%s1199_s5 + $0x24] sm:$0xf] %vm361_vm1, %v742_v50 }
 0x21c   :  { %v769_v51 = vpop.f32.mrf.mxu0 }
 0x21d   :  { %v541_v52 = vadd.f32 %v769_v51, %v682_v34 }
 0x21e   :  { %v532_v28 = vpop.f32.mrf.mxu0 }
 0x21f   :  { %v739_v29 = vpack.c.bf16 %v541_v52, %v541_v52  ;;  %v533_v53 = vadd.f32 %v682_v34, %v532_v28 }
 0x220   :  { %v770_v56 = vpop.f32.mrf.mxu0  ;;  %v777_v11 = vpop.f32.mrf.mxu1 }
 0x221   :  { %650 = vst.msk [vmem:[%s1199_s5 + $0x18] sm:$0xf] %vm361_vm1, %v739_v29  ;;  %v737_v57 = vpack.c.bf16 %v533_v53, %v533_v53  ;;  %v544_v23 = vadd.f32 %v770_v56, %v682_v34  ;;  %v573_v58 = vadd.f32 %v777_v11, %v682_v34 }
 0x222   :  { %v535_v44 = vpop.f32.mrf.mxu0  ;;  %v564_v59 = vpop.f32.mrf.mxu1 }
 0x223   :  { %648 = vst.msk [vmem:[%s1199_s5 + $0x10] sm:$0xf] %vm361_vm1, %v737_v57  ;;  %v740_v37 = vpack.c.bf16 %v544_v23, %v544_v23  ;;  %v747_v60 = vpack.c.bf16 %v573_v58, %v573_v58  ;;  %v536_v61 = vadd.f32 %v682_v34, %v535_v44  ;;  %v565_v62 = vadd.f32 %v682_v34, %v564_v59 }
 0x224   :  { %v778_v63 = vpop.f32.mrf.mxu1 }
 0x225   :  { %651 = vst.msk [vmem:[%s1199_s5 + $0x1c] sm:$0xf] %vm361_vm1, %v740_v37  ;;  %658 = vst.msk [vmem:[%s1199_s5 + $0x38] sm:$0xf] %vm361_vm1, %v747_v60  ;;  %v738_v17 = vpack.c.bf16 %v536_v61, %v536_v61  ;;  %v745_v2 = vpack.c.bf16 %v565_v62, %v565_v62  ;;  %v576_v35 = vadd.f32 %v778_v63, %v682_v34 }
 0x226   :  { %v567_v3 = vpop.f32.mrf.mxu1 }
 0x227   :  { %649 = vst.msk [vmem:[%s1199_s5 + $0x14] sm:$0xf] %vm361_vm1, %v738_v17  ;;  %656 = vst.msk [vmem:[%s1199_s5 + $0x30] sm:$0xf] %vm361_vm1, %v745_v2  ;;  %v748_v4 = vpack.c.bf16 %v576_v35, %v576_v35  ;;  %v568_v5 = vadd.f32 %v682_v34, %v567_v3 }
 0x229   :  { %659 = vst.msk [vmem:[%s1199_s5 + $0x3c] sm:$0xf] %vm361_vm1, %v748_v4  ;;  %v746_v6 = vpack.c.bf16 %v568_v5, %v568_v5 }
 0x22b   :  { %657 = vst.msk [vmem:[%s1199_s5 + $0x34] sm:$0xf] %vm361_vm1, %v746_v6 }

// kernel: _lambda_.24
= control target key start
LH: loop header
LB: loop body
LE: loop exit
PB: predicated region body
PF: predicated region fallthrough
CT: control target
= control target key end

     0   :  { %s868_s12 = smov 0   ;;  %s870_s13 = smov 0   ;;  %s953_s0 = inlined_call_operand.vmem [shape: bf16[8,64,8], index: 0, kind: input, shape index: {}]   ;;  %s954_s1 = inlined_call_operand.vmem [shape: bf16[8,8,8], index: 1, kind: input, shape index: {}]   ;;  %s955_s2 = inlined_call_operand.vmem [shape: bf16[8,8,8], index: 2, kind: input, shape index: {}]   ;;  %s956_s3 = inlined_call_operand.vmem [shape: bf16[8,64,8], index: 3, kind: output, shape index: {}]  }
   0x1   :  { %s872_s14 = smov 0  }
   0x2 LB: > { %s25_s15 = sadd.s32 1, %s842_s13  ;;  %p693_p0 = scmp.ge.s32.totalorder %s846_s14, 1  ;;  %s846_s14 = sphi %s872_s14, %s13_s14   ;;  %s842_s13 = sphi %s870_s13, %s958_s13   ;;  %s838_s12 = sphi %s868_s12, %s957_s12  }
   0x3   : > { %p27_p1 = scmp.ge.s32.totalorder %s25_s15, 8  ;;  %p176_p2 = scmp.lt.s32.totalorder %s846_s14, 9 }
   0x5   : > { %s960_s15 = smov (%p27_p1, %s25_s15), 0  ;;  %p177_p3 = pnand %p693_p0, %p176_p2 }
   0x6   : > { %p217_p4 = scmp.lt.s32.totalorder (!%p177_p3), %s838_s12, 7 }
   0x7   : > { %180 = sbr.rel (%p177_p3) target bundleno = 754 (0x2f2), region = 32 }
   0xc   : > { %s962_s12 = smov (!%p217_p4, %s838_s12), 7  ;;  %vm275_vm0 = vcmask 64512   ;;  %vm468_vm1 = vcmask 1043456   ;;  %vm569_vm2 = vcmask 60416  }
   0xd   : > { %s722_s16 = sshll.u32 %s962_s12, 5  ;;  %s696_s17 = sshll.u32 %s962_s12, 2 }
   0xe   : > { %s224_s20 = scalar_lea.vmem %s953_s0, %s722_s16  ;;  %s229_s23 = scalar_lea.vmem %s954_s1, %s696_s17 }
   0xf   : > { %v253_v0 = vld [vmem:[%s229_s23] sm:$0xf]  ;;  %v789_v3 = vld [vmem:[%s224_s20 + $0x8] sm:$0xff]   ;;  %v790_v4 = vld [vmem:[%s224_s20 + $0x10] sm:$0xff]   ;;  %s233_s26 = scalar_lea.vmem %s955_s2, %s696_s17  ;;  %s242_s29 = scalar_lea.vmem %s956_s3, %s722_s16 }
  0x10   : > { %762 = vmatprep.subr.msk.bf16.mxu0 %vm275_vm0, %v253_v0  ;;  %v289_v1 = vsel %vm275_vm0, %v253_v0, 0  ;;  %v788_v2 = vld [vmem:[%s224_s20] sm:$0xff]   ;;  %v791_v5 = vld [vmem:[%s224_s20 + $0x18] sm:$0xff]  }
  0x11   : > { %743 = vmatpush3.bf16.xpose.msra.mxu0 %v289_v1  ;;  %744 = vmatprep.mubr.msk.bf16.mxu0 %vm275_vm0, %v788_v2 }
  0x18   : > { %745 = vmatmul.mubr.msk.bf16.vlgmr.msra.gmra.mxu0 %vm275_vm0, %v789_v3 }
  0x19   : > { %748 = vmatprep.mubr.msk.bf16.mxu0 %vm275_vm0, %v790_v4 }
  0x20   : > { %749 = vmatmul.mubr.msk.bf16.gmra.mxu0 %vm275_vm0, %v791_v5 }
  0xd8   : > { %v746_v6 = vpop.f32.mrf.mxu0 }
  0xd9   : > { %v358_v7 = vmul.f32 0.35355338, %v746_v6  ;;  %v254_v6 = vld [vmem:[%s233_s26] sm:$0xf] }
  0xda   : > { %v325_v8 = vpop.f32.mrf.mxu0  ;;  %763 = vmatprep.subr.msk.bf16.mxu1 %vm468_vm1, %v254_v6 }
  0xdb   : > { %v356_v9 = vmul.f32 0.35355338, %v325_v8  ;;  %v370_v10 = vsel %vm275_vm0, %v358_v7, -inf }
  0xdc   : > { %371 = vmax.xlane.f32.xlu1 %v370_v10  ;;  %v747_v11 = vpop.f32.mrf.mxu0 }
  0xdd   : > { %v359_v12 = vmul.f32 0.35355338, %v747_v11  ;;  %v364_v13 = vsel %vm275_vm0, %v356_v9, -inf }
  0xde   : > { %365 = vmax.xlane.f32.xlu0 %v364_v13  ;;  %v328_v14 = vpop.f32.mrf.mxu0 }
  0xdf   : > { %v357_v15 = vmul.f32 0.35355338, %v328_v14  ;;  %v373_v16 = vsel %vm275_vm0, %v359_v12, -inf }
  0xe0   : > { %374 = vmax.xlane.f32.xlu1 %v373_v16  ;;  %v750_v17 = vpop.f32.mrf.mxu0 }
  0xe1   : > { %v367_v18 = vsel %vm275_vm0, %v357_v15, -inf  ;;  %v362_v22 = vmul.f32 0.35355338, %v750_v17 }
  0xe2   : > { %368 = vmax.xlane.f32.xlu0 %v367_v18  ;;  %v341_v19 = vpop.f32.mrf.mxu0 }
  0xe3   : > { %v360_v20 = vmul.f32 0.35355338, %v341_v19  ;;  %v382_v27 = vsel %vm275_vm0, %v362_v22, -inf }
  0xe4   : > { %v751_v21 = vpop.f32.mrf.mxu0 }
  0xe5   : > { %v376_v23 = vsel %vm275_vm0, %v360_v20, -inf  ;;  %v363_v26 = vmul.f32 0.35355338, %v751_v21 }
  0xe6   : > { %377 = vmax.xlane.f32.xlu0 %v376_v23  ;;  %v344_v24 = vpop.f32.mrf.mxu0 }
  0xe7   : > { %v361_v25 = vmul.f32 0.35355338, %v344_v24  ;;  %v385_v29 = vsel %vm275_vm0, %v363_v26, -inf }
  0xe9   : > { %v379_v28 = vsel %vm275_vm0, %v361_v25, -inf }
  0xea   : > { %383 = vmax.xlane.f32.xlu0 %v382_v27  ;;  %380 = vmax.xlane.f32.xlu1 %v379_v28 }
  0xee   : > { %386 = vmax.xlane.f32.xlu1 %v385_v29 }
 0x165   : > { %v372_v30 = vpop.xlane.xlu1 %371 }
 0x166   : > { %v390_v31 = vsub.f32 %v358_v7, %v372_v30  ;;  %v470_v7 = vsel %vm468_vm1, %v254_v6, 0 }
 0x167   : > { %v366_v32 = vpop.xlane.xlu0 %365  ;;  %753 = vmatpush3.bf16.msra.mxu1 %v470_v7 }
 0x168   : > { %v388_v33 = vsub.f32 %v356_v9, %v366_v32  ;;  %v400_v35 = vmul.f32 1.442695, %v390_v31 }
 0x169   : > { %v375_v34 = vpop.xlane.xlu1 %374 }
 0x16a   : > { %v396_v36 = vmul.f32 1.442695, %v388_v33  ;;  %v391_v37 = vsub.f32 %v359_v12, %v375_v34 }
 0x16b   : > { %v369_v38 = vpop.xlane.xlu0 %368 }
 0x16c   : > { %792 = vpow2.f32 %v396_v36  ;;  %v389_v39 = vsub.f32 %v357_v15, %v369_v38  ;;  %v402_v40 = vmul.f32 1.442695, %v391_v37 }
 0x16d   : > { %794 = vpow2.f32 %v400_v35 }
 0x16e   : > { %v398_v41 = vmul.f32 1.442695, %v389_v39 }
 0x16f   : > { %v378_v42 = vpop.xlane.xlu0 %377 }
 0x170   : > { %796 = vpow2.f32 %v398_v41  ;;  %v392_v43 = vsub.f32 %v360_v20, %v378_v42 }
 0x171   : > { %798 = vpow2.f32 %v402_v40 }
 0x172   : > { %v404_v44 = vmul.f32 1.442695, %v392_v43 }
 0x173   : > { %v384_v45 = vpop.xlane.xlu0 %383  ;;  %v381_v46 = vpop.xlane.xlu1 %380 }
 0x174   : > { %800 = vpow2.f32 %v404_v44  ;;  %v394_v47 = vsub.f32 %v362_v22, %v384_v45  ;;  %v393_v48 = vsub.f32 %v361_v25, %v381_v46 }
 0x176   : > { %v408_v49 = vmul.f32 1.442695, %v394_v47  ;;  %v406_v50 = vmul.f32 1.442695, %v393_v48 }
 0x177   : > { %v387_v51 = vpop.xlane.xlu1 %386 }
 0x178   : > { %802 = vpow2.f32 %v408_v49  ;;  %v395_v52 = vsub.f32 %v363_v26, %v387_v51 }
 0x179   : > { %v793_v53 = vpop.eup %792  ;;  %804 = vpow2.f32 %v406_v50 }
 0x17a   : > { %v410_v54 = vmul.f32 1.442695, %v395_v52  ;;  %v412_v55 = vsel %vm275_vm0, %v793_v53, 0.0  ;;  %v795_v56 = vpop.eup %794 }
 0x17b   : > { %413 = vadd.xlane.f32.xlu0 %v412_v55  ;;  %v418_v58 = vsel %vm275_vm0, %v795_v56, 0.0 }
 0x17c   : > { %806 = vpow2.f32 %v410_v54 }
 0x17d   : > { %v797_v57 = vpop.eup %796 }
 0x17e   : > { %v415_v59 = vsel %vm275_vm0, %v797_v57, 0.0  ;;  %v799_v60 = vpop.eup %798 }
 0x17f   : > { %419 = vadd.xlane.f32.xlu0 %v418_v58  ;;  %416 = vadd.xlane.f32.xlu1 %v415_v59  ;;  %v421_v63 = vsel %vm275_vm0, %v799_v60, 0.0 }
 0x181   : > { %v801_v61 = vpop.eup %800 }
 0x182   : > { %v424_v62 = vsel %vm275_vm0, %v801_v61, 0.0 }
 0x183   : > { %425 = vadd.xlane.f32.xlu0 %v424_v62  ;;  %422 = vadd.xlane.f32.xlu1 %v421_v63 }
 0x185   : > { %v803_v0 = vpop.eup %802 }
 0x186   : > { %v805_v1 = vpop.eup %804  ;;  %v430_v2 = vsel %vm275_vm0, %v803_v0, 0.0 }
 0x187   : > { %431 = vadd.xlane.f32.xlu0 %v430_v2  ;;  %v427_v3 = vsel %vm275_vm0, %v805_v1, 0.0 }
 0x188   : > { %428 = vadd.xlane.f32.xlu1 %v427_v3 }
 0x189   : > { %v807_v4 = vpop.eup %806 }
 0x18a   : > { %v433_v5 = vsel %vm275_vm0, %v807_v4, 0.0 }
 0x18c   : > { %434 = vadd.xlane.f32.xlu1 %v433_v5 }
 0x204   : > { %v414_v8 = vpop.xlane.xlu0 %413 }
 0x205   : > { %808 = vrcp.f32 %v414_v8 }
 0x208   : > { %v420_v9 = vpop.xlane.xlu0 %419  ;;  %v417_v10 = vpop.xlane.xlu1 %416 }
 0x209   : > { %810 = vrcp.f32 %v417_v10 }
 0x20a   : > { %812 = vrcp.f32 %v420_v9 }
 0x20c   : > { %v426_v11 = vpop.xlane.xlu0 %425  ;;  %v423_v12 = vpop.xlane.xlu1 %422 }
 0x20d   : > { %814 = vrcp.f32 %v423_v12 }
 0x20e   : > { %816 = vrcp.f32 %v426_v11 }
 0x210   : > { %v432_v13 = vpop.xlane.xlu0 %431 }
 0x211   : > { %v429_v14 = vpop.xlane.xlu1 %428 }
 0x212   : > { %818 = vrcp.f32 %v429_v14  ;;  %v809_v15 = vpop.eup %808 }
 0x213   : > { %820 = vrcp.f32 %v432_v13  ;;  %v444_v18 = vmul.f32 %v809_v15, %v793_v53 }
 0x215   : > { %v435_v16 = vpop.xlane.xlu1 %434 }
 0x216   : > { %822 = vrcp.f32 %v435_v16  ;;  %v811_v17 = vpop.eup %810 }
 0x217   : > { %v445_v19 = vmul.f32 %v811_v17, %v797_v57  ;;  %v813_v20 = vpop.eup %812 }
 0x218   : > { %v446_v23 = vmul.f32 %v813_v20, %v795_v56 }
 0x219   : > { %v452_v21 = vpack.c.bf16 %v445_v19, %v444_v18 }
 0x21a   : > { %v815_v22 = vpop.eup %814 }
 0x21b   : > { %754 = vmatprep.mubr.msk.bf16.mxu1 %vm275_vm0, %v452_v21  ;;  %v447_v24 = vmul.f32 %v815_v22, %v799_v60  ;;  %v817_v25 = vpop.eup %816 }
 0x21c   : > { %v448_v28 = vmul.f32 %v817_v25, %v801_v61 }
 0x21d   : > { %v453_v26 = vpack.c.bf16 %v447_v24, %v446_v23 }
 0x21f   : > { %v819_v27 = vpop.eup %818  ;;  %755 = vmatmul.mubr.msk.bf16.vlgmr.msra.gmra.mxu1 %vm275_vm0, %v453_v26 }
 0x220   : > { %v449_v29 = vmul.f32 %v819_v27, %v805_v1  ;;  %v821_v30 = vpop.eup %820 }
 0x221   : > { %v450_v33 = vmul.f32 %v821_v30, %v803_v0 }
 0x222   : > { %v454_v31 = vpack.c.bf16 %v449_v29, %v448_v28 }
 0x223   : > { %v823_v32 = vpop.eup %822 }
 0x224   : > { %758 = vmatprep.mubr.msk.bf16.mxu1 %vm275_vm0, %v454_v31  ;;  %v451_v34 = vmul.f32 %v823_v32, %v807_v4 }
 0x226   : > { %v455_v35 = vpack.c.bf16 %v451_v34, %v450_v33 }
 0x228   : > { %759 = vmatmul.mubr.msk.bf16.gmra.mxu1 %vm275_vm0, %v455_v35 }
 0x2df   : > { %v756_v36 = vpop.f32.mrf.mxu1 }
 0x2e0   : > { %v726_v37 = vpack.c.bf16 %v756_v36, %v756_v36 }
 0x2e1   : > { %v506_v38 = vpop.f32.mrf.mxu1 }
 0x2e2   : > { %572 = vst.msk [vmem:[%s242_s29 + $0x8] sm:$0xf] %vm569_vm2, %v726_v37  ;;  %v724_v39 = vpack.c.bf16 %v506_v38, %v506_v38 }
 0x2e3   : > { %v757_v40 = vpop.f32.mrf.mxu1 }
 0x2e4   : > { %570 = vst.msk [vmem:[%s242_s29] sm:$0xf] %vm569_vm2, %v724_v39  ;;  %v727_v41 = vpack.c.bf16 %v757_v40, %v757_v40 }
 0x2e5   : > { %v509_v42 = vpop.f32.mrf.mxu1 }
 0x2e6   : > { %573 = vst.msk [vmem:[%s242_s29 + $0xc] sm:$0xf] %vm569_vm2, %v727_v41  ;;  %v725_v43 = vpack.c.bf16 %v509_v42, %v509_v42 }
 0x2e8   : > { %v760_v44 = vpop.f32.mrf.mxu1  ;;  %571 = vst.msk [vmem:[%s242_s29 + $0x4] sm:$0xf] %vm569_vm2, %v725_v43 }
 0x2e9   : > { %v730_v45 = vpack.c.bf16 %v760_v44, %v760_v44 }
 0x2ea   : > { %v522_v46 = vpop.f32.mrf.mxu1 }
 0x2eb   : > { %576 = vst.msk [vmem:[%s242_s29 + $0x18] sm:$0xf] %vm569_vm2, %v730_v45  ;;  %v728_v47 = vpack.c.bf16 %v522_v46, %v522_v46 }
 0x2ec   : > { %v761_v48 = vpop.f32.mrf.mxu1 }
 0x2ed   : > { %574 = vst.msk [vmem:[%s242_s29 + $0x10] sm:$0xf] %vm569_vm2, %v728_v47  ;;  %v731_v49 = vpack.c.bf16 %v761_v48, %v761_v48 }
 0x2ee   : > { %v525_v50 = vpop.f32.mrf.mxu1 }
 0x2ef   : > { %577 = vst.msk [vmem:[%s242_s29 + $0x1c] sm:$0xf] %vm569_vm2, %v731_v49  ;;  %v729_v51 = vpack.c.bf16 %v525_v50, %v525_v50 }
 0x2f1   : > { %575 = vst.msk [vmem:[%s242_s29 + $0x14] sm:$0xf] %vm569_vm2, %v729_v51 }
 0x2f2 PF: > { %s13_s14 = sadd.s32 1, %s846_s14   ;;  %s957_s12 = smov %s842_s13 }
 0x2f3   : > { %p10_p5 = scmp.ge.s32.totalorder %s13_s14, 10   ;;  %s958_s13 = smov %s960_s15 }
 0x2f5   :  { %12 = sbr.rel (!%p10_p5) target bundleno = 2 (0x2), region = 68 }

// kernel: _lambda_.26
= control target key start
LH: loop header
LB: loop body
LE: loop exit
PB: predicated region body
PF: predicated region fallthrough
CT: control target
= control target key end

     0   :  { %vm45_vm0 = vcmask 261120   ;;  %s2145_s0 = inlined_call_operand.vmem [shape: f32[128,32], index: 0, kind: input, shape index: {}]   ;;  %s2146_s3 = inlined_call_operand.vmem [shape: bf16[32,32], index: 3, kind: input, shape index: {}]   ;;  %s2147_s1 = inlined_call_operand.vmem [shape: f32[1,32], index: 1, kind: input, shape index: {}]   ;;  %s2148_s2 = inlined_call_operand.vmem [shape: f32[1,32], index: 2, kind: input, shape index: {}]   ;;  %s2149_s5 = inlined_call_operand.vmem [shape: bf16[32,32], index: 5, kind: input, shape index: {}]   ;;  %s2150_s4 = inlined_call_operand.vmem [shape: f32[1,32], index: 4, kind: input, shape index: {}]   ;;  %s2151_s6 = inlined_call_operand.vmem [shape: f32[1,32], index: 6, kind: input, shape index: {}]   ;;  %s2152_s7 = inlined_call_operand.vmem [shape: f32[128,32], index: 7, kind: output, shape index: {}]  }
   0x1   :  { %v27_v0 = vld [vmem:[%s2145_s0] sm:$0xff]  ;;  %v29_v1 = vld [vmem:[%s2145_s0 + $0x10] sm:$0xff]  ;;  %v28_v2 = vld [vmem:[%s2145_s0 + $0x8] sm:$0xff] }
   0x2   :  { %v46_v3 = vsel %vm45_vm0, %v27_v0, 0.0  ;;  %v52_v4 = vsel %vm45_vm0, %v29_v1, 0.0  ;;  %v30_v5 = vld [vmem:[%s2145_s0 + $0x18] sm:$0xff]  ;;  %v49_v6 = vsel %vm45_vm0, %v28_v2, 0.0  ;;  %v31_v8 = vld [vmem:[%s2145_s0 + $0x20] sm:$0xff]  ;;  %v32_v9 = vld [vmem:[%s2145_s0 + $0x28] sm:$0xff] }
   0x3   :  { %47 = vadd.xlane.f32.xlu0 %v46_v3  ;;  %53 = vadd.xlane.f32.xlu1 %v52_v4  ;;  %v55_v7 = vsel %vm45_vm0, %v30_v5, 0.0  ;;  %v58_v10 = vsel %vm45_vm0, %v31_v8, 0.0  ;;  %v61_v11 = vsel %vm45_vm0, %v32_v9, 0.0  ;;  %v1340_v12 = vld [vmem:[%s2145_s0 + $0x30] sm:$0xff]  ;;  %v1345_v13 = vld [vmem:[%s2145_s0 + $0x38] sm:$0xff]  ;;  %v1354_v16 = vld [vmem:[%s2145_s0 + $0x40] sm:$0xff] }
   0x4   :  { %v64_v14 = vsel %vm45_vm0, %v1340_v12, 0.0  ;;  %v67_v15 = vsel %vm45_vm0, %v1345_v13, 0.0  ;;  %v1359_v17 = vld [vmem:[%s2145_s0 + $0x48] sm:$0xff]  ;;  %v70_v18 = vsel %vm45_vm0, %v1354_v16, 0.0  ;;  %v1368_v20 = vld [vmem:[%s2145_s0 + $0x50] sm:$0xff]  ;;  %v1373_v21 = vld [vmem:[%s2145_s0 + $0x58] sm:$0xff] }
   0x5   :  { %v73_v19 = vsel %vm45_vm0, %v1359_v17, 0.0  ;;  %v76_v22 = vsel %vm45_vm0, %v1368_v20, 0.0  ;;  %v79_v23 = vsel %vm45_vm0, %v1373_v21, 0.0  ;;  %v1382_v24 = vld [vmem:[%s2145_s0 + $0x60] sm:$0xff]  ;;  %v1387_v25 = vld [vmem:[%s2145_s0 + $0x68] sm:$0xff]  ;;  %v1396_v28 = vld [vmem:[%s2145_s0 + $0x70] sm:$0xff] }
   0x6   :  { %v82_v26 = vsel %vm45_vm0, %v1382_v24, 0.0  ;;  %v85_v27 = vsel %vm45_vm0, %v1387_v25, 0.0  ;;  %v1401_v29 = vld [vmem:[%s2145_s0 + $0x78] sm:$0xff]  ;;  %v88_v30 = vsel %vm45_vm0, %v1396_v28, 0.0 }
   0x7   :  { %50 = vadd.xlane.f32.xlu0 %v49_v6  ;;  %56 = vadd.xlane.f32.xlu1 %v55_v7  ;;  %v91_v31 = vsel %vm45_vm0, %v1401_v29, 0.0 }
   0xb   :  { %59 = vadd.xlane.f32.xlu0 %v58_v10  ;;  %62 = vadd.xlane.f32.xlu1 %v61_v11 }
   0xf   :  { %65 = vadd.xlane.f32.xlu0 %v64_v14  ;;  %68 = vadd.xlane.f32.xlu1 %v67_v15 }
  0x13   :  { %71 = vadd.xlane.f32.xlu0 %v70_v18  ;;  %74 = vadd.xlane.f32.xlu1 %v73_v19 }
  0x17   :  { %77 = vadd.xlane.f32.xlu0 %v76_v22  ;;  %80 = vadd.xlane.f32.xlu1 %v79_v23 }
  0x1b   :  { %83 = vadd.xlane.f32.xlu0 %v82_v26  ;;  %86 = vadd.xlane.f32.xlu1 %v85_v27 }
  0x1f   :  { %89 = vadd.xlane.f32.xlu0 %v88_v30  ;;  %92 = vadd.xlane.f32.xlu1 %v91_v31 }
  0x8c   :  { %v48_v32 = vpop.xlane.xlu0 %47  ;;  %v54_v33 = vpop.xlane.xlu1 %53 }
  0x8d   :  { %v95_v34 = vmul.f32 0.03125, %v48_v32  ;;  %v97_v35 = vmul.f32 0.03125, %v54_v33 }
  0x8f   :  { %v1407_v36 = vsub.f32 %v27_v0, %v95_v34  ;;  %v1409_v37 = vsub.f32 %v29_v1, %v97_v35 }
  0x90   :  { %v51_v38 = vpop.xlane.xlu0 %50  ;;  %v57_v39 = vpop.xlane.xlu1 %56 }
  0x91   :  { %v96_v40 = vmul.f32 0.03125, %v51_v38  ;;  %v98_v41 = vmul.f32 0.03125, %v57_v39  ;;  %v127_v42 = vmul.f32 %v1407_v36, %v1407_v36  ;;  %v129_v43 = vmul.f32 %v1409_v37, %v1409_v37 }
  0x93   :  { %v1415_v44 = vsub.f32 %v28_v2, %v96_v40  ;;  %v1417_v45 = vsub.f32 %v30_v5, %v98_v41  ;;  %v143_v46 = vsel %vm45_vm0, %v127_v42, 0.0  ;;  %v149_v49 = vsel %vm45_vm0, %v129_v43, 0.0 }
  0x94   :  { %144 = vadd.xlane.f32.xlu0 %v143_v46  ;;  %v60_v47 = vpop.xlane.xlu0 %59  ;;  %v63_v48 = vpop.xlane.xlu1 %62 }
  0x95   :  { %v99_v50 = vmul.f32 0.03125, %v60_v47  ;;  %v100_v51 = vmul.f32 0.03125, %v63_v48  ;;  %v128_v52 = vmul.f32 %v1415_v44, %v1415_v44  ;;  %v130_v53 = vmul.f32 %v1417_v45, %v1417_v45 }
  0x97   :  { %v1425_v54 = vsub.f32 %v31_v8, %v99_v50  ;;  %v1427_v55 = vsub.f32 %v32_v9, %v100_v51  ;;  %v146_v56 = vsel %vm45_vm0, %v128_v52, 0.0  ;;  %v152_v59 = vsel %vm45_vm0, %v130_v53, 0.0  ;;  %v1157_v53 = vld [vmem:[%s2146_s3] sm:$0xff]  }
  0x98   :  { %150 = vadd.xlane.f32.xlu0 %v149_v49  ;;  %147 = vadd.xlane.f32.xlu1 %v146_v56  ;;  %v66_v57 = vpop.xlane.xlu0 %65  ;;  %v69_v58 = vpop.xlane.xlu1 %68 }
  0x99   :  { %v101_v60 = vmul.f32 0.03125, %v66_v57  ;;  %v102_v61 = vmul.f32 0.03125, %v69_v58  ;;  %v131_v62 = vmul.f32 %v1425_v54, %v1425_v54  ;;  %v132_v63 = vmul.f32 %v1427_v55, %v1427_v55 }
  0x9b   :  { %v1436_v0 = vsub.f32 %v1340_v12, %v101_v60  ;;  %v1439_v1 = vsub.f32 %v1345_v13, %v102_v61  ;;  %v155_v2 = vsel %vm45_vm0, %v131_v62, 0.0  ;;  %v158_v5 = vsel %vm45_vm0, %v132_v63, 0.0 }
  0x9c   :  { %153 = vadd.xlane.f32.xlu1 %v152_v59  ;;  %156 = vadd.xlane.f32.xlu0 %v155_v2  ;;  %v72_v3 = vpop.xlane.xlu0 %71  ;;  %v75_v4 = vpop.xlane.xlu1 %74 }
  0x9d   :  { %v103_v6 = vmul.f32 0.03125, %v72_v3  ;;  %v104_v7 = vmul.f32 0.03125, %v75_v4  ;;  %v133_v8 = vmul.f32 %v1436_v0, %v1436_v0  ;;  %v134_v9 = vmul.f32 %v1439_v1, %v1439_v1 }
  0x9f   :  { %v1448_v10 = vsub.f32 %v1354_v16, %v103_v6  ;;  %v1451_v11 = vsub.f32 %v1359_v17, %v104_v7  ;;  %v161_v12 = vsel %vm45_vm0, %v133_v8, 0.0  ;;  %v164_v15 = vsel %vm45_vm0, %v134_v9, 0.0 }
  0xa0   :  { %159 = vadd.xlane.f32.xlu1 %v158_v5  ;;  %162 = vadd.xlane.f32.xlu0 %v161_v12  ;;  %v78_v13 = vpop.xlane.xlu0 %77  ;;  %v81_v14 = vpop.xlane.xlu1 %80 }
  0xa1   :  { %v105_v18 = vmul.f32 0.03125, %v78_v13  ;;  %v106_v19 = vmul.f32 0.03125, %v81_v14  ;;  %v135_v22 = vmul.f32 %v1448_v10, %v1448_v10  ;;  %v136_v16 = vmul.f32 %v1451_v11, %v1451_v11 }
  0xa3   :  { %v1460_v23 = vsub.f32 %v1368_v20, %v105_v18  ;;  %v1463_v17 = vsub.f32 %v1373_v21, %v106_v19  ;;  %v167_v26 = vsel %vm45_vm0, %v135_v22, 0.0  ;;  %v170_v31 = vsel %vm45_vm0, %v136_v16, 0.0 }
  0xa4   :  { %165 = vadd.xlane.f32.xlu1 %v164_v15  ;;  %168 = vadd.xlane.f32.xlu0 %v167_v26  ;;  %v84_v27 = vpop.xlane.xlu0 %83  ;;  %v87_v30 = vpop.xlane.xlu1 %86 }
  0xa5   :  { %v107_v32 = vmul.f32 0.03125, %v84_v27  ;;  %v108_v33 = vmul.f32 0.03125, %v87_v30  ;;  %v137_v34 = vmul.f32 %v1460_v23, %v1460_v23  ;;  %v138_v20 = vmul.f32 %v1463_v17, %v1463_v17 }
  0xa7   :  { %v1472_v35 = vsub.f32 %v1382_v24, %v107_v32  ;;  %v1475_v21 = vsub.f32 %v1387_v25, %v108_v33  ;;  %v173_v38 = vsel %vm45_vm0, %v137_v34, 0.0  ;;  %v176_v41 = vsel %vm45_vm0, %v138_v20, 0.0  ;;  %v1506_v32 = vld [vmem:[%s2147_s1] ss:$0 sm:$0xff] }
  0xa8   :  { %171 = vadd.xlane.f32.xlu1 %v170_v31  ;;  %174 = vadd.xlane.f32.xlu0 %v173_v38  ;;  %v90_v39 = vpop.xlane.xlu0 %89  ;;  %v93_v40 = vpop.xlane.xlu1 %92 }
  0xa9   :  { %v109_v42 = vmul.f32 0.03125, %v90_v39  ;;  %v110_v43 = vmul.f32 0.03125, %v93_v40  ;;  %v139_v46 = vmul.f32 %v1472_v35, %v1472_v35  ;;  %v140_v24 = vmul.f32 %v1475_v21, %v1475_v21 }
  0xab   :  { %v1484_v47 = vsub.f32 %v1396_v28, %v109_v42  ;;  %v1487_v25 = vsub.f32 %v1401_v29, %v110_v43  ;;  %v179_v48 = vsel %vm45_vm0, %v139_v46, 0.0  ;;  %v182_v49 = vsel %vm45_vm0, %v140_v24, 0.0  ;;  %v1156_v29 = vld [vmem:[%s2146_s3 + $0x8] sm:$0xff]   ;;  %v1513_v24 = vld [vmem:[%s2148_s2] ss:$0 sm:$0xff] }
  0xac   :  { %177 = vadd.xlane.f32.xlu1 %v176_v41  ;;  %180 = vadd.xlane.f32.xlu0 %v179_v48 }
  0xad   :  { %v141_v50 = vmul.f32 %v1484_v47, %v1484_v47  ;;  %v142_v51 = vmul.f32 %v1487_v25, %v1487_v25  ;;  %1115 = vmatprep.subr.bf16.mxu0 %v1156_v29 }
  0xae   :  { %1116 = vmatpush3.bf16.msra.mxu0 %v1156_v29 }
  0xaf   :  { %v185_v52 = vsel %vm45_vm0, %v141_v50, 0.0  ;;  %v188_v28 = vsel %vm45_vm0, %v142_v51, 0.0  ;;  %1117 = vmatprep.subr.bf16.mxu0 %v1157_v53 }
  0xb0   :  { %183 = vadd.xlane.f32.xlu1 %v182_v49  ;;  %186 = vadd.xlane.f32.xlu0 %v185_v52 }
  0xb2   :  { %1118 = vmatpush3.bf16.msra.mxu0 %v1157_v53 }
  0xb4   :  { %189 = vadd.xlane.f32.xlu1 %v188_v28 }
 0x11d   :  { %v145_v56 = vpop.xlane.xlu0 %144 }
 0x11e   :  { %v191_v57 = vmul.f32 0.03125, %v145_v56 }
 0x120   :  { %v207_v58 = vadd.f32 1e-05, %v191_v57 }
 0x121   :  { %v148_v59 = vpop.xlane.xlu1 %147  ;;  %v151_v60 = vpop.xlane.xlu0 %150 }
 0x122   :  { %1160 = vrsqrt.f32 %v207_v58  ;;  %v192_v61 = vmul.f32 0.03125, %v148_v59  ;;  %v193_v62 = vmul.f32 0.03125, %v151_v60 }
 0x124   :  { %v208_v63 = vadd.f32 1e-05, %v192_v61  ;;  %v209_v2 = vadd.f32 1e-05, %v193_v62 }
 0x125   :  { %v154_v3 = vpop.xlane.xlu1 %153  ;;  %v157_v4 = vpop.xlane.xlu0 %156 }
 0x126   :  { %1162 = vrsqrt.f32 %v208_v63  ;;  %v194_v5 = vmul.f32 0.03125, %v154_v3  ;;  %v195_v6 = vmul.f32 0.03125, %v157_v4 }
 0x127   :  { %1164 = vrsqrt.f32 %v209_v2 }
 0x128   :  { %v210_v7 = vadd.f32 1e-05, %v194_v5  ;;  %v211_v8 = vadd.f32 1e-05, %v195_v6 }
 0x129   :  { %v160_v9 = vpop.xlane.xlu1 %159  ;;  %v163_v12 = vpop.xlane.xlu0 %162 }
 0x12a   :  { %1166 = vrsqrt.f32 %v210_v7  ;;  %v196_v13 = vmul.f32 0.03125, %v160_v9  ;;  %v197_v14 = vmul.f32 0.03125, %v163_v12 }
 0x12b   :  { %1168 = vrsqrt.f32 %v211_v8 }
 0x12c   :  { %v212_v15 = vadd.f32 1e-05, %v196_v13  ;;  %v213_v18 = vadd.f32 1e-05, %v197_v14 }
 0x12d   :  { %v166_v19 = vpop.xlane.xlu1 %165  ;;  %v169_v22 = vpop.xlane.xlu0 %168 }
 0x12e   :  { %1170 = vrsqrt.f32 %v212_v15  ;;  %v198_v16 = vmul.f32 0.03125, %v166_v19  ;;  %v199_v26 = vmul.f32 0.03125, %v169_v22 }
 0x12f   :  { %v1161_v27 = vpop.eup %1160  ;;  %1172 = vrsqrt.f32 %v213_v18 }
 0x130   :  { %v214_v30 = vadd.f32 1e-05, %v198_v16  ;;  %v215_v31 = vadd.f32 1e-05, %v199_v26  ;;  %v239_v33 = vmul.f32 %v1161_v27, %v1407_v36 }
 0x131   :  { %v172_v34 = vpop.xlane.xlu1 %171  ;;  %v175_v20 = vpop.xlane.xlu0 %174 }
 0x132   :  { %1174 = vrsqrt.f32 %v214_v30  ;;  %v200_v38 = vmul.f32 0.03125, %v172_v34  ;;  %v201_v39 = vmul.f32 0.03125, %v175_v20  ;;  %v261_v41 = vmul.f32 %v1506_v32, %v239_v33 }
 0x133   :  { %v1163_v40 = vpop.eup %1162  ;;  %1176 = vrsqrt.f32 %v215_v31 }
 0x134   :  { %v1165_v42 = vpop.eup %1164  ;;  %v216_v43 = vadd.f32 1e-05, %v200_v38  ;;  %v217_v46 = vadd.f32 1e-05, %v201_v39  ;;  %v240_v48 = vmul.f32 %v1163_v40, %v1415_v44  ;;  %v283_v53 = vadd.f32 %v1513_v24, %v261_v41 }
 0x135   :  { %v178_v36 = vpop.xlane.xlu1 %177  ;;  %v181_v49 = vpop.xlane.xlu0 %180  ;;  %v241_v50 = vmul.f32 %v1165_v42, %v1409_v37 }
 0x136   :  { %1178 = vrsqrt.f32 %v216_v43  ;;  %v202_v51 = vmul.f32 0.03125, %v178_v36  ;;  %v203_v52 = vmul.f32 0.03125, %v181_v49  ;;  %v262_v28 = vmul.f32 %v1506_v32, %v240_v48 }
 0x137   :  { %v1167_v29 = vpop.eup %1166  ;;  %1180 = vrsqrt.f32 %v217_v46  ;;  %v263_v37 = vmul.f32 %v1506_v32, %v241_v50 }
 0x138   :  { %v1169_v56 = vpop.eup %1168  ;;  %v218_v57 = vadd.f32 1e-05, %v202_v51  ;;  %v219_v58 = vadd.f32 1e-05, %v203_v52  ;;  %v284_v59 = vadd.f32 %v1513_v24, %v262_v28  ;;  %v242_v44 = vmul.f32 %v1167_v29, %v1417_v45 }
 0x139   :  { %v184_v60 = vpop.xlane.xlu1 %183  ;;  %v187_v61 = vpop.xlane.xlu0 %186  ;;  %v243_v62 = vmul.f32 %v1169_v56, %v1425_v54  ;;  %v285_v54 = vadd.f32 %v1513_v24, %v263_v37 }
 0x13a   :  { %1182 = vrsqrt.f32 %v218_v57  ;;  %v204_v63 = vmul.f32 0.03125, %v184_v60  ;;  %v205_v2 = vmul.f32 0.03125, %v187_v61  ;;  %v299_v3 = vpack.c.bf16 %v284_v59, %v283_v53 }
 0x13b   :  { %v1171_v4 = vpop.eup %1170  ;;  %1184 = vrsqrt.f32 %v219_v58  ;;  %v264_v5 = vmul.f32 %v1506_v32, %v242_v44  ;;  %v265_v6 = vmul.f32 %v1506_v32, %v243_v62 }
 0x13c   :  { %v1173_v7 = vpop.eup %1172  ;;  %v220_v8 = vadd.f32 1e-05, %v204_v63  ;;  %v221_v9 = vadd.f32 1e-05, %v205_v2  ;;  %1119 = vmatprep.mubr.msk.bf16.mxu0 %vm45_vm0, %v299_v3  ;;  %v244_v45 = vmul.f32 %v1171_v4, %v1427_v55  ;;  %v1159_v4 = vld [vmem:[%s2149_s5] sm:$0xff]  }
 0x13d   :  { %v190_v12 = vpop.xlane.xlu1 %189  ;;  %v286_v13 = vadd.f32 %v1513_v24, %v264_v5  ;;  %v245_v14 = vmul.f32 %v1173_v7, %v1436_v0  ;;  %v287_v16 = vadd.f32 %v1513_v24, %v265_v6 }
 0x13e   :  { %1186 = vrsqrt.f32 %v220_v8  ;;  %v206_v15 = vmul.f32 0.03125, %v190_v12  ;;  %v266_v18 = vmul.f32 %v1506_v32, %v244_v45 }
 0x13f   :  { %v1175_v19 = vpop.eup %1174  ;;  %1188 = vrsqrt.f32 %v221_v9  ;;  %v300_v22 = vpack.c.bf16 %v286_v13, %v285_v54  ;;  %v267_v31 = vmul.f32 %v1506_v32, %v245_v14 }
 0x140   :  { %v1177_v26 = vpop.eup %1176  ;;  %v222_v27 = vadd.f32 1e-05, %v206_v15  ;;  %v288_v55 = vadd.f32 %v1513_v24, %v266_v18  ;;  %v246_v30 = vmul.f32 %v1175_v19, %v1439_v1 }
 0x141   :  { %1120 = vmatmul.mubr.msk.bf16.vlgmr.msra.gmra.mxu0 %vm45_vm0, %v300_v22  ;;  %v247_v0 = vmul.f32 %v1177_v26, %v1448_v10  ;;  %v289_v39 = vadd.f32 %v1513_v24, %v267_v31 }
 0x142   :  { %1190 = vrsqrt.f32 %v222_v27  ;;  %v301_v33 = vpack.c.bf16 %v288_v55, %v287_v16  ;;  %v268_v34 = vmul.f32 %v1506_v32, %v246_v30 }
 0x143   :  { %v1179_v20 = vpop.eup %1178  ;;  %v269_v41 = vmul.f32 %v1506_v32, %v247_v0 }
 0x144   :  { %v1181_v38 = vpop.eup %1180  ;;  %1123 = vmatprep.mubr.msk.bf16.mxu0 %vm45_vm0, %v301_v33  ;;  %v290_v40 = vadd.f32 %v1513_v24, %v268_v34  ;;  %v248_v1 = vmul.f32 %v1179_v20, %v1451_v11 }
 0x145   :  { %v249_v42 = vmul.f32 %v1181_v38, %v1460_v23  ;;  %v291_v36 = vadd.f32 %v1513_v24, %v269_v41 }
 0x146   :  { %v302_v43 = vpack.c.bf16 %v290_v40, %v289_v39  ;;  %v270_v10 = vmul.f32 %v1506_v32, %v248_v1 }
 0x147   :  { %v1183_v46 = vpop.eup %1182  ;;  %v271_v51 = vmul.f32 %v1506_v32, %v249_v42 }
 0x148   :  { %v1185_v48 = vpop.eup %1184  ;;  %v292_v49 = vadd.f32 %v1513_v24, %v270_v10  ;;  %v250_v50 = vmul.f32 %v1183_v46, %v1463_v17 }
 0x149   :  { %1124 = vmatmul.mubr.msk.bf16.gmra.mxu0 %vm45_vm0, %v302_v43  ;;  %v251_v11 = vmul.f32 %v1185_v48, %v1472_v35  ;;  %v293_v53 = vadd.f32 %v1513_v24, %v271_v51 }
 0x14a   :  { %v303_v52 = vpack.c.bf16 %v292_v49, %v291_v36  ;;  %v272_v23 = vmul.f32 %v1506_v32, %v250_v50 }
 0x14b   :  { %v1187_v28 = vpop.eup %1186  ;;  %v273_v17 = vmul.f32 %v1506_v32, %v251_v11 }
 0x14c   :  { %v1189_v29 = vpop.eup %1188  ;;  %1127 = vmatprep.mubr.msk.bf16.mxu0 %vm45_vm0, %v303_v52  ;;  %v294_v56 = vadd.f32 %v1513_v24, %v272_v23  ;;  %v252_v57 = vmul.f32 %v1187_v28, %v1475_v21 }
 0x14d   :  { %v253_v58 = vmul.f32 %v1189_v29, %v1484_v47  ;;  %v295_v60 = vadd.f32 %v1513_v24, %v273_v17 }
 0x14e   :  { %v304_v59 = vpack.c.bf16 %v294_v56, %v293_v53  ;;  %v274_v35 = vmul.f32 %v1506_v32, %v252_v57 }
 0x14f   :  { %v1191_v44 = vpop.eup %1190  ;;  %v275_v62 = vmul.f32 %v1506_v32, %v253_v58 }
 0x150   :  { %v296_v61 = vadd.f32 %v1513_v24, %v274_v35  ;;  %v254_v37 = vmul.f32 %v1191_v44, %v1487_v25  ;;  %v1158_v25 = vld [vmem:[%s2149_s5 + $0x8] sm:$0xff]  }
 0x151   :  { %1128 = vmatmul.mubr.msk.bf16.gmra.mxu0 %vm45_vm0, %v304_v59  ;;  %v297_v47 = vadd.f32 %v1513_v24, %v275_v62  ;;  %1135 = vmatprep.subr.bf16.mxu1 %v1158_v25 }
 0x152   :  { %v305_v63 = vpack.c.bf16 %v296_v61, %v295_v60  ;;  %v276_v21 = vmul.f32 %v1506_v32, %v254_v37  ;;  %1136 = vmatpush3.bf16.msra.mxu1 %v1158_v25  ;;  %v1578_v32 = vld [vmem:[%s2150_s4] ss:$0 sm:$0xff] }
 0x153   :  { %1137 = vmatprep.subr.bf16.mxu1 %v1159_v4 }
 0x154   :  { %1131 = vmatprep.mubr.msk.bf16.mxu0 %vm45_vm0, %v305_v63  ;;  %v298_v2 = vadd.f32 %v1513_v24, %v276_v21 }
 0x156   :  { %v306_v3 = vpack.c.bf16 %v298_v2, %v297_v47  ;;  %1138 = vmatpush3.bf16.msra.mxu1 %v1159_v4 }
 0x159   :  { %1132 = vmatmul.mubr.msk.bf16.gmra.mxu0 %vm45_vm0, %v306_v3 }
 0x201   :  { %v1121_v24 = vpop.f32.mrf.mxu0 }
 0x202   :  { %v1581_v5 = vadd.f32 %v1121_v24, %v1578_v32  ;;  %v2153_v24 = vmov -1.0  }
 0x203   :  { %v388_v6 = vpop.f32.mrf.mxu0 }
 0x204   :  { %v1584_v7 = vmul.f32 0.70710677, %v1581_v5  ;;  %v389_v39 = vadd.f32 %v1578_v32, %v388_v6  ;;  %v1661_v2 = vmul.f32 0.5, %v1581_v5 }
 0x205   :  { %v1122_v8 = vpop.f32.mrf.mxu0 }
 0x206   :  { %v1587_v9 = vand.u32 2147483647, %v1584_v7  ;;  %v1590_v45 = vadd.f32 %v1122_v8, %v1578_v32  ;;  %v467_v50 = vmul.f32 0.70710677, %v389_v39  ;;  %vm485_vm1 = vcmp.ge.f32.partialorder %v1584_v7, 0.0 }
 0x207   :  { %v391_v12 = vpop.f32.mrf.mxu0  ;;  %v1664_v25 = vmul.f32 0.5, %v389_v39  ;;  %v1670_v6 = vsel %vm485_vm1, 1.0, %v2153_v24 }
 0x208   :  { %v533_v54 = vmul.f32 0.3275911, %v1587_v9  ;;  %v1594_v13 = vmul.f32 0.70710677, %v1590_v45  ;;  %v515_v56 = vand.u32 2147483647, %v467_v50  ;;  %v392_v57 = vadd.f32 %v1578_v32, %v391_v12 }
 0x209   :  { %v1125_v14 = vpop.f32.mrf.mxu0  ;;  %v741_v44 = vsub.f32 0.0, %v1587_v9  ;;  %vm483_vm2 = vcmp.ge.f32.partialorder %v467_v50, 0.0 }
 0x20a   :  { %v549_v15 = vadd.f32 1.0, %v533_v54  ;;  %v1597_v18 = vand.u32 2147483647, %v1594_v13  ;;  %v1601_v26 = vadd.f32 %v1125_v14, %v1578_v32  ;;  %v739_v37 = vsub.f32 0.0, %v515_v56 }
 0x20b   :  { %v404_v19 = vpop.f32.mrf.mxu0  ;;  %v468_v47 = vmul.f32 0.70710677, %v392_v57  ;;  %v757_v3 = vmul.f32 %v741_v44, %v1587_v9  ;;  %v531_v7 = vmul.f32 0.3275911, %v515_v56  ;;  %v1679_v5 = vsel %vm483_vm2, 1.0, %v2153_v24 }
 0x20c   :  { %1192 = vrcp.f32 %v549_v15  ;;  %v534_v22 = vmul.f32 0.3275911, %v1597_v18  ;;  %v1604_v55 = vadd.f32 %v1578_v32, %v404_v19  ;;  %v1607_v30 = vmul.f32 0.70710677, %v1601_v26 }
 0x20d   :  { %v1126_v27 = vpop.f32.mrf.mxu0  ;;  %v755_v9 = vmul.f32 %v739_v37, %v515_v56  ;;  %v1682_v14 = vmul.f32 0.5, %v1590_v45  ;;  %vm486_vm3 = vcmp.ge.f32.partialorder %v1594_v13, 0.0  ;;  %v547_v45 = vadd.f32 1.0, %v531_v7 }
 0x20e   :  { %v550_v16 = vadd.f32 1.0, %v534_v22  ;;  %v1610_v31 = vmul.f32 0.70710677, %v1604_v55  ;;  %v1613_v0 = vand.u32 2147483647, %v1607_v30  ;;  %v1616_v33 = vadd.f32 %v1126_v27, %v1578_v32 }
 0x20f   :  { %v407_v34 = vpop.f32.mrf.mxu0  ;;  %v742_v22 = vsub.f32 0.0, %v1597_v18  ;;  %v775_v27 = vmul.f32 1.442695, %v757_v3  ;;  %vm484_vm4 = vcmp.ge.f32.partialorder %v468_v47, 0.0  ;;  %vm489_vm5 = vcmp.ge.f32.partialorder %v1607_v30, 0.0 }
 0x210   :  { %1194 = vrcp.f32 %v550_v16  ;;  %v537_v20 = vmul.f32 0.3275911, %v1613_v0  ;;  %v1620_v38 = vand.u32 2147483647, %v1610_v31  ;;  %v1624_v40 = vmul.f32 0.70710677, %v1616_v33 }
 0x211   :  { %v1627_v1 = vadd.f32 %v1578_v32, %v407_v34  ;;  %v1129_v36 = vpop.f32.mrf.mxu0  ;;  %v516_v16 = vand.u32 2147483647, %v468_v47  ;;  %vm487_vm6 = vcmp.ge.f32.partialorder %v1610_v31, 0.0 }
 0x212   :  { %v553_v41 = vadd.f32 1.0, %v537_v20  ;;  %v535_v42 = vmul.f32 0.3275911, %v1620_v38  ;;  %v1631_v43 = vand.u32 2147483647, %v1624_v40  ;;  %v1648_v17 = vadd.f32 %v1129_v36, %v1578_v32 }
 0x213   :  { %v1634_v10 = vmul.f32 0.70710677, %v1627_v1  ;;  %v420_v29 = vpop.f32.mrf.mxu0  ;;  %v771_v36 = vmul.f32 1.442695, %v755_v9  ;;  %vm490_vm7 = vcmp.ge.f32.partialorder %v1624_v40, 0.0 }
 0x214   :  { %1196 = vrcp.f32 %v553_v41  ;;  %v551_v48 = vadd.f32 1.0, %v535_v42  ;;  %v538_v51 = vmul.f32 0.3275911, %v1631_v43  ;;  %2163 = vst [vmem:[#allocation2_spill] sm:$0xff] %v1648_v17  ;;  %v1654_v60 = vadd.f32 %v1578_v32, %v420_v29 }
 0x215   :  { %v1641_v11 = vand.u32 2147483647, %v1634_v10  ;;  %v1658_v62 = vmul.f32 0.70710677, %v1648_v17  ;;  %v1130_v63 = vpop.f32.mrf.mxu0  ;;  %v1696_v42 = vmul.f32 0.5, %v392_v57  ;;  %v740_v29 = vsub.f32 0.0, %v516_v16 }
 0x216   :  { %1198 = vrcp.f32 %v551_v48  ;;  %v554_v23 = vadd.f32 1.0, %v538_v51  ;;  %v1667_v4 = vmul.f32 0.70710677, %v1654_v60  ;;  %v1674_v12 = vadd.f32 %v1130_v63, %v1578_v32 }
 0x217   :  { %v536_v28 = vmul.f32 0.3275911, %v1641_v11  ;;  %v1685_v15 = vand.u32 2147483647, %v1658_v62  ;;  %v756_v7 = vmul.f32 %v740_v29, %v516_v16  ;;  %vm488_vm8 = vcmp.ge.f32.partialorder %v1634_v10, 0.0 }
 0x218   :  { %1200 = vrcp.f32 %v554_v23  ;;  %2164 = vst [vmem:[#allocation3_spill] sm:$0xff] %v1674_v12  ;;  %v1692_v20 = vand.u32 2147483647, %v1667_v4  ;;  %v1699_v48 = vmul.f32 0.70710677, %v1674_v12  ;;  %vm491_vm9 = vcmp.ge.f32.partialorder %v1667_v4, 0.0 }
 0x219   :  { %v1636_v46 = vpop.eup %1192  ;;  %v552_v35 = vadd.f32 1.0, %v536_v28  ;;  %v541_v50 = vmul.f32 0.3275911, %v1685_v15  ;;  %v532_v23 = vmul.f32 0.3275911, %v516_v16  ;;  %vm493_vm12 = vcmp.ge.f32.partialorder %v1658_v62, 0.0 }
 0x21a   :  { %v597_v49 = vmul.f32 1.0614054, %v1636_v46  ;;  %v539_v57 = vmul.f32 0.3275911, %v1692_v20  ;;  %vm494_vm11 = vcmp.ge.f32.partialorder %v1699_v48, 0.0 }
 0x21b   :  { %1202 = vrcp.f32 %v552_v35  ;;  %v1714_v35 = vand.u32 2147483647, %v1699_v48  ;;  %v548_v3 = vadd.f32 1.0, %v532_v23  ;;  %v1739_v23 = vmul.f32 0.5, %v1604_v55 }
 0x21c   :  { %v613_v52 = vadd.f32 -1.4531521, %v597_v49  ;;  %1204 = vpow2.f32 %v775_v27  ;;  %v555_v9 = vadd.f32 1.0, %v539_v57  ;;  %v423_v27 = vpop.f32.mrf.mxu0 }
 0x21d   :  { %v1644_v53 = vpop.eup %1194  ;;  %1206 = vrcp.f32 %v547_v45  ;;  %v743_v45 = vsub.f32 0.0, %v1620_v38 }
 0x21e   :  { %v629_v58 = vmul.f32 %v1636_v46, %v613_v52  ;;  %v598_v59 = vmul.f32 1.0614054, %v1644_v53  ;;  %v758_v52 = vmul.f32 %v742_v22, %v1597_v18  ;;  %1208 = vpow2.f32 %v771_v36 }
 0x21f   :  { %v1717_v18 = vsel %vm484_vm4, 1.0, %v2153_v24  ;;  %v542_v22 = vmul.f32 0.3275911, %v1714_v35 }
 0x220   :  { %v614_v61 = vadd.f32 -1.4531521, %v598_v59  ;;  %v645_v21 = vadd.f32 1.4214138, %v629_v58  ;;  %v1710_v58 = vsel %vm486_vm3, 1.0, %v2153_v24 }
 0x221   :  { %v1676_v54 = vpop.eup %1196  ;;  %v777_v63 = vmul.f32 1.442695, %v758_v52  ;;  %v558_v29 = vadd.f32 1.0, %v542_v22 }
 0x222   :  { %v630_v8 = vmul.f32 %v1644_v53, %v614_v61  ;;  %v661_v19 = vmul.f32 %v1636_v46, %v645_v21  ;;  %v601_v34 = vmul.f32 1.0614054, %v1676_v54  ;;  %v557_v61 = vadd.f32 1.0, %v541_v50 }
 0x223   :  { %v1694_v39 = vpop.eup %1198  ;;  %v1721_v21 = vmul.f32 0.5, %v1601_v26  ;;  %v745_v26 = vsub.f32 0.0, %v1613_v0 }
 0x224   :  { %v646_v41 = vadd.f32 1.4214138, %v630_v8  ;;  %v599_v49 = vmul.f32 1.0614054, %v1694_v39  ;;  %v677_v51 = vadd.f32 -0.28449672, %v661_v19  ;;  %1210 = vrcp.f32 %v557_v61 }
 0x225   :  { %v1704_v28 = vpop.eup %1200  ;;  %v617_v56 = vadd.f32 -1.4531521, %v601_v34  ;;  %1212 = vpow2.f32 %v777_v63  ;;  %v761_v57 = vmul.f32 %v745_v26, %v1613_v0 }
 0x226   :  { %v662_v59 = vmul.f32 %v1644_v53, %v646_v41  ;;  %v615_v44 = vadd.f32 -1.4531521, %v599_v49  ;;  %v693_v37 = vmul.f32 %v1636_v46, %v677_v51  ;;  %v602_v13 = vmul.f32 1.0614054, %v1704_v28 }
 0x227   :  { %v633_v8 = vmul.f32 %v1676_v54, %v617_v56  ;;  %v773_v49 = vmul.f32 1.442695, %v756_v7  ;;  %1214 = vrcp.f32 %v555_v9  ;;  %v1735_v51 = vadd.f32 %v1578_v32, %v423_v27 }
 0x228   :  { %v1724_v47 = vpop.eup %1202  ;;  %v678_v19 = vadd.f32 -0.28449672, %v662_v59  ;;  %v631_v34 = vmul.f32 %v1694_v39, %v615_v44  ;;  %v709_v41 = vadd.f32 0.2548296, %v693_v37  ;;  %v618_v16 = vadd.f32 -1.4531521, %v602_v13 }
 0x229   :  { %v600_v36 = vmul.f32 1.0614054, %v1724_v47  ;;  %v649_v50 = vadd.f32 1.4214138, %v633_v8  ;;  %1216 = vrcp.f32 %v548_v3  ;;  %v1744_v56 = vsel %vm489_vm5, 1.0, %v2153_v24  ;;  %v1205_v3 = vpop.eup %1204 }
 0x22a   :  { %v694_v52 = vmul.f32 %v1644_v53, %v678_v19  ;;  %v1750_v59 = vsel %vm487_vm6, 1.0, %v2153_v24  ;;  %v647_v44 = vadd.f32 1.4214138, %v631_v34  ;;  %v725_v61 = vmul.f32 %v1636_v46, %v709_v41 }
 0x22b   :  { %v759_v37 = vmul.f32 %v743_v45, %v1620_v38  ;;  %v634_v55 = vmul.f32 %v1704_v28, %v618_v16  ;;  %v616_v63 = vadd.f32 -1.4531521, %v600_v36  ;;  %1218 = vpow2.f32 %v773_v49  ;;  %v1764_v38 = vpop.eup %1206 }
 0x22c   :  { %v665_v30 = vmul.f32 %v1676_v54, %v649_v50  ;;  %v746_v13 = vsub.f32 0.0, %v1631_v43  ;;  %v1758_v0 = vmul.f32 0.70710677, %v1735_v51  ;;  %v710_v31 = vadd.f32 0.2548296, %v694_v52  ;;  %v1771_v22 = vpop.eup %1208 }
 0x22d   :  { %v1761_v7 = vmul.f32 0.5, %v1616_v33  ;;  %1220 = vrcp.f32 %v558_v29  ;;  %v783_v46 = vmul.f32 1.442695, %v761_v57  ;;  %v663_v8 = vmul.f32 %v1694_v39, %v647_v44  ;;  %v1133_v57 = vpop.f32.mrf.mxu0 }
 0x22e   :  { %v1768_v9 = vmul.f32 0.5, %v1627_v1  ;;  %v744_v19 = vsub.f32 0.0, %v1641_v11  ;;  %v805_v27 = vmul.f32 %v1205_v3, %v725_v61  ;;  %v779_v26 = vmul.f32 1.442695, %v759_v37 }
 0x22f   :  { %v650_v34 = vadd.f32 1.4214138, %v634_v55  ;;  %v632_v33 = vmul.f32 %v1724_v47, %v616_v63  ;;  %v681_v45 = vadd.f32 -0.28449672, %v665_v30  ;;  %v762_v41 = vmul.f32 %v746_v13, %v1631_v43 }
 0x230   :  { %v749_v16 = vsub.f32 0.0, %v1685_v15  ;;  %v1777_v36 = vand.u32 2147483647, %v1758_v0  ;;  %v726_v1 = vmul.f32 %v1644_v53, %v710_v31  ;;  %v1783_v49 = vsel %vm490_vm7, 1.0, %v2153_v24 }
 0x231   :  { %v747_v50 = vsub.f32 0.0, %v1692_v20  ;;  %1222 = vpow2.f32 %v783_v46  ;;  %v679_v52 = vadd.f32 -0.28449672, %v663_v8  ;;  %v760_v43 = vmul.f32 %v744_v19, %v1641_v11  ;;  %v1789_v44 = vpop.eup %1210 }
 0x232   :  { %v540_v29 = vmul.f32 0.3275911, %v1777_v36  ;;  %v821_v61 = vsub.f32 1.0, %v805_v27  ;;  %1224 = vpow2.f32 %v779_v26  ;;  %v666_v53 = vmul.f32 %v1704_v28, %v650_v34  ;;  %v1213_v37 = vpop.eup %1212 }
 0x233   :  { %v648_v40 = vadd.f32 1.4214138, %v632_v33  ;;  %v697_v55 = vmul.f32 %v1676_v54, %v681_v45  ;;  %v785_v10 = vmul.f32 1.442695, %v762_v41  ;;  %v1794_v63 = vsel %vm488_vm8, 1.0, %v2153_v24 }
 0x234   :  { %v765_v30 = vmul.f32 %v749_v16, %v1685_v15  ;;  %v1797_v11 = vpop.eup %1214  ;;  %v806_v13 = vmul.f32 %v1213_v37, %v726_v1  ;;  %v763_v3 = vmul.f32 %v747_v50, %v1692_v20  ;;  %v556_v31 = vadd.f32 1.0, %v540_v29  ;;  %v436_v20 = vpop.f32.mrf.mxu0 }
 0x235   :  { %v1801_v46 = vadd.f32 %v1133_v57, %v1578_v32  ;;  %v695_v19 = vmul.f32 %v1694_v39, %v679_v52  ;;  %v781_v27 = vmul.f32 1.442695, %v760_v43  ;;  %v605_v26 = vmul.f32 1.0614054, %v1789_v44 }
 0x236   :  { %v1803_v8 = vpop.eup %1216  ;;  %v750_v34 = vsub.f32 0.0, %v1714_v35  ;;  %v837_v15 = vmul.f32 %v821_v61, %v1670_v6  ;;  %v682_v33 = vadd.f32 -0.28449672, %v666_v53  ;;  %v664_v45 = vmul.f32 %v1724_v47, %v648_v40 }
 0x237   :  { %2165 = vst [vmem:[#allocation4_spill] sm:$0xff] %v1801_v46  ;;  %1226 = vrcp.f32 %v556_v31  ;;  %v713_v41 = vadd.f32 0.2548296, %v697_v55  ;;  %v791_v16 = vmul.f32 1.442695, %v765_v30  ;;  %v822_v52 = vsub.f32 1.0, %v806_v13 }
 0x238   :  { %1228 = vpow2.f32 %v785_v10  ;;  %v603_v1 = vmul.f32 1.0614054, %v1797_v11  ;;  %v1811_v50 = vpop.eup %1218  ;;  %v787_v43 = vmul.f32 1.442695, %v763_v3  ;;  %v1815_v29 = vmul.f32 0.70710677, %v1801_v46 }
 0x239   :  { %v711_v57 = vadd.f32 0.2548296, %v695_v19  ;;  %v621_v61 = vadd.f32 -1.4531521, %v605_v26  ;;  %v766_v53 = vmul.f32 %v750_v34, %v1714_v35  ;;  %v1821_v40 = vadd.f32 %v1578_v32, %v436_v20  ;;  %v1134_v34 = vpop.f32.mrf.mxu0 }
 0x23a   :  { %2166 = vst [vmem:[#allocation5_spill] sm:$0xff] %v1815_v29  ;;  %v1817_v6 = vpop.eup %1220  ;;  %v853_v37 = vadd.f32 1.0, %v837_v15  ;;  %v698_v55 = vmul.f32 %v1704_v28, %v682_v33  ;;  %v680_v10 = vadd.f32 -0.28449672, %v664_v45  ;;  %1230 = vpow2.f32 %v781_v27 }
 0x23b   :  { %2167 = vst [vmem:[#allocation6_spill] sm:$0xff] %v1821_v40  ;;  %v729_v4 = vmul.f32 %v1676_v54, %v713_v41  ;;  %1232 = vpow2.f32 %v791_v16  ;;  %v1826_v30 = vsel %vm491_vm9, 1.0, %v2153_v24  ;;  %v619_v13 = vadd.f32 -1.4531521, %v603_v1 }
 0x23c   :  { %v838_v3 = vmul.f32 %v822_v52, %v1710_v58  ;;  %1234 = vpow2.f32 %v787_v43  ;;  %v606_v35 = vmul.f32 1.0614054, %v1817_v6  ;;  %v1831_v31 = vand.u32 2147483647, %v1815_v29 }
 0x23d   :  { %v727_v19 = vmul.f32 %v1694_v39, %v711_v57  ;;  %v637_v26 = vmul.f32 %v1789_v44, %v621_v61  ;;  %v793_v27 = vmul.f32 1.442695, %v766_v53  ;;  %v1836_v54 = vmul.f32 0.70710677, %v1821_v40 }
 0x23e   :  { %v1223_v15 = vpop.eup %1222  ;;  %v1839_v33 = vmul.f32 %v853_v37, %v1661_v2  ;;  %v714_v58 = vadd.f32 0.2548296, %v698_v55  ;;  %v696_v45 = vmul.f32 %v1724_v47, %v680_v10  ;;  %v545_v20 = vmul.f32 0.3275911, %v1831_v31 }
 0x23f   :  { %v1225_v41 = vpop.eup %1224  ;;  %v809_v16 = vmul.f32 %v1223_v15, %v729_v4  ;;  %v635_v39 = vmul.f32 %v1797_v11, %v619_v13  ;;  %v748_v1 = vsub.f32 0.0, %v1777_v36  ;;  %v1846_v52 = vand.u32 2147483647, %v1836_v54  ;;  %v439_v13 = vpop.f32.mrf.mxu0 }
 0x240   :  { %v854_v43 = vadd.f32 1.0, %v838_v3  ;;  %v622_v57 = vadd.f32 -1.4531521, %v606_v35  ;;  %v561_v61 = vadd.f32 1.0, %v545_v20  ;;  %v1849_v2 = vadd.f32 %v1134_v34, %v1578_v32 }
 0x241   :  { %v807_v53 = vmul.f32 %v1225_v41, %v727_v19  ;;  %v653_v37 = vadd.f32 1.4214138, %v637_v26  ;;  %1236 = vpow2.f32 %v793_v27  ;;  %v543_v55 = vmul.f32 0.3275911, %v1846_v52 }
 0x242   :  { %2168 = vst [vmem:[#allocation7_spill] sm:$0xff] %v1849_v2  ;;  %v730_v10 = vmul.f32 %v1704_v28, %v714_v58  ;;  %v712_v4 = vadd.f32 0.2548296, %v696_v45  ;;  %vm492_vm10 = vcmp.ge.f32.partialorder %v1758_v0, 0.0  ;;  %1238 = vrcp.f32 %v561_v61 }
 0x243   :  { %v825_v3 = vsub.f32 1.0, %v809_v16  ;;  %v651_v35 = vadd.f32 1.4214138, %v635_v39  ;;  %v764_v20 = vmul.f32 %v748_v1, %v1777_v36  ;;  %v559_v34 = vadd.f32 1.0, %v543_v55 }
 0x244   :  { %v1854_v15 = vpop.eup %1226  ;;  %v1858_v19 = vmul.f32 %v854_v43, %v1682_v14  ;;  %v638_v26 = vmul.f32 %v1817_v6, %v622_v57  ;;  %v1863_v27 = vmul.f32 0.70710677, %v1849_v2  ;;  %v823_v58 = vsub.f32 1.0, %v807_v53 }
 0x245   :  { %v1229_v24 = vpop.eup %1228  ;;  %v604_v28 = vmul.f32 1.0614054, %v1854_v15  ;;  %v669_v45 = vmul.f32 %v1789_v44, %v653_v37  ;;  %1240 = vrcp.f32 %v559_v34  ;;  %v1867_v41 = vadd.f32 %v1578_v32, %v439_v13 }
 0x246   :  { %v810_v36 = vmul.f32 %v1229_v24, %v730_v10  ;;  %v728_v16 = vmul.f32 %v1724_v47, %v712_v4  ;;  %v1871_v14 = vand.u32 2147483647, %v1863_v27  ;;  %v1874_v43 = vmul.f32 %v825_v3, %v1744_v56 }
 0x247   :  { %2169 = vst [vmem:[#allocation8_spill] sm:$0xff] %v1867_v41  ;;  %v620_v39 = vadd.f32 -1.4531521, %v604_v28  ;;  %v1231_v1 = vpop.eup %1230  ;;  %v667_v57 = vmul.f32 %v1797_v11, %v651_v35  ;;  %v2170_v61 = vmov -1.0   ;;  %v789_v32 = vmul.f32 1.442695, %v764_v20 }
 0x248   :  { %v1880_v53 = vsel %vm492_vm10, 1.0, %v2170_v61  ;;  %v1882_v37 = vpop.eup %1232  ;;  %v654_v24 = vadd.f32 1.4214138, %v638_v26  ;;  %v546_v55 = vmul.f32 0.3275911, %v1871_v14  ;;  %v839_v4 = vmul.f32 %v823_v58, %v1750_v59 }
 0x249   :  { %v636_v47 = vmul.f32 %v1854_v15, %v620_v39  ;;  %v1887_v10 = vmul.f32 0.70710677, %v1867_v41  ;;  %v1889_v56 = vpop.eup %1234  ;;  %v685_v13 = vadd.f32 -0.28449672, %v669_v45  ;;  %v595_v0 = vmul.f32 1.0614054, %v1764_v38 }
 0x24a   :  { %v596_v3 = vmul.f32 1.0614054, %v1803_v8  ;;  %v826_v35 = vsub.f32 1.0, %v810_v36  ;;  %v808_v20 = vmul.f32 %v1231_v1, %v728_v16  ;;  %v562_v26 = vadd.f32 1.0, %v546_v55 }
 0x24b   :  { %2171 = vst [vmem:[#allocation9_spill] sm:$0xff] %v1887_v10  ;;  %v652_v34 = vadd.f32 1.4214138, %v636_v47  ;;  %v683_v28 = vadd.f32 -0.28449672, %v667_v57  ;;  %1242 = vpow2.f32 %v789_v32  ;;  %v670_v2 = vmul.f32 %v1817_v6, %v654_v24 }
 0x24c   :  { %v1895_v39 = vand.u32 2147483647, %v1887_v10  ;;  %v611_v46 = vadd.f32 -1.4531521, %v595_v0  ;;  %1244 = vrcp.f32 %v562_v26  ;;  %v612_v59 = vadd.f32 -1.4531521, %v596_v3 }
 0x24d   :  { %v668_v41 = vmul.f32 %v1854_v15, %v652_v34  ;;  %v1899_v58 = vadd.f32 1.0, %v839_v4  ;;  %v701_v45 = vmul.f32 %v1789_v44, %v685_v13  ;;  %v1907_v57 = vmul.f32 %v826_v35, %v1783_v49 }
 0x24e   :  { %v544_v36 = vmul.f32 0.3275911, %v1895_v39  ;;  %v627_v16 = vmul.f32 %v1764_v38, %v611_v46  ;;  %v1904_v1 = vpop.eup %1236  ;;  %v824_v32 = vsub.f32 1.0, %v808_v20  ;;  %v628_v24 = vmul.f32 %v1803_v8, %v612_v59 }
 0x24f   :  { %v684_v47 = vadd.f32 -0.28449672, %v668_v41  ;;  %v1910_v55 = vpop.eup %1238  ;;  %v699_v4 = vmul.f32 %v1797_v11, %v683_v28  ;;  %v751_v0 = vsub.f32 0.0, %v1846_v52  ;;  %v686_v34 = vadd.f32 -0.28449672, %v670_v2 }
 0x250   :  { %v560_v13 = vadd.f32 1.0, %v544_v36  ;;  %v643_v3 = vadd.f32 1.4214138, %v627_v16  ;;  %v609_v26 = vmul.f32 1.0614054, %v1910_v55  ;;  %v753_v35 = vsub.f32 0.0, %v1831_v31 }
 0x251   :  { %v700_v46 = vmul.f32 %v1854_v15, %v684_v47  ;;  %v644_v40 = vadd.f32 1.4214138, %v628_v24  ;;  %v717_v49 = vadd.f32 0.2548296, %v701_v45  ;;  %v754_v17 = vsub.f32 0.0, %v1871_v14 }
 0x252   :  { %1246 = vrcp.f32 %v560_v13  ;;  %v659_v41 = vmul.f32 %v1764_v38, %v643_v3  ;;  %v1918_v20 = vpop.eup %1240  ;;  %v625_v28 = vadd.f32 -1.4531521, %v609_v26  ;;  %v840_v2 = vmul.f32 %v824_v32, %v1794_v63 }
 0x253   :  { %v716_v59 = vadd.f32 0.2548296, %v700_v46  ;;  %v660_v36 = vmul.f32 %v1803_v8, %v644_v40  ;;  %v607_v16 = vmul.f32 1.0614054, %v1918_v20  ;;  %v767_v47 = vmul.f32 %v751_v0, %v1846_v52 }
 0x254   :  { %v675_v45 = vadd.f32 -0.28449672, %v659_v41  ;;  %v715_v24 = vadd.f32 0.2548296, %v699_v4  ;;  %v702_v13 = vmul.f32 %v1817_v6, %v686_v34  ;;  %v641_v3 = vmul.f32 %v1910_v55, %v625_v28 }
 0x255   :  { %v676_v10 = vadd.f32 -0.28449672, %v660_v36  ;;  %v733_v46 = vmul.f32 %v1789_v44, %v717_v49  ;;  %v769_v26 = vmul.f32 %v753_v35, %v1831_v31  ;;  %v623_v29 = vadd.f32 -1.4531521, %v607_v16 }
 0x256   :  { %v691_v40 = vmul.f32 %v1764_v38, %v675_v45  ;;  %v732_v63 = vmul.f32 %v1854_v15, %v716_v59  ;;  %v657_v32 = vadd.f32 1.4214138, %v641_v3  ;;  %v770_v12 = vmul.f32 %v754_v17, %v1871_v14 }
 0x257   :  { %v692_v52 = vmul.f32 %v1803_v8, %v676_v10  ;;  %v639_v4 = vmul.f32 %v1918_v20, %v623_v29  ;;  %v795_v0 = vmul.f32 1.442695, %v767_v47  ;;  %v752_v34 = vsub.f32 0.0, %v1895_v39 }
 0x258   :  { %v707_v41 = vadd.f32 0.2548296, %v691_v40  ;;  %v1243_v28 = vpop.eup %1242  ;;  %v856_v44 = vadd.f32 1.0, %v840_v2  ;;  %v731_v31 = vmul.f32 %v1797_v11, %v715_v24  ;;  %v718_v49 = vadd.f32 0.2548296, %v702_v13 }
 0x259   :  { %v708_v35 = vadd.f32 0.2548296, %v692_v52  ;;  %v1936_v36 = vpop.eup %1244  ;;  %v673_v15 = vmul.f32 %v1910_v55, %v657_v32  ;;  %v799_v59 = vmul.f32 1.442695, %v769_v26  ;;  %v655_v17 = vadd.f32 1.4214138, %v639_v4 }
 0x25a   :  { %v723_v14 = vmul.f32 %v1764_v38, %v707_v41  ;;  %v812_v10 = vmul.f32 %v1243_v28, %v732_v63  ;;  %v610_v29 = vmul.f32 1.0614054, %v1936_v36  ;;  %v801_v16 = vmul.f32 1.442695, %v770_v12 }
 0x25b   :  { %v724_v47 = vmul.f32 %v1803_v8, %v708_v35  ;;  %v671_v2 = vmul.f32 %v1918_v20, %v655_v17  ;;  %1248 = vpow2.f32 %v795_v0  ;;  %v768_v11 = vmul.f32 %v752_v34, %v1895_v39 }
 0x25c   :  { %v803_v45 = vmul.f32 %v1771_v22, %v723_v14  ;;  %v811_v24 = vmul.f32 %v1889_v56, %v731_v31  ;;  %v734_v13 = vmul.f32 %v1817_v6, %v718_v49  ;;  %v626_v3 = vadd.f32 -1.4531521, %v610_v29 }
 0x25d   :  { %v804_v38 = vmul.f32 %v1811_v50, %v724_v47  ;;  %v689_v26 = vadd.f32 -0.28449672, %v673_v15  ;;  %1250 = vpow2.f32 %v799_v59  ;;  %v687_v40 = vadd.f32 -0.28449672, %v671_v2 }
 0x25e   :  { %v819_v12 = vsub.f32 1.0, %v803_v45  ;;  %v828_v8 = vsub.f32 1.0, %v812_v10  ;;  %v642_v32 = vmul.f32 %v1936_v36, %v626_v3  ;;  %1252 = vpow2.f32 %v801_v16 }
 0x25f   :  { %v1948_v63 = vpop.eup %1246  ;;  %v820_v39 = vsub.f32 1.0, %v804_v38  ;;  %v703_v22 = vmul.f32 %v1918_v20, %v687_v40  ;;  %v797_v56 = vmul.f32 1.442695, %v768_v11  ;;  %v871_v52 = vmul.f32 %v1899_v58, %v1739_v23 }
 0x260   :  { %v608_v6 = vmul.f32 1.0614054, %v1948_v63  ;;  %v835_v50 = vmul.f32 %v819_v12, %v1679_v5  ;;  %v827_v4 = vsub.f32 1.0, %v811_v24  ;;  %v658_v0 = vadd.f32 1.4214138, %v642_v32 }
 0x261   :  { %v836_v34 = vmul.f32 %v820_v39, %v1717_v18  ;;  %v705_v41 = vmul.f32 %v1910_v55, %v689_v26  ;;  %v719_v28 = vadd.f32 0.2548296, %v703_v22  ;;  %v872_v35 = vmul.f32 %v856_v44, %v1768_v9 }
 0x262   :  { %v624_v31 = vadd.f32 -1.4531521, %v608_v6  ;;  %v851_v49 = vadd.f32 1.0, %v835_v50  ;;  %v844_v15 = vmul.f32 %v828_v8, %v1880_v53  ;;  %v674_v5 = vmul.f32 %v1936_v36, %v658_v0 }
 0x263   :  { %v852_v59 = vadd.f32 1.0, %v836_v34  ;;  %v813_v23 = vmul.f32 %v1882_v37, %v733_v46  ;;  %v814_v58 = vmul.f32 %v1904_v1, %v734_v13  ;;  %1254 = vpow2.f32 %v797_v56 }
 0x264   :  { %v640_v17 = vmul.f32 %v1948_v63, %v624_v31  ;;  %v843_v18 = vmul.f32 %v827_v4, %v1826_v30  ;;  %v690_v14 = vadd.f32 -0.28449672, %v674_v5  ;;  %v867_v10 = vmul.f32 %v851_v49, %v1664_v25 }
 0x265   :  { %v868_v29 = vmul.f32 %v852_v59, %v1696_v42  ;;  %v858_v9 = vadd.f32 1.0, %v1907_v57  ;;  %v721_v53 = vadd.f32 0.2548296, %v705_v41  ;;  %v735_v44 = vmul.f32 %v1918_v20, %v719_v28  ;;  %v2172_v41 = vld [vmem:[#allocation3_spill] sm:$0xff]  ;;  %v2173_v28 = vld [vmem:[#allocation5_spill] sm:$0xff] }
 0x266   :  { %v656_v16 = vadd.f32 1.4214138, %v640_v17  ;;  %v885_v47 = vpack.c.bf16 %v872_v35, %v871_v52  ;;  %v860_v37 = vadd.f32 1.0, %v844_v15  ;;  %v706_v1 = vmul.f32 %v1936_v36, %v690_v14  ;;  %v2174_v35 = vld [vmem:[#allocation9_spill] sm:$0xff] }
 0x267   :  { %v883_v46 = vpack.c.bf16 %v868_v29, %v867_v10  ;;  %v884_v2 = vpack.c.bf16 %v1858_v19, %v1839_v33  ;;  %v830_v30 = vsub.f32 1.0, %v814_v58  ;;  %v460_v11 = vmul.f32 0.5, %v1735_v51 }
 0x268   :  { %v672_v25 = vmul.f32 %v1948_v63, %v656_v16  ;;  %v1249_v42 = vpop.eup %1248  ;;  %v857_v57 = vadd.f32 1.0, %v1874_v43  ;;  %v829_v45 = vsub.f32 1.0, %v813_v23  ;;  %v859_v24 = vadd.f32 1.0, %v843_v18 }
 0x269   :  { %v722_v20 = vadd.f32 0.2548296, %v706_v1  ;;  %1139 = vmatprep.mubr.msk.bf16.mxu1 %vm45_vm0, %v883_v46  ;;  %v459_v13 = vmul.f32 0.5, %v1654_v60  ;;  %v737_v3 = vmul.f32 %v1910_v55, %v721_v53  ;;  %v815_v38 = vmul.f32 %v1249_v42, %v735_v44  ;;  %v2176_v53 = vld [vmem:[#allocation6_spill] sm:$0xff] }
 0x26a   :  { %v688_v26 = vadd.f32 -0.28449672, %v672_v25  ;;  %1140 = vmatmul.mubr.msk.bf16.vlgmr.msra.gmra.mxu1 %vm45_vm0, %v884_v2  ;;  %v1251_v33 = vpop.eup %1250  ;;  %v874_v51 = vmul.f32 %v858_v9, %v1761_v7  ;;  %v510_v19 = vsel %vm494_vm11, 1.0, %v2170_v61  ;;  %v876_v43 = vmul.f32 %v860_v37, %v460_v11  ;;  %v2177_v37 = vld [vmem:[#allocation8_spill] sm:$0xff]  ;;  %v2178_v11 = vld [vmem:[#allocation7_spill] sm:$0xff] }
 0x26b   :  { %v738_v40 = vmul.f32 %v1936_v36, %v722_v20  ;;  %1143 = vmatprep.mubr.msk.bf16.mxu1 %vm45_vm0, %v885_v47  ;;  %v1253_v12 = vpop.eup %1252  ;;  %v509_v60 = vsel %vm493_vm12, 1.0, %v2170_v61  ;;  %v846_v55 = vmul.f32 %v830_v30, %v510_v19  ;;  %v873_v32 = vmul.f32 %v857_v57, %v1721_v21  ;;  %v2179_v57 = vld [vmem:[#allocation4_spill] sm:$0xff] }
 0x26c   :  { %v704_v8 = vmul.f32 %v1948_v63, %v688_v26  ;;  %v845_v7 = vmul.f32 %v829_v45, %v509_v60  ;;  %v875_v39 = vmul.f32 %v859_v24, %v459_v13  ;;  %v817_v48 = vmul.f32 %v1251_v33, %v737_v3  ;;  %v2015_v3 = vld [vmem:[%s2151_s6] ss:$0 sm:$0xff] }
 0x26d   :  { %v818_v22 = vmul.f32 %v1253_v12, %v738_v40  ;;  %vm495_vm13 = vcmp.ge.f32.partialorder %v1836_v54, 0.0  ;;  %v831_v6 = vsub.f32 1.0, %v815_v38  ;;  %v886_v56 = vpack.c.bf16 %v874_v51, %v873_v32  ;;  %v1256_v51 = vld [vmem:[%s2145_s0 + $0x10] sm:$0xff]  ;;  %v1257_v12 = vld [vmem:[%s2145_s0] sm:$0xff]  ;;  %v1258_v32 = vld [vmem:[%s2145_s0 + $0x18] sm:$0xff] }
 0x26e   :  { %v720_v36 = vadd.f32 0.2548296, %v704_v8  ;;  %v887_v50 = vpack.c.bf16 %v876_v43, %v875_v39  ;;  %v862_v52 = vadd.f32 1.0, %v846_v55  ;;  %vm498_vm14 = vcmp.ge.f32.partialorder %v1863_v27, 0.0 }
 0x26f   :  { %v834_v62 = vsub.f32 1.0, %v818_v22  ;;  %v861_v34 = vadd.f32 1.0, %v845_v7  ;;  %v462_v21 = vmul.f32 0.5, %v2172_v41  ;;  %vm497_vm15 = vcmp.ge.f32.partialorder %v2173_v28, 0.0  ;;  %v1262_v28 = vld [vmem:[%s2145_s0 + $0x38] sm:$0xff] }
 0x270   :  { %v736_v4 = vmul.f32 %v1948_v63, %v720_v36  ;;  %v1255_v0 = vpop.eup %1254  ;;  %v511_v31 = vsel %vm495_vm13, 1.0, %v2170_v61  ;;  %v833_v49 = vsub.f32 1.0, %v817_v48  ;;  %vm496_vm1 = vcmp.ge.f32.partialorder %v2174_v35, 0.0  ;;  %v2175_v63 = vld [vmem:[#allocation2_spill] sm:$0xff]  ;;  %v1259_v48 = vld [vmem:[%s2145_s0 + $0x8] sm:$0xff] }
 0x271   :  { %v847_v54 = vmul.f32 %v831_v6, %v511_v31  ;;  %v514_v27 = vsel %vm498_vm14, 1.0, %v2170_v61  ;;  %v461_v5 = vmul.f32 0.5, %v2175_v63  ;;  %v878_v59 = vmul.f32 %v862_v52, %v462_v21  ;;  %v1263_v35 = vld [vmem:[%s2145_s0 + $0x28] sm:$0xff] }
 0x272   :  { %v816_v15 = vmul.f32 %v1255_v0, %v736_v4  ;;  %1144 = vmatmul.mubr.msk.bf16.gmra.mxu1 %vm45_vm0, %v886_v56  ;;  %v850_v23 = vmul.f32 %v834_v62, %v514_v27  ;;  %v513_v17 = vsel %vm497_vm15, 1.0, %v2170_v61  ;;  %v512_v18 = vsel %vm496_vm1, 1.0, %v2170_v61  ;;  %v1261_v0 = vld [vmem:[%s2145_s0 + $0x20] sm:$0xff] }
 0x273   :  { %1147 = vmatprep.mubr.msk.bf16.mxu1 %vm45_vm0, %v887_v50  ;;  %v877_v14 = vmul.f32 %v861_v34, %v461_v5  ;;  %v849_v10 = vmul.f32 %v833_v49, %v513_v17  ;;  %v863_v29 = vadd.f32 1.0, %v847_v54  ;;  %v463_v44 = vmul.f32 0.5, %v2176_v53  ;;  %v1260_v50 = vld [vmem:[%s2145_s0 + $0x30] sm:$0xff]  ;;  %v1265_v17 = vld [vmem:[%s2145_s0 + $0x40] sm:$0xff] }
 0x274   :  { %v832_v58 = vsub.f32 1.0, %v816_v15  ;;  %v866_v47 = vadd.f32 1.0, %v850_v23  ;;  %v464_v1 = vmul.f32 0.5, %v2177_v37  ;;  %v466_v25 = vmul.f32 0.5, %v2178_v11  ;;  %v1264_v5 = vld [vmem:[%s2145_s0 + $0x50] sm:$0xff] }
 0x275   :  { %v888_v16 = vpack.c.bf16 %v878_v59, %v877_v14  ;;  %v865_v2 = vadd.f32 1.0, %v849_v10  ;;  %v879_v30 = vmul.f32 %v863_v29, %v463_v44  ;;  %v465_v61 = vmul.f32 0.5, %v2179_v57  ;;  %v1266_v29 = vld [vmem:[%s2145_s0 + $0x58] sm:$0xff] }
 0x276   :  { %v848_v9 = vmul.f32 %v832_v58, %v512_v18  ;;  %v882_v45 = vmul.f32 %v866_v47, %v466_v25  ;;  %v1269_v25 = vld [vmem:[%s2145_s0 + $0x60] sm:$0xff] }
 0x277   :  { %v881_v20 = vmul.f32 %v865_v2, %v465_v61 }
 0x278   :  { %v864_v46 = vadd.f32 1.0, %v848_v9 }
 0x279   :  { %v890_v13 = vpack.c.bf16 %v882_v45, %v881_v20  ;;  %v1270_v45 = vld [vmem:[%s2145_s0 + $0x78] sm:$0xff] }
 0x27a   :  { %v880_v42 = vmul.f32 %v864_v46, %v464_v1  ;;  %1148 = vmatmul.mubr.msk.bf16.gmra.mxu1 %vm45_vm0, %v888_v16  ;;  %v1267_v16 = vld [vmem:[%s2145_s0 + $0x48] sm:$0xff]  ;;  %v1268_v46 = vld [vmem:[%s2145_s0 + $0x70] sm:$0xff] }
 0x27c   :  { %v889_v24 = vpack.c.bf16 %v880_v42, %v879_v30 }
 0x27e   :  { %1151 = vmatprep.mubr.msk.bf16.mxu1 %vm45_vm0, %v889_v24 }
 0x282   :  { %1152 = vmatmul.mubr.msk.bf16.gmra.mxu1 %vm45_vm0, %v890_v13  ;;  %v1271_v13 = vld [vmem:[%s2145_s0 + $0x68] sm:$0xff] }
 0x32a   :  { %v1141_v38 = vpop.f32.mrf.mxu1 }
 0x32b   :  { %v981_v26 = vadd.f32 %v1141_v38, %v2015_v3 }
 0x32c   :  { %v972_v33 = vpop.f32.mrf.mxu1 }
 0x32d   :  { %v1037_v19 = vadd.f32 %v1256_v51, %v981_v26  ;;  %v973_v43 = vadd.f32 %v2015_v3, %v972_v33 }
 0x32e   :  { %v1142_v40 = vpop.f32.mrf.mxu1 }
 0x32f   :  { %1053 = vst.msk [vmem:[%s2152_s7 + $0x10] sm:$0xff] %vm45_vm0, %v1037_v19  ;;  %v1035_v60 = vadd.f32 %v1257_v12, %v973_v43  ;;  %v984_v55 = vadd.f32 %v1142_v40, %v2015_v3 }
 0x330   :  { %v975_v8 = vpop.f32.mrf.mxu1 }
 0x331   :  { %1051 = vst.msk [vmem:[%s2152_s7] sm:$0xff] %vm45_vm0, %v1035_v60  ;;  %v1038_v7 = vadd.f32 %v1258_v32, %v984_v55  ;;  %v976_v39 = vadd.f32 %v2015_v3, %v975_v8 }
 0x332   :  { %v1145_v22 = vpop.f32.mrf.mxu1 }
 0x333   :  { %1054 = vst.msk [vmem:[%s2152_s7 + $0x18] sm:$0xff] %vm45_vm0, %v1038_v7  ;;  %v1036_v6 = vadd.f32 %v1259_v48, %v976_v39  ;;  %v997_v36 = vadd.f32 %v1145_v22, %v2015_v3 }
 0x334   :  { %v988_v56 = vpop.f32.mrf.mxu1 }
 0x335   :  { %1052 = vst.msk [vmem:[%s2152_s7 + $0x8] sm:$0xff] %vm45_vm0, %v1036_v6  ;;  %v1041_v52 = vadd.f32 %v1260_v50, %v997_v36  ;;  %v989_v62 = vadd.f32 %v2015_v3, %v988_v56 }
 0x336   :  { %v1146_v4 = vpop.f32.mrf.mxu1 }
 0x337   :  { %1057 = vst.msk [vmem:[%s2152_s7 + $0x30] sm:$0xff] %vm45_vm0, %v1041_v52  ;;  %v1039_v34 = vadd.f32 %v1261_v0, %v989_v62  ;;  %v1000_v41 = vadd.f32 %v1146_v4, %v2015_v3 }
 0x338   :  { %v991_v21 = vpop.f32.mrf.mxu1 }
 0x339   :  { %1055 = vst.msk [vmem:[%s2152_s7 + $0x20] sm:$0xff] %vm45_vm0, %v1039_v34  ;;  %v1042_v31 = vadd.f32 %v1262_v28, %v1000_v41  ;;  %v992_v49 = vadd.f32 %v2015_v3, %v991_v21 }
 0x33a   :  { %v1149_v54 = vpop.f32.mrf.mxu1 }
 0x33b   :  { %1058 = vst.msk [vmem:[%s2152_s7 + $0x38] sm:$0xff] %vm45_vm0, %v1042_v31  ;;  %v1040_v15 = vadd.f32 %v1263_v35, %v992_v49  ;;  %v1013_v27 = vadd.f32 %v1149_v54, %v2015_v3 }
 0x33c   :  { %v1004_v63 = vpop.f32.mrf.mxu1 }
 0x33d   :  { %1056 = vst.msk [vmem:[%s2152_s7 + $0x28] sm:$0xff] %vm45_vm0, %v1040_v15  ;;  %v1045_v59 = vadd.f32 %v1264_v5, %v1013_v27  ;;  %v1005_v23 = vadd.f32 %v2015_v3, %v1004_v63 }
 0x33e   :  { %v1150_v58 = vpop.f32.mrf.mxu1 }
 0x33f   :  { %1061 = vst.msk [vmem:[%s2152_s7 + $0x50] sm:$0xff] %vm45_vm0, %v1045_v59  ;;  %v1043_v18 = vadd.f32 %v1265_v17, %v1005_v23  ;;  %v1016_v14 = vadd.f32 %v1150_v58, %v2015_v3 }
 0x340   :  { %v1007_v10 = vpop.f32.mrf.mxu1 }
 0x341   :  { %1059 = vst.msk [vmem:[%s2152_s7 + $0x40] sm:$0xff] %vm45_vm0, %v1043_v18  ;;  %v1046_v9 = vadd.f32 %v1266_v29, %v1016_v14  ;;  %v1008_v53 = vadd.f32 %v2015_v3, %v1007_v10 }
 0x342   :  { %v1153_v44 = vpop.f32.mrf.mxu1 }
 0x343   :  { %1062 = vst.msk [vmem:[%s2152_s7 + $0x58] sm:$0xff] %vm45_vm0, %v1046_v9  ;;  %v1044_v47 = vadd.f32 %v1267_v16, %v1008_v53  ;;  %v1029_v37 = vadd.f32 %v1153_v44, %v2015_v3 }
 0x344   :  { %v1020_v1 = vpop.f32.mrf.mxu1 }
 0x345   :  { %1060 = vst.msk [vmem:[%s2152_s7 + $0x48] sm:$0xff] %vm45_vm0, %v1044_v47  ;;  %v1049_v2 = vadd.f32 %v1268_v46, %v1029_v37  ;;  %v1021_v30 = vadd.f32 %v2015_v3, %v1020_v1 }
 0x346   :  { %v1154_v11 = vpop.f32.mrf.mxu1 }
 0x347   :  { %1065 = vst.msk [vmem:[%s2152_s7 + $0x70] sm:$0xff] %vm45_vm0, %v1049_v2  ;;  %v1047_v42 = vadd.f32 %v1269_v25, %v1021_v30  ;;  %v1032_v57 = vadd.f32 %v1154_v11, %v2015_v3 }
 0x348   :  { %v1023_v61 = vpop.f32.mrf.mxu1 }
 0x349   :  { %1063 = vst.msk [vmem:[%s2152_s7 + $0x60] sm:$0xff] %vm45_vm0, %v1047_v42  ;;  %v1050_v24 = vadd.f32 %v1270_v45, %v1032_v57  ;;  %v1024_v20 = vadd.f32 %v2015_v3, %v1023_v61 }
 0x34b   :  { %1066 = vst.msk [vmem:[%s2152_s7 + $0x78] sm:$0xff] %vm45_vm0, %v1050_v24  ;;  %v1048_v38 = vadd.f32 %v1271_v13, %v1024_v20 }
 0x34d   :  { %1064 = vst.msk [vmem:[%s2152_s7 + $0x68] sm:$0xff] %vm45_vm0, %v1048_v38 }

// kernel: _lambda_.28
= control target key start
LH: loop header
LB: loop body
LE: loop exit
PB: predicated region body
PF: predicated region fallthrough
CT: control target
= control target key end

     0   :  { %s641_s12 = smov 0   ;;  %s643_s13 = smov 0   ;;  %s709_s0 = inlined_call_operand.vmem [shape: bf16[8,8,8,8], index: 0, kind: input, shape index: {}]   ;;  %s710_s1 = inlined_call_operand.vmem [shape: bf16[8,8,8,8], index: 1, kind: input, shape index: {}]   ;;  %s711_s2 = inlined_call_operand.vmem [shape: bf16[8,8,8,8], index: 2, kind: input, shape index: {}]   ;;  %s712_s3 = inlined_call_operand.vmem [shape: bf16[8,8,8,8], index: 3, kind: output, shape index: {}]  }
   0x1   :  { %s645_s14 = smov 0   ;;  %s647_s15 = smov 0  }
   0x2   :  { %s649_s16 = smov 0  }
   0x3 LB: > { %s22_s17 = sadd.s32 1, %s609_s14  ;;  %s25_s18 = sadd.s32 1, %s613_s15  ;;  %s617_s16 = sphi %s649_s16, %s13_s16   ;;  %s613_s15 = sphi %s647_s15, %s716_s15   ;;  %s609_s14 = sphi %s645_s14, %s715_s14   ;;  %s605_s13 = sphi %s643_s13, %s714_s13   ;;  %s601_s12 = sphi %s641_s12, %s713_s12  }
   0x4   : > { %p23_p0 = scmp.ge.s32.totalorder %s22_s17, 8  ;;  %p504_p1 = scmp.ge.s32.totalorder %s617_s16, 1 }
   0x5   : > { %p186_p2 = scmp.lt.s32.totalorder %s617_s16, 65 }
   0x6   : > { %s718_s17 = smov (%p23_p0, %s22_s17), 0  ;;  %s720_s18 = smov (!%p23_p0, %s25_s18), %s613_s15 }
   0x7   : > { %p187_p3 = pnand %p504_p1, %p186_p2  ;;  %p27_p4 = scmp.ge.s32.totalorder %s720_s18, 8 }
   0x8   : > { %p232_p5 = scmp.lt.s32.totalorder (!%p187_p3), %s605_s13, 7  ;;  %p234_p6 = scmp.lt.s32.totalorder (!%p187_p3), %s601_s12, 7 }
   0x9   : > { %s722_s18 = smov (%p27_p4, %s720_s18), 0  ;;  %190 = sbr.rel (%p187_p3) target bundleno = 736 (0x2e0), region = 32 }
   0xe   : > { %v619_v0 = vmov 0.0   ;;  %vm620_vm0 = vmmov 0   ;;  %s724_s13 = smov (!%p232_p5, %s605_s13), 7  ;;  %s726_s12 = smov (!%p234_p6, %s601_s12), 7  ;;  %vm268_vm1 = vcmask 64512   ;;  %vm331_vm2 = vcmask 1043456  }
   0xf   : > { %521 = vmatprep.subr.bf16.mxu0 %v619_v0  ;;  %523 = vmatprep.mubr.msk.bf16.mxu0 %vm620_vm0, %v619_v0  ;;  %s505_s19 = sshll.u32 %s724_s13, 3  ;;  %vm376_vm3 = vcmask 60416  }
  0x10   : > { %527 = vmatprep.subr.bf16.mxu1 %v619_v0  ;;  %529 = vmatprep.mubr.msk.bf16.mxu1 %vm620_vm0, %v619_v0  ;;  %s237_s20 = sadd.s32 %s505_s19, %s726_s12 }
  0x11   : > { %s671_s21 = sshll.u32 %s237_s20, 2 }
  0x12   : > { %s247_s24 = scalar_lea.vmem %s710_s1, %s671_s21  ;;  %s239_s27 = scalar_lea.vmem %s709_s0, %s671_s21 }
  0x13   : > { %v266_v1 = vld [vmem:[%s247_s24] sm:$0xf]  ;;  %s255_s30 = scalar_lea.vmem %s711_s2, %s671_s21  ;;  %s263_s6 = scalar_lea.vmem %s712_s3, %s671_s21 }
  0x14   : > { %v273_v2 = vsel %vm268_vm1, %v266_v1, 0  ;;  %v265_v3 = vld [vmem:[%s239_s27] sm:$0xf] }
  0x15   : > { %522 = vmatpush3.bf16.xpose.msra.mxu0 %v273_v2  ;;  %v267_v15 = vld [vmem:[%s255_s30] sm:$0xf] }
  0x16   : > { %v333_v16 = vsel %vm331_vm2, %v267_v15, 0 }
  0x17   : > { %528 = vmatpush3.bf16.msra.mxu1 %v333_v16 }
  0x1c   : > { %524 = vmatmul.mubr.msk.bf16.vlgmr.msra.gmra.mxu0 %vm268_vm1, %v265_v3 }
  0xdc   : > { %v309_v4 = vpop.f32.mrf.mxu0 }
  0xdd   : > { %v315_v5 = vmul.f32 0.35355338, %v309_v4 }
  0xde   : > { %v525_v6 = vpop.f32.mrf.mxu0 }
  0xdf   : > { %v316_v7 = vsel %vm268_vm1, %v315_v5, -inf }
  0xe0   : > { %317 = vmax.xlane.f32.xlu0 %v316_v7  ;;  %v312_v8 = vpop.f32.mrf.mxu0 }
  0xe2   : > { %v526_v9 = vpop.f32.mrf.mxu0 }
 0x169   : > { %v318_v10 = vpop.xlane.xlu0 %317 }
 0x16a   : > { %v319_v11 = vsub.f32 %v315_v5, %v318_v10 }
 0x16c   : > { %v320_v12 = vmul.f32 1.442695, %v319_v11 }
 0x16e   : > { %575 = vpow2.f32 %v320_v12 }
 0x17b   : > { %v576_v13 = vpop.eup %575 }
 0x17c   : > { %v322_v14 = vsel %vm268_vm1, %v576_v13, 0.0 }
 0x17d   : > { %323 = vadd.xlane.f32.xlu0 %v322_v14 }
 0x206   : > { %v324_v17 = vpop.xlane.xlu0 %323 }
 0x207   : > { %577 = vrcp.f32 %v324_v17 }
 0x214   : > { %v578_v18 = vpop.eup %577 }
 0x215   : > { %v326_v19 = vmul.f32 %v578_v18, %v576_v13 }
 0x217   : > { %v327_v20 = vpack.c.bf16 %v326_v19, %v326_v19 }
 0x219   : > { %530 = vmatmul.mubr.msk.bf16.vlgmr.msra.gmra.mxu1 %vm268_vm1, %v327_v20 }
 0x2d9   : > { %v369_v21 = vpop.f32.mrf.mxu1 }
 0x2da   : > { %v375_v22 = vpack.c.bf16 %v369_v21, %v369_v21 }
 0x2db   : > { %v531_v23 = vpop.f32.mrf.mxu1 }
 0x2dc   : > { %377 = vst.msk [vmem:[%s263_s6] sm:$0xf] %vm376_vm3, %v375_v22 }
 0x2dd   : > { %v372_v24 = vpop.f32.mrf.mxu1 }
 0x2df   : > { %v532_v25 = vpop.f32.mrf.mxu1 }
 0x2e0 PF: > { %s13_s16 = sadd.s32 1, %s617_s16   ;;  %s713_s12 = smov %s609_s14 }
 0x2e1   : > { %p10_p7 = scmp.ge.s32.totalorder %s13_s16, 66   ;;  %s714_s13 = smov %s613_s15 }
 0x2e2   : > { %s715_s14 = smov %s718_s17  ;;  %s716_s15 = smov %s722_s18 }
 0x2e3   :  { %12 = sbr.rel (!%p10_p7) target bundleno = 3 (0x3), region = 68 }

// kernel: _lambda_.35
= control target key start
LH: loop header
LB: loop body
LE: loop exit
PB: predicated region body
PF: predicated region fallthrough
CT: control target
= control target key end

     0   :  { %vm43_vm0 = vcmask 261120   ;;  %vm361_vm1 = vcmask 257024   ;;  %vm579_vm2 = vcmask 523264   ;;  %s1098_s0 = inlined_call_operand.vmem [shape: f32[128,32], index: 0, kind: input, shape index: {}]   ;;  %s1099_s3 = inlined_call_operand.vmem [shape: bf16[32,64], index: 3, kind: input, shape index: {}]   ;;  %s1100_s1 = inlined_call_operand.vmem [shape: f32[1,32], index: 1, kind: input, shape index: {}]   ;;  %s1101_s2 = inlined_call_operand.vmem [shape: f32[1,32], index: 2, kind: input, shape index: {}]   ;;  %s1102_s4 = inlined_call_operand.vmem [shape: f32[1,64], index: 4, kind: input, shape index: {}]   ;;  %s1103_s5 = inlined_call_operand.vmem [shape: f32[128,64], index: 5, kind: output, shape index: {}]  }
   0x1   :  { %v25_v0 = vld [vmem:[%s1098_s0] sm:$0xff]  ;;  %v26_v2 = vld [vmem:[%s1098_s0 + $0x8] sm:$0xff]  ;;  %v27_v8 = vld [vmem:[%s1098_s0 + $0x10] sm:$0xff] }
   0x2   :  { %v33_v1 = vld [vmem:[%s1098_s0 + $0x40] sm:$0xff]  ;;  %v44_v3 = vsel %vm43_vm0, %v25_v0, 0.0  ;;  %v34_v5 = vld [vmem:[%s1098_s0 + $0x48] sm:$0xff]  ;;  %v47_v6 = vsel %vm43_vm0, %v26_v2, 0.0  ;;  %v28_v9 = vld [vmem:[%s1098_s0 + $0x18] sm:$0xff]  ;;  %v50_v10 = vsel %vm43_vm0, %v27_v8, 0.0 }
   0x3   :  { %v68_v4 = vsel %vm43_vm0, %v33_v1, 0.0  ;;  %45 = vadd.xlane.f32.xlu0 %v44_v3  ;;  %v71_v7 = vsel %vm43_vm0, %v34_v5, 0.0  ;;  %v53_v11 = vsel %vm43_vm0, %v28_v9, 0.0  ;;  %v786_v12 = vld [vmem:[%s1098_s0 + $0x50] sm:$0xff]  ;;  %v791_v13 = vld [vmem:[%s1098_s0 + $0x58] sm:$0xff]  ;;  %v800_v16 = vld [vmem:[%s1098_s0 + $0x20] sm:$0xff] }
   0x4   :  { %69 = vadd.xlane.f32.xlu1 %v68_v4  ;;  %v74_v14 = vsel %vm43_vm0, %v786_v12, 0.0  ;;  %v77_v15 = vsel %vm43_vm0, %v791_v13, 0.0  ;;  %v805_v17 = vld [vmem:[%s1098_s0 + $0x28] sm:$0xff]  ;;  %v56_v18 = vsel %vm43_vm0, %v800_v16, 0.0  ;;  %v814_v20 = vld [vmem:[%s1098_s0 + $0x60] sm:$0xff]  ;;  %v828_v24 = vld [vmem:[%s1098_s0 + $0x30] sm:$0xff] }
   0x5   :  { %v59_v19 = vsel %vm43_vm0, %v805_v17, 0.0  ;;  %v819_v21 = vld [vmem:[%s1098_s0 + $0x68] sm:$0xff]  ;;  %v80_v22 = vsel %vm43_vm0, %v814_v20, 0.0  ;;  %v833_v25 = vld [vmem:[%s1098_s0 + $0x38] sm:$0xff]  ;;  %v62_v26 = vsel %vm43_vm0, %v828_v24, 0.0  ;;  %v842_v28 = vld [vmem:[%s1098_s0 + $0x70] sm:$0xff] }
   0x6   :  { %v83_v23 = vsel %vm43_vm0, %v819_v21, 0.0  ;;  %v65_v27 = vsel %vm43_vm0, %v833_v25, 0.0  ;;  %v847_v29 = vld [vmem:[%s1098_s0 + $0x78] sm:$0xff]  ;;  %v86_v30 = vsel %vm43_vm0, %v842_v28, 0.0 }
   0x7   :  { %48 = vadd.xlane.f32.xlu0 %v47_v6  ;;  %v89_v31 = vsel %vm43_vm0, %v847_v29, 0.0 }
   0x8   :  { %72 = vadd.xlane.f32.xlu1 %v71_v7 }
   0xb   :  { %51 = vadd.xlane.f32.xlu0 %v50_v10 }
   0xc   :  { %54 = vadd.xlane.f32.xlu1 %v53_v11 }
   0xf   :  { %75 = vadd.xlane.f32.xlu0 %v74_v14 }
  0x10   :  { %78 = vadd.xlane.f32.xlu1 %v77_v15 }
  0x13   :  { %57 = vadd.xlane.f32.xlu0 %v56_v18 }
  0x14   :  { %60 = vadd.xlane.f32.xlu1 %v59_v19 }
  0x17   :  { %81 = vadd.xlane.f32.xlu0 %v80_v22 }
  0x18   :  { %84 = vadd.xlane.f32.xlu1 %v83_v23 }
  0x1b   :  { %63 = vadd.xlane.f32.xlu0 %v62_v26 }
  0x1c   :  { %66 = vadd.xlane.f32.xlu1 %v65_v27 }
  0x1f   :  { %87 = vadd.xlane.f32.xlu0 %v86_v30 }
  0x20   :  { %90 = vadd.xlane.f32.xlu1 %v89_v31 }
  0x8c   :  { %v46_v32 = vpop.xlane.xlu0 %45 }
  0x8d   :  { %v70_v33 = vpop.xlane.xlu1 %69  ;;  %v93_v34 = vmul.f32 0.03125, %v46_v32 }
  0x8e   :  { %v101_v35 = vmul.f32 0.03125, %v70_v33 }
  0x8f   :  { %v853_v36 = vsub.f32 %v25_v0, %v93_v34 }
  0x90   :  { %v855_v37 = vsub.f32 %v33_v1, %v101_v35  ;;  %v49_v38 = vpop.xlane.xlu0 %48 }
  0x91   :  { %v73_v39 = vpop.xlane.xlu1 %72  ;;  %v94_v40 = vmul.f32 0.03125, %v49_v38  ;;  %v125_v42 = vmul.f32 %v853_v36, %v853_v36 }
  0x92   :  { %v102_v41 = vmul.f32 0.03125, %v73_v39  ;;  %v133_v43 = vmul.f32 %v855_v37, %v855_v37 }
  0x93   :  { %v861_v44 = vsub.f32 %v26_v2, %v94_v40  ;;  %v141_v46 = vsel %vm43_vm0, %v125_v42, 0.0 }
  0x94   :  { %v863_v45 = vsub.f32 %v34_v5, %v102_v41  ;;  %142 = vadd.xlane.f32.xlu0 %v141_v46  ;;  %v52_v47 = vpop.xlane.xlu0 %51  ;;  %v165_v49 = vsel %vm43_vm0, %v133_v43, 0.0 }
  0x95   :  { %v55_v48 = vpop.xlane.xlu1 %54  ;;  %v95_v50 = vmul.f32 0.03125, %v52_v47  ;;  %v126_v52 = vmul.f32 %v861_v44, %v861_v44 }
  0x96   :  { %v96_v51 = vmul.f32 0.03125, %v55_v48  ;;  %v134_v53 = vmul.f32 %v863_v45, %v863_v45 }
  0x97   :  { %v871_v54 = vsub.f32 %v27_v8, %v95_v50  ;;  %v144_v56 = vsel %vm43_vm0, %v126_v52, 0.0 }
  0x98   :  { %v873_v55 = vsub.f32 %v28_v9, %v96_v51  ;;  %166 = vadd.xlane.f32.xlu0 %v165_v49  ;;  %145 = vadd.xlane.f32.xlu1 %v144_v56  ;;  %v76_v57 = vpop.xlane.xlu0 %75  ;;  %v168_v59 = vsel %vm43_vm0, %v134_v53, 0.0  ;;  %v689_v53 = vld [vmem:[%s1099_s3] sm:$0xff]  }
  0x99   :  { %v79_v58 = vpop.xlane.xlu1 %78  ;;  %v103_v60 = vmul.f32 0.03125, %v76_v57  ;;  %v127_v62 = vmul.f32 %v871_v54, %v871_v54 }
  0x9a   :  { %v104_v61 = vmul.f32 0.03125, %v79_v58  ;;  %v128_v63 = vmul.f32 %v873_v55, %v873_v55 }
  0x9b   :  { %v882_v0 = vsub.f32 %v786_v12, %v103_v60  ;;  %v147_v2 = vsel %vm43_vm0, %v127_v62, 0.0 }
  0x9c   :  { %v885_v1 = vsub.f32 %v791_v13, %v104_v61  ;;  %169 = vadd.xlane.f32.xlu1 %v168_v59  ;;  %148 = vadd.xlane.f32.xlu0 %v147_v2  ;;  %v58_v3 = vpop.xlane.xlu0 %57  ;;  %v150_v5 = vsel %vm43_vm0, %v128_v63, 0.0 }
  0x9d   :  { %v61_v4 = vpop.xlane.xlu1 %60  ;;  %v97_v6 = vmul.f32 0.03125, %v58_v3  ;;  %v135_v8 = vmul.f32 %v882_v0, %v882_v0 }
  0x9e   :  { %v98_v7 = vmul.f32 0.03125, %v61_v4  ;;  %v136_v9 = vmul.f32 %v885_v1, %v885_v1 }
  0x9f   :  { %v894_v10 = vsub.f32 %v800_v16, %v97_v6  ;;  %v171_v12 = vsel %vm43_vm0, %v135_v8, 0.0 }
  0xa0   :  { %v897_v11 = vsub.f32 %v805_v17, %v98_v7  ;;  %151 = vadd.xlane.f32.xlu1 %v150_v5  ;;  %172 = vadd.xlane.f32.xlu0 %v171_v12  ;;  %v82_v13 = vpop.xlane.xlu0 %81  ;;  %v174_v15 = vsel %vm43_vm0, %v136_v9, 0.0 }
  0xa1   :  { %v85_v14 = vpop.xlane.xlu1 %84  ;;  %v105_v18 = vmul.f32 0.03125, %v82_v13  ;;  %v129_v22 = vmul.f32 %v894_v10, %v894_v10 }
  0xa2   :  { %v106_v19 = vmul.f32 0.03125, %v85_v14  ;;  %v130_v16 = vmul.f32 %v897_v11, %v897_v11 }
  0xa3   :  { %v906_v23 = vsub.f32 %v814_v20, %v105_v18  ;;  %v153_v26 = vsel %vm43_vm0, %v129_v22, 0.0 }
  0xa4   :  { %v909_v17 = vsub.f32 %v819_v21, %v106_v19  ;;  %175 = vadd.xlane.f32.xlu1 %v174_v15  ;;  %154 = vadd.xlane.f32.xlu0 %v153_v26  ;;  %v64_v27 = vpop.xlane.xlu0 %63  ;;  %v156_v31 = vsel %vm43_vm0, %v130_v16, 0.0 }
  0xa5   :  { %v67_v30 = vpop.xlane.xlu1 %66  ;;  %v99_v32 = vmul.f32 0.03125, %v64_v27  ;;  %v137_v34 = vmul.f32 %v906_v23, %v906_v23 }
  0xa6   :  { %v100_v33 = vmul.f32 0.03125, %v67_v30  ;;  %v138_v20 = vmul.f32 %v909_v17, %v909_v17  ;;  %v952_v30 = vld [vmem:[%s1100_s1] ss:$0 sm:$0xff] }
  0xa7   :  { %v918_v35 = vsub.f32 %v828_v24, %v99_v32  ;;  %v177_v38 = vsel %vm43_vm0, %v137_v34, 0.0  ;;  %v958_v34 = vld [vmem:[%s1101_s2] ss:$0 sm:$0xff] }
  0xa8   :  { %v921_v21 = vsub.f32 %v833_v25, %v100_v33  ;;  %157 = vadd.xlane.f32.xlu1 %v156_v31  ;;  %178 = vadd.xlane.f32.xlu0 %v177_v38  ;;  %v88_v39 = vpop.xlane.xlu0 %87  ;;  %v180_v41 = vsel %vm43_vm0, %v138_v20, 0.0 }
  0xa9   :  { %v91_v40 = vpop.xlane.xlu1 %90  ;;  %v107_v42 = vmul.f32 0.03125, %v88_v39  ;;  %v131_v46 = vmul.f32 %v918_v35, %v918_v35 }
  0xaa   :  { %v108_v43 = vmul.f32 0.03125, %v91_v40  ;;  %v132_v24 = vmul.f32 %v921_v21, %v921_v21 }
  0xab   :  { %v930_v47 = vsub.f32 %v842_v28, %v107_v42  ;;  %v159_v48 = vsel %vm43_vm0, %v131_v46, 0.0 }
  0xac   :  { %v933_v25 = vsub.f32 %v847_v29, %v108_v43  ;;  %181 = vadd.xlane.f32.xlu1 %v180_v41  ;;  %160 = vadd.xlane.f32.xlu0 %v159_v48  ;;  %v162_v49 = vsel %vm43_vm0, %v132_v24, 0.0  ;;  %v687_v29 = vld [vmem:[%s1099_s3 + $0x8] sm:$0xff]  }
  0xad   :  { %v139_v50 = vmul.f32 %v930_v47, %v930_v47  ;;  %663 = vmatprep.subr.bf16.mxu0 %v687_v29  ;;  %683 = vmatprep.subr.bf16.mxu1 %v687_v29 }
  0xae   :  { %v140_v51 = vmul.f32 %v933_v25, %v933_v25  ;;  %664 = vmatpush3.bf16.msra.mxu0 %v687_v29  ;;  %685 = vmatpush3.bf16.msra.mxu1 %v687_v29 }
  0xaf   :  { %v183_v52 = vsel %vm43_vm0, %v139_v50, 0.0  ;;  %665 = vmatprep.subr.bf16.mxu0 %v689_v53  ;;  %684 = vmatprep.subr.bf16.mxu1 %v689_v53 }
  0xb0   :  { %163 = vadd.xlane.f32.xlu1 %v162_v49  ;;  %184 = vadd.xlane.f32.xlu0 %v183_v52  ;;  %v186_v28 = vsel %vm43_vm0, %v140_v51, 0.0 }
  0xb2   :  { %666 = vmatpush3.bf16.msra.mxu0 %v689_v53  ;;  %686 = vmatpush3.bf16.msra.mxu1 %v689_v53 }
  0xb4   :  { %187 = vadd.xlane.f32.xlu1 %v186_v28 }
 0x11d   :  { %v143_v56 = vpop.xlane.xlu0 %142 }
 0x11e   :  { %v189_v57 = vmul.f32 0.03125, %v143_v56 }
 0x120   :  { %v205_v58 = vadd.f32 1e-05, %v189_v57 }
 0x121   :  { %v146_v59 = vpop.xlane.xlu1 %145  ;;  %v167_v60 = vpop.xlane.xlu0 %166 }
 0x122   :  { %697 = vrsqrt.f32 %v205_v58  ;;  %v190_v61 = vmul.f32 0.03125, %v146_v59  ;;  %v197_v62 = vmul.f32 0.03125, %v167_v60 }
 0x124   :  { %v206_v63 = vadd.f32 1e-05, %v190_v61  ;;  %v213_v2 = vadd.f32 1e-05, %v197_v62 }
 0x125   :  { %v170_v3 = vpop.xlane.xlu1 %169  ;;  %v149_v4 = vpop.xlane.xlu0 %148 }
 0x126   :  { %699 = vrsqrt.f32 %v206_v63  ;;  %v198_v5 = vmul.f32 0.03125, %v170_v3  ;;  %v191_v6 = vmul.f32 0.03125, %v149_v4 }
 0x127   :  { %701 = vrsqrt.f32 %v213_v2 }
 0x128   :  { %v214_v7 = vadd.f32 1e-05, %v198_v5  ;;  %v207_v8 = vadd.f32 1e-05, %v191_v6 }
 0x129   :  { %v152_v9 = vpop.xlane.xlu1 %151  ;;  %v173_v12 = vpop.xlane.xlu0 %172 }
 0x12a   :  { %703 = vrsqrt.f32 %v214_v7  ;;  %v192_v13 = vmul.f32 0.03125, %v152_v9  ;;  %v199_v14 = vmul.f32 0.03125, %v173_v12 }
 0x12b   :  { %705 = vrsqrt.f32 %v207_v8 }
 0x12c   :  { %v208_v15 = vadd.f32 1e-05, %v192_v13  ;;  %v215_v18 = vadd.f32 1e-05, %v199_v14 }
 0x12d   :  { %v176_v19 = vpop.xlane.xlu1 %175  ;;  %v155_v22 = vpop.xlane.xlu0 %154 }
 0x12e   :  { %707 = vrsqrt.f32 %v208_v15  ;;  %v200_v16 = vmul.f32 0.03125, %v176_v19  ;;  %v193_v26 = vmul.f32 0.03125, %v155_v22 }
 0x12f   :  { %v698_v27 = vpop.eup %697  ;;  %709 = vrsqrt.f32 %v215_v18 }
 0x130   :  { %v237_v31 = vmul.f32 %v698_v27, %v853_v36  ;;  %v216_v32 = vadd.f32 1e-05, %v200_v16  ;;  %v209_v33 = vadd.f32 1e-05, %v193_v26 }
 0x131   :  { %v158_v20 = vpop.xlane.xlu1 %157  ;;  %v179_v38 = vpop.xlane.xlu0 %178 }
 0x132   :  { %v259_v39 = vmul.f32 %v952_v30, %v237_v31  ;;  %711 = vrsqrt.f32 %v216_v32  ;;  %v194_v40 = vmul.f32 0.03125, %v158_v20  ;;  %v201_v41 = vmul.f32 0.03125, %v179_v38 }
 0x133   :  { %v700_v42 = vpop.eup %699  ;;  %713 = vrsqrt.f32 %v209_v33 }
 0x134   :  { %v702_v43 = vpop.eup %701  ;;  %v281_v46 = vadd.f32 %v958_v34, %v259_v39  ;;  %v238_v36 = vmul.f32 %v700_v42, %v861_v44  ;;  %v210_v24 = vadd.f32 1e-05, %v194_v40  ;;  %v217_v48 = vadd.f32 1e-05, %v201_v41 }
 0x135   :  { %v245_v49 = vmul.f32 %v702_v43, %v855_v37  ;;  %v182_v50 = vpop.xlane.xlu1 %181  ;;  %v161_v51 = vpop.xlane.xlu0 %160 }
 0x136   :  { %v637_v52 = vpack.c.bf16 %v281_v46, %v281_v46  ;;  %v260_v28 = vmul.f32 %v952_v30, %v238_v36  ;;  %715 = vrsqrt.f32 %v210_v24  ;;  %v202_v29 = vmul.f32 0.03125, %v182_v50 }
 0x137   :  { %v704_v53 = vpop.eup %703  ;;  %v267_v56 = vmul.f32 %v952_v30, %v245_v49  ;;  %717 = vrsqrt.f32 %v217_v48  ;;  %v195_v57 = vmul.f32 0.03125, %v161_v51 }
 0x138   :  { %v706_v58 = vpop.eup %705  ;;  %362 = vst.msk [vmem:[#allocation2] sm:$0xf] %vm361_vm1, %v637_v52  ;;  %v282_v44 = vadd.f32 %v958_v34, %v260_v28  ;;  %v246_v59 = vmul.f32 %v704_v53, %v863_v45  ;;  %v218_v37 = vadd.f32 1e-05, %v202_v29 }
 0x139   :  { %v289_v60 = vadd.f32 %v958_v34, %v267_v56  ;;  %v239_v61 = vmul.f32 %v706_v58, %v871_v54  ;;  %v211_v62 = vadd.f32 1e-05, %v195_v57  ;;  %v164_v63 = vpop.xlane.xlu1 %163  ;;  %v185_v2 = vpop.xlane.xlu0 %184 }
 0x13a   :  { %v638_v3 = vpack.c.bf16 %v282_v44, %v282_v44  ;;  %v268_v4 = vmul.f32 %v952_v30, %v246_v59  ;;  %719 = vrsqrt.f32 %v218_v37  ;;  %v196_v5 = vmul.f32 0.03125, %v164_v63 }
 0x13b   :  { %v708_v6 = vpop.eup %707  ;;  %v645_v7 = vpack.c.bf16 %v289_v60, %v289_v60  ;;  %v261_v8 = vmul.f32 %v952_v30, %v239_v61  ;;  %721 = vrsqrt.f32 %v211_v62  ;;  %v203_v9 = vmul.f32 0.03125, %v185_v2 }
 0x13c   :  { %v710_v45 = vpop.eup %709  ;;  %363 = vst.msk [vmem:[#allocation2 + $0x4] sm:$0xf] %vm361_vm1, %v638_v3  ;;  %v290_v12 = vadd.f32 %v958_v34, %v268_v4  ;;  %v240_v54 = vmul.f32 %v708_v6, %v873_v55  ;;  %v212_v13 = vadd.f32 1e-05, %v196_v5 }
 0x13d   :  { %370 = vst.msk [vmem:[#allocation2 + $0x20] sm:$0xf] %vm361_vm1, %v645_v7  ;;  %v283_v14 = vadd.f32 %v958_v34, %v261_v8  ;;  %v247_v15 = vmul.f32 %v710_v45, %v882_v0  ;;  %v219_v18 = vadd.f32 1e-05, %v203_v9  ;;  %v188_v19 = vpop.xlane.xlu1 %187 }
 0x13e   :  { %v646_v22 = vpack.c.bf16 %v290_v12, %v290_v12  ;;  %v262_v16 = vmul.f32 %v952_v30, %v240_v54  ;;  %723 = vrsqrt.f32 %v212_v13  ;;  %v204_v26 = vmul.f32 0.03125, %v188_v19 }
 0x13f   :  { %v712_v27 = vpop.eup %711  ;;  %v639_v31 = vpack.c.bf16 %v283_v14, %v283_v14  ;;  %v269_v32 = vmul.f32 %v952_v30, %v247_v15  ;;  %725 = vrsqrt.f32 %v219_v18 }
 0x140   :  { %v714_v55 = vpop.eup %713  ;;  %371 = vst.msk [vmem:[#allocation2 + $0x24] sm:$0xf] %vm361_vm1, %v646_v22  ;;  %v284_v33 = vadd.f32 %v958_v34, %v262_v16  ;;  %v248_v20 = vmul.f32 %v712_v27, %v885_v1  ;;  %v220_v0 = vadd.f32 1e-05, %v204_v26 }
 0x141   :  { %364 = vst.msk [vmem:[#allocation2 + $0x8] sm:$0xf] %vm361_vm1, %v639_v31  ;;  %v291_v38 = vadd.f32 %v958_v34, %v269_v32  ;;  %v241_v39 = vmul.f32 %v714_v55, %v894_v10 }
 0x142   :  { %v640_v40 = vpack.c.bf16 %v284_v33, %v284_v33  ;;  %v270_v41 = vmul.f32 %v952_v30, %v248_v20  ;;  %727 = vrsqrt.f32 %v220_v0 }
 0x143   :  { %v716_v42 = vpop.eup %715  ;;  %v647_v43 = vpack.c.bf16 %v291_v38, %v291_v38  ;;  %v263_v46 = vmul.f32 %v952_v30, %v241_v39  ;;  %v688_v36 = vld [vmem:[#allocation2] sm:$0xff]  }
 0x144   :  { %v718_v24 = vpop.eup %717  ;;  %365 = vst.msk [vmem:[#allocation2 + $0xc] sm:$0xf] %vm361_vm1, %v640_v40  ;;  %v292_v1 = vadd.f32 %v958_v34, %v270_v41  ;;  %v242_v48 = vmul.f32 %v716_v42, %v897_v11  ;;  %667 = vmatprep.mubr.msk.bf16.mxu0 %vm43_vm0, %v688_v36 }
 0x145   :  { %372 = vst.msk [vmem:[#allocation2 + $0x28] sm:$0xf] %vm361_vm1, %v647_v43  ;;  %v285_v10 = vadd.f32 %v958_v34, %v263_v46  ;;  %v249_v49 = vmul.f32 %v718_v24, %v906_v23 }
 0x146   :  { %v648_v50 = vpack.c.bf16 %v292_v1, %v292_v1  ;;  %v264_v51 = vmul.f32 %v952_v30, %v242_v48 }
 0x147   :  { %v720_v52 = vpop.eup %719  ;;  %v641_v28 = vpack.c.bf16 %v285_v10, %v285_v10  ;;  %v271_v29 = vmul.f32 %v952_v30, %v249_v49  ;;  %v690_v53 = vld [vmem:[#allocation2 + $0x20] sm:$0xff]  }
 0x148   :  { %v722_v56 = vpop.eup %721  ;;  %373 = vst.msk [vmem:[#allocation2 + $0x2c] sm:$0xf] %vm361_vm1, %v648_v50  ;;  %v286_v11 = vadd.f32 %v958_v34, %v264_v51  ;;  %v250_v57 = vmul.f32 %v720_v52, %v909_v17  ;;  %675 = vmatprep.mubr.msk.bf16.mxu1 %vm43_vm0, %v690_v53 }
 0x149   :  { %366 = vst.msk [vmem:[#allocation2 + $0x10] sm:$0xf] %vm361_vm1, %v641_v28  ;;  %v293_v23 = vadd.f32 %v958_v34, %v271_v29  ;;  %v243_v58 = vmul.f32 %v722_v56, %v918_v35 }
 0x14a   :  { %v642_v44 = vpack.c.bf16 %v286_v11, %v286_v11  ;;  %v272_v59 = vmul.f32 %v952_v30, %v250_v57 }
 0x14b   :  { %v724_v37 = vpop.eup %723  ;;  %v649_v60 = vpack.c.bf16 %v293_v23, %v293_v23  ;;  %v265_v61 = vmul.f32 %v952_v30, %v243_v58  ;;  %v691_v62 = vld [vmem:[#allocation2 + $0x8] sm:$0xff]  }
 0x14c   :  { %v726_v63 = vpop.eup %725  ;;  %367 = vst.msk [vmem:[#allocation2 + $0x14] sm:$0xf] %vm361_vm1, %v642_v44  ;;  %v294_v17 = vadd.f32 %v958_v34, %v272_v59  ;;  %v244_v2 = vmul.f32 %v724_v37, %v921_v21  ;;  %668 = vmatmul.mubr.msk.bf16.vlgmr.msra.gmra.mxu0 %vm43_vm0, %v691_v62 }
 0x14d   :  { %374 = vst.msk [vmem:[#allocation2 + $0x30] sm:$0xf] %vm361_vm1, %v649_v60  ;;  %v287_v35 = vadd.f32 %v958_v34, %v265_v61  ;;  %v251_v3 = vmul.f32 %v726_v63, %v930_v47 }
 0x14e   :  { %v650_v4 = vpack.c.bf16 %v294_v17, %v294_v17  ;;  %v266_v5 = vmul.f32 %v952_v30, %v244_v2 }
 0x14f   :  { %v728_v6 = vpop.eup %727  ;;  %v643_v7 = vpack.c.bf16 %v287_v35, %v287_v35  ;;  %v273_v8 = vmul.f32 %v952_v30, %v251_v3  ;;  %v692_v9 = vld [vmem:[#allocation2 + $0x28] sm:$0xff]  }
 0x150   :  { %375 = vst.msk [vmem:[#allocation2 + $0x34] sm:$0xf] %vm361_vm1, %v650_v4  ;;  %v288_v21 = vadd.f32 %v958_v34, %v266_v5  ;;  %v252_v45 = vmul.f32 %v728_v6, %v933_v25  ;;  %676 = vmatmul.mubr.msk.bf16.vlgmr.msra.gmra.mxu1 %vm43_vm0, %v692_v9 }
 0x151   :  { %368 = vst.msk [vmem:[#allocation2 + $0x18] sm:$0xf] %vm361_vm1, %v643_v7  ;;  %v295_v47 = vadd.f32 %v958_v34, %v273_v8 }
 0x152   :  { %v644_v12 = vpack.c.bf16 %v288_v21, %v288_v21  ;;  %v274_v54 = vmul.f32 %v952_v30, %v252_v45 }
 0x153   :  { %v651_v13 = vpack.c.bf16 %v295_v47, %v295_v47  ;;  %v693_v14 = vld [vmem:[#allocation2 + $0x10] sm:$0xff]  }
 0x154   :  { %369 = vst.msk [vmem:[#allocation2 + $0x1c] sm:$0xf] %vm361_vm1, %v644_v12  ;;  %v296_v15 = vadd.f32 %v958_v34, %v274_v54  ;;  %671 = vmatprep.mubr.msk.bf16.mxu0 %vm43_vm0, %v693_v14  ;;  %v618_v34 = vld [vmem:[%s1102_s4] ss:$0 sm:$0xff] }
 0x155   :  { %376 = vst.msk [vmem:[#allocation2 + $0x38] sm:$0xf] %vm361_vm1, %v651_v13 }
 0x156   :  { %v652_v25 = vpack.c.bf16 %v296_v15, %v296_v15 }
 0x157   :  { %v694_v18 = vld [vmem:[#allocation2 + $0x30] sm:$0xff]  }
 0x158   :  { %377 = vst.msk [vmem:[#allocation2 + $0x3c] sm:$0xf] %vm361_vm1, %v652_v25  ;;  %679 = vmatprep.mubr.msk.bf16.mxu1 %vm43_vm0, %v694_v18 }
 0x15b   :  { %v695_v19 = vld [vmem:[#allocation2 + $0x18] sm:$0xff]  }
 0x15c   :  { %672 = vmatmul.mubr.msk.bf16.gmra.mxu0 %vm43_vm0, %v695_v19 }
 0x15f   :  { %v696_v30 = vld [vmem:[#allocation2 + $0x38] sm:$0xff]  }
 0x160   :  { %680 = vmatmul.mubr.msk.bf16.gmra.mxu1 %vm43_vm0, %v696_v30 }
 0x20c   :  { %v669_v22 = vpop.f32.mrf.mxu0 }
 0x20d   :  { %v525_v16 = vadd.f32 %v669_v22, %v618_v34 }
 0x20e   :  { %v516_v26 = vpop.f32.mrf.mxu0 }
 0x20f   :  { %582 = vst.msk [vmem:[%s1103_s5 + $0x10] sm:$0xff] %vm579_vm2, %v525_v16  ;;  %v517_v27 = vadd.f32 %v618_v34, %v516_v26 }
 0x210   :  { %v670_v31 = vpop.f32.mrf.mxu0  ;;  %v677_v32 = vpop.f32.mrf.mxu1 }
 0x211   :  { %580 = vst.msk [vmem:[%s1103_s5] sm:$0xff] %vm579_vm2, %v517_v27  ;;  %v528_v55 = vadd.f32 %v670_v31, %v618_v34  ;;  %v557_v33 = vadd.f32 %v677_v32, %v618_v34 }
 0x212   :  { %v519_v20 = vpop.f32.mrf.mxu0  ;;  %v548_v0 = vpop.f32.mrf.mxu1 }
 0x213   :  { %583 = vst.msk [vmem:[%s1103_s5 + $0x18] sm:$0xff] %vm579_vm2, %v528_v55  ;;  %590 = vst.msk [vmem:[%s1103_s5 + $0x50] sm:$0xff] %vm579_vm2, %v557_v33  ;;  %v520_v38 = vadd.f32 %v618_v34, %v519_v20  ;;  %v549_v39 = vadd.f32 %v618_v34, %v548_v0 }
 0x214   :  { %v678_v40 = vpop.f32.mrf.mxu1 }
 0x215   :  { %581 = vst.msk [vmem:[%s1103_s5 + $0x8] sm:$0xff] %vm579_vm2, %v520_v38  ;;  %588 = vst.msk [vmem:[%s1103_s5 + $0x40] sm:$0xff] %vm579_vm2, %v549_v39  ;;  %v560_v41 = vadd.f32 %v678_v40, %v618_v34 }
 0x216   :  { %v551_v42 = vpop.f32.mrf.mxu1 }
 0x217   :  { %591 = vst.msk [vmem:[%s1103_s5 + $0x58] sm:$0xff] %vm579_vm2, %v560_v41  ;;  %v552_v43 = vadd.f32 %v618_v34, %v551_v42 }
 0x219   :  { %589 = vst.msk [vmem:[%s1103_s5 + $0x48] sm:$0xff] %vm579_vm2, %v552_v43 }
 0x21c   :  { %v673_v46 = vpop.f32.mrf.mxu0 }
 0x21d   :  { %v541_v36 = vadd.f32 %v673_v46, %v618_v34 }
 0x21e   :  { %v532_v24 = vpop.f32.mrf.mxu0 }
 0x21f   :  { %586 = vst.msk [vmem:[%s1103_s5 + $0x30] sm:$0xff] %vm579_vm2, %v541_v36  ;;  %v533_v1 = vadd.f32 %v618_v34, %v532_v24 }
 0x220   :  { %v674_v48 = vpop.f32.mrf.mxu0  ;;  %v681_v10 = vpop.f32.mrf.mxu1 }
 0x221   :  { %584 = vst.msk [vmem:[%s1103_s5 + $0x20] sm:$0xff] %vm579_vm2, %v533_v1  ;;  %v544_v49 = vadd.f32 %v674_v48, %v618_v34  ;;  %v573_v50 = vadd.f32 %v681_v10, %v618_v34 }
 0x222   :  { %v535_v51 = vpop.f32.mrf.mxu0  ;;  %v564_v52 = vpop.f32.mrf.mxu1 }
 0x223   :  { %587 = vst.msk [vmem:[%s1103_s5 + $0x38] sm:$0xff] %vm579_vm2, %v544_v49  ;;  %594 = vst.msk [vmem:[%s1103_s5 + $0x70] sm:$0xff] %vm579_vm2, %v573_v50  ;;  %v536_v28 = vadd.f32 %v618_v34, %v535_v51  ;;  %v565_v29 = vadd.f32 %v618_v34, %v564_v52 }
 0x224   :  { %v682_v53 = vpop.f32.mrf.mxu1 }
 0x225   :  { %585 = vst.msk [vmem:[%s1103_s5 + $0x28] sm:$0xff] %vm579_vm2, %v536_v28  ;;  %592 = vst.msk [vmem:[%s1103_s5 + $0x60] sm:$0xff] %vm579_vm2, %v565_v29  ;;  %v576_v56 = vadd.f32 %v682_v53, %v618_v34 }
 0x226   :  { %v567_v11 = vpop.f32.mrf.mxu1 }
 0x227   :  { %595 = vst.msk [vmem:[%s1103_s5 + $0x78] sm:$0xff] %vm579_vm2, %v576_v56  ;;  %v568_v57 = vadd.f32 %v618_v34, %v567_v11 }
 0x229   :  { %593 = vst.msk [vmem:[%s1103_s5 + $0x68] sm:$0xff] %vm579_vm2, %v568_v57 }

</bundles_post_ra>
